<compile_context>
chip_gen: v7x
topology: tpu7x:2x2x1
jax: 0.10.0
libtpu: 0.0.40
codegen_flags: <defaults>
</compile_context>

<pallas_src>
import functools

import jax
import jax.numpy as jnp
from jax import lax
from jax.experimental import pallas as pl
from jax.experimental.pallas import tpu as pltpu


# ---------------------------------------------------------------------------
# Kernel 1: 3x3 conv (as im2col matmul) + bias + ReLU.
# grid=(2,): one step per modality; batch folded onto the lane axis.
# ---------------------------------------------------------------------------

def _conv_kernel(x_ref, w_ref, b_ref, o_ref):
    # x:(1,K,N) bf16  w:(1,C,K) bf16  b:(1,C,1) f32  ->  o:(1,C,N) f32
    acc = jnp.dot(w_ref[0], x_ref[0], preferred_element_type=jnp.float32)
    o_ref[0] = jnp.maximum(acc + b_ref[0], 0.0)


def conv3x3_relu(patches_bf16, w_bf16, b_f32):
    G, K, N = patches_bf16.shape
    C = w_bf16.shape[1]
    cost = pl.CostEstimate(
        flops=int(2 * G * C * K * N), transcendentals=0,
        bytes_accessed=int((G * K * N + G * C * K) * 2 + G * C * 4
                           + G * C * N * 4))
    return pl.pallas_call(
        _conv_kernel,
        out_shape=jax.ShapeDtypeStruct((G, C, N), jnp.float32),
        grid=(G,),
        in_specs=[
            pl.BlockSpec((1, K, N), lambda g: (g, 0, 0)),
            pl.BlockSpec((1, C, K), lambda g: (g, 0, 0)),
            pl.BlockSpec((1, C, 1), lambda g: (g, 0, 0)),
        ],
        out_specs=pl.BlockSpec((1, C, N), lambda g: (g, 0, 0)),
        compiler_params=pltpu.CompilerParams(
            dimension_semantics=("parallel",)),
        cost_estimate=cost,
    )(patches_bf16, w_bf16, b_f32)


# ---------------------------------------------------------------------------
# Kernel 2: MSC 1x1 conv + ReLU, 3-way split weights (no 3C concat in HBM).
# grid=(2,): one step per modality; batch folded onto the lane axis.
# ---------------------------------------------------------------------------

def _msc_kernel(x0_ref, x1_ref, x2_ref, w0_ref, w1_ref, w2_ref, b_ref, o_ref):
    acc = jnp.dot(w0_ref[0], x0_ref[0], preferred_element_type=jnp.float32)
    acc = acc + jnp.dot(w1_ref[0], x1_ref[0], preferred_element_type=jnp.float32)
    acc = acc + jnp.dot(w2_ref[0], x2_ref[0], preferred_element_type=jnp.float32)
    o_ref[0] = jnp.maximum(acc + b_ref[0], 0.0)


def msc_1x1_relu(x0, x1, x2, w0, w1, w2, b_f32):
    G, C, N = x0.shape
    cost = pl.CostEstimate(
        flops=int(6 * G * C * C * N), transcendentals=0,
        bytes_accessed=int((3 * G * C * N + 3 * G * C * C) * 2
                           + G * C * 4 + G * C * N * 4))
    act = pl.BlockSpec((1, C, N), lambda g: (g, 0, 0))
    wsp = pl.BlockSpec((1, C, C), lambda g: (g, 0, 0))
    return pl.pallas_call(
        _msc_kernel,
        out_shape=jax.ShapeDtypeStruct((G, C, N), jnp.float32),
        grid=(G,),
        in_specs=[act, act, act, wsp, wsp, wsp,
                  pl.BlockSpec((1, C, 1), lambda g: (g, 0, 0))],
        out_specs=act,
        compiler_params=pltpu.CompilerParams(
            dimension_semantics=("parallel",)),
        cost_estimate=cost,
    )(x0, x1, x2, w0, w1, w2, b_f32)


# ---------------------------------------------------------------------------
# Kernel 3: fused qkv projection + both cross-attention directions +
# (rgb_W/t_W folded) gate softmax + gated residual + ReLU.  grid=(B,).
# ---------------------------------------------------------------------------

def _attn_tail_kernel(mfeat_ref, mfeatT_ref, feat_ref,
                      wq_ref, bq_ref, wkv_ref, bkv_ref, gw_ref, gb_ref,
                      nrgb_ref, nt_ref, nsh_ref, *, nsplit, scale):
    f32 = jnp.float32
    bf16 = jnp.bfloat16
    HW = mfeat_ref.shape[-1]
    Np = HW // nsplit

    def qkv(mod):
        x = mfeat_ref[mod]                                    # (C, HW)  bf16
        xT = mfeatT_ref[mod]                                  # (HW, C)  bf16
        # query is produced directly transposed (HW, oc): the score matmul
        # becomes plain NN — no in-kernel transpose / transposed-LHS dot.
        qT = jnp.dot(xT, wq_ref[mod], preferred_element_type=f32) + bq_ref[mod]
        qT = jnp.maximum(qT, 0.0)                             # BN folded + ReLU
        k = (jnp.dot(wkv_ref[mod, 0], x, preferred_element_type=f32)
             + bkv_ref[mod, 0])
        k = jnp.maximum(k, 0.0)                               # BN folded + ReLU
        v = (jnp.dot(wkv_ref[mod, 1], x, preferred_element_type=f32)
             + bkv_ref[mod, 1])                               # no ReLU on value
        return qT, k, v

    r_qT, r_k, r_v = qkv(0)
    t_qT, t_k, t_v = qkv(1)

    def cross(qT, k, v):
        # torch's (oc,HW) -> (adapt,Np) contiguous view is realised as
        # `nsplit` lane halves: scores = sum of NN matmuls over the halves,
        # context = lane-concat of NT matmuls.  No reshape/relayout needed.
        qTb = qT.astype(bf16)
        kb = k.astype(bf16)
        s = None
        for h in range(nsplit):
            qh = qTb[h * Np:(h + 1) * Np, :]                  # (Np, oc)
            kh = kb[:, h * Np:(h + 1) * Np]                   # (oc, Np)
            d = jnp.dot(qh, kh, preferred_element_type=f32)   # (Np, Np)
            s = d if s is None else s + d
        s = s * scale
        s = s - jnp.max(s, axis=-1, keepdims=True)
        p = jnp.exp(s)
        # exact reciprocal of the (Np,1) denominator (accuracy concern fix).
        p = p * (1.0 / jnp.sum(p, axis=-1, keepdims=True))
        pb = p.astype(bf16)
        vb = v.astype(bf16)
        parts = []
        for h in range(nsplit):
            vh = vb[:, h * Np:(h + 1) * Np]                   # (oc, Np)
            # ctx[:, h*Np + i] = sum_j vh[:, j] * p[i, j]
            parts.append(lax.dot_general(
                vh, pb, (((1,), (1,)), ((), ())), preferred_element_type=f32))
        return parts[0] if nsplit == 1 else jnp.concatenate(parts, axis=-1)

    ctx_r = cross(t_qT, r_k, r_v)      # RGB_context (pre rgb_W),  (oc, HW) f32
    ctx_t = cross(r_qT, t_k, t_v)      # T_context   (pre t_W)

    # Gate logits: rgb_W / t_W were composed into gw/gb at trace time (their
    # outputs feed nothing but the gates, so they never materialize).
    logits = (jnp.dot(gw_ref[0], ctx_r, preferred_element_type=f32)
              + jnp.dot(gw_ref[1], ctx_t, preferred_element_type=f32)
              + gb_ref[...])                                  # (2, HW)
    g_rgb = logits[0:1, :]
    g_t = logits[1:2, :]
    m = jnp.maximum(g_rgb, g_t)
    e_rgb = jnp.exp(g_rgb - m)
    e_t = jnp.exp(g_t - m)
    inv = 1.0 / (e_rgb + e_t)                                 # exact (1,HW) divide
    rgb = feat_ref[0]                                         # (C, HW) f32
    t = feat_ref[1]
    shared = rgb * (e_rgb * inv) + t * (e_t * inv)
    nsh_ref[0] = shared
    nrgb_ref[0] = jnp.maximum((rgb + shared) * 0.5, 0.0)
    nt_ref[0] = jnp.maximum((t + shared) * 0.5, 0.0)


def attn_fuse_tail(m_feat_bf16, m_featT_bf16, feat_f32,
                   wq, bq, wkv, bkv, gw, gb, *, B, HW, nsplit, scale):
    G, C, _ = feat_f32.shape
    oc = wq.shape[-1]
    Np = HW // nsplit
    flops = int(B * (2 * 3 * (2 * oc * C * HW)
                     + 2 * nsplit * 2 * (2 * oc * Np * Np)
                     + 2 * (2 * 2 * oc * HW)))
    trans = int(B * (2 * Np * Np + 2 * HW))
    bytes_acc = int((m_feat_bf16.size + m_featT_bf16.size
                     + wq.size + wkv.size) * 2
                    + (feat_f32.size + bq.size + bkv.size
                       + gw.size + gb.size) * 4
                    + 3 * B * C * HW * 4)
    cost = pl.CostEstimate(flops=flops, transcendentals=trans,
                           bytes_accessed=bytes_acc)

    per_b_chw = pl.BlockSpec((G, C, HW), lambda b: (0, 0, b))
    per_b_hwc = pl.BlockSpec((G, HW, C), lambda b: (0, b, 0))
    out_spec = pl.BlockSpec((1, C, HW), lambda b: (b, 0, 0))

    def full(a):
        return pl.BlockSpec(a.shape, lambda b: (0,) * a.ndim)

    out_sd = jax.ShapeDtypeStruct((B, C, HW), jnp.float32)
    return pl.pallas_call(
        functools.partial(_attn_tail_kernel, nsplit=nsplit, scale=scale),
        out_shape=(out_sd, out_sd, out_sd),
        grid=(B,),
        in_specs=[per_b_chw, per_b_hwc, per_b_chw,
                  full(wq), full(bq), full(wkv), full(bkv), full(gw), full(gb)],
        out_specs=(out_spec, out_spec, out_spec),
        compiler_params=pltpu.CompilerParams(
            dimension_semantics=("parallel",)),
        cost_estimate=cost,
    )(m_feat_bf16, m_featT_bf16, feat_f32, wq, bq, wkv, bkv, gw, gb)


# ---------------------------------------------------------------------------
# JAX glue: im2col, pooling, nearest resize, BN folding (pure data movement)
# ---------------------------------------------------------------------------

def im2col_3x3(x):
    """x: (..., C, H, W) -> (..., C*9, H*W), row index = c*9 + kh*3 + kw."""
    lead = x.shape[:-3]
    C, H, W = x.shape[-3:]
    pad = [(0, 0)] * len(lead) + [(0, 0), (1, 1), (1, 1)]
    xp = jnp.pad(x, pad)
    cols = [xp[..., kh:kh + H, kw:kw + W] for kh in range(3) for kw in range(3)]
    pat = jnp.stack(cols, axis=-3)                 # (..., C, 9, H, W)
    return pat.reshape(*lead, C * 9, H * W)


def maxpool(x, k):
    *lead, H, W = x.shape
    return x.reshape(*lead, H // k, k, W // k, k).max(axis=(-3, -1))


def upsample_nearest(x, k):
    return jnp.repeat(jnp.repeat(x, k, axis=-2), k, axis=-1)


def fold_bn_1x1(w, b, gamma, beta, mean, var, eps=1e-5):
    scale = gamma / jnp.sqrt(var + eps)
    return w * scale[:, None], (b - mean) * scale + beta


# ---------------------------------------------------------------------------
# Block forward
# ---------------------------------------------------------------------------

def block_forward(params, RGB, T, L):
    B, Cin, H, W = RGB.shape
    HW = H * W
    N = B * HW
    f32, bf16 = jnp.float32, jnp.bfloat16
    C = params["rgb_conv_w"].shape[0]
    oc = C // 2
    adapt = (2 ** L) * oc
    nsplit = adapt // oc                       # = 2**L
    # TODO(synk): the lane-half attention layout assumes HW % nsplit == 0
    # (true for the reference config); general L needs padded-Np handling.

    # ---- 3x3 conv + ReLU: one Pallas step per modality, batch on lanes ----
    x = jnp.stack([RGB, T], axis=0).astype(f32)               # (2,B,Cin,H,W)
    patches = im2col_3x3(x)                                    # (2,B,Cin*9,HW)
    patches = jnp.transpose(patches, (0, 2, 1, 3)).reshape(2, Cin * 9, N)
    w3 = jnp.stack([params["rgb_conv_w"].reshape(C, Cin * 9),
                    params["t_conv_w"].reshape(C, Cin * 9)], 0).astype(bf16)
    b3 = jnp.stack([params["rgb_conv_b"], params["t_conv_b"]], 0)
    b3 = b3.reshape(2, C, 1).astype(f32)
    # TODO(synk): im2col is materialized in JAX (tiny here); at large H,W,C
    # replace with an in-kernel 9-shifted-matmul accumulation.
    feat = conv3x3_relu(patches.astype(bf16), w3, b3)          # (2, C, N) f32

    # ---- MSC: pool/resize glue in JAX, split 1x1 conv + ReLU in Pallas -----
    feat_img = feat.reshape(2, C, B, H, W)
    up2 = upsample_nearest(maxpool(feat_img, 2), 2).reshape(2, C, N)
    up4 = upsample_nearest(maxpool(feat_img, 4), 4).reshape(2, C, N)
    # TODO(synk): the 2x/4x pool + nearest-resize could move inside the MSC
    # kernel to avoid two small HBM round trips.
    wm = jnp.stack([params["rgb_msc_w"], params["t_msc_w"]], 0)   # (2, C, 3C)
    bm = jnp.stack([params["rgb_msc_b"], params["t_msc_b"]], 0)
    m_feat = msc_1x1_relu(
        feat.astype(bf16), up2.astype(bf16), up4.astype(bf16),
        wm[:, :, :C].astype(bf16), wm[:, :, C:2 * C].astype(bf16),
        wm[:, :, 2 * C:].astype(bf16),
        bm.reshape(2, C, 1).astype(f32))                       # (2, C, N) f32

    # ---- q/k/v weights (eval BatchNorm folded into query/key convs) --------
    rq_w, rq_b = fold_bn_1x1(params["rgb_query_w"], params["rgb_query_b"],
                             *params["rgb_query_bn"])
    rk_w, rk_b = fold_bn_1x1(params["rgb_key_w"], params["rgb_key_b"],
                             *params["rgb_key_bn"])
    tq_w, tq_b = fold_bn_1x1(params["t_query_w"], params["t_query_b"],
                             *params["t_query_bn"])
    tk_w, tk_b = fold_bn_1x1(params["t_key_w"], params["t_key_b"],
                             *params["t_key_bn"])
    wq = jnp.stack([rq_w.T, tq_w.T], 0).astype(bf16)           # (2, C, oc)
    bq = jnp.stack([rq_b, tq_b], 0).reshape(2, 1, oc).astype(f32)
    wkv = jnp.stack([jnp.stack([rk_w, params["rgb_value_w"]], 0),
                     jnp.stack([tk_w, params["t_value_w"]], 0)], 0).astype(bf16)
    bkv = jnp.stack([jnp.stack([rk_b, params["rgb_value_b"]], 0),
                     jnp.stack([tk_b, params["t_value_b"]], 0)], 0)
    bkv = bkv.reshape(2, 2, oc, 1).astype(f32)

    # ---- gate weights with rgb_W / t_W composed in at trace time ----------
    # Reference cat_fea channel order is [T_context_W, RGB_context_W].
    gw_full = jnp.concatenate([params["gate_rgb_w"], params["gate_t_w"]], 0)
    gbias = jnp.stack([params["gate_rgb_b"], params["gate_t_b"]], 0).reshape(2, 1)
    gw_on_t, gw_on_r = gw_full[:, :C], gw_full[:, C:]
    gw = jnp.stack([gw_on_r @ params["rgb_W_w"],               # applied to ctx_r
                    gw_on_t @ params["t_W_w"]], 0).astype(f32)  # (2, 2, oc)
    gb = (gw_on_t @ params["t_W_b"][:, None]
          + gw_on_r @ params["rgb_W_b"][:, None] + gbias).astype(f32)  # (2, 1)

    # ---- fused qkv + cross-attention (both dirs) + gates + residual --------
    m_featT = jnp.swapaxes(m_feat, 1, 2)                       # (2, N, C)
    new_rgb, new_t, new_sh = attn_fuse_tail(
        m_feat.astype(bf16), m_featT.astype(bf16), feat,
        wq, bq, wkv, bkv, gw, gb,
        B=B, HW=HW, nsplit=nsplit, scale=float(adapt) ** (-0.5))

    shape4 = (B, C, H, W)
    return (new_rgb.reshape(shape4), new_t.reshape(shape4),
            new_sh.reshape(shape4))


# ---------------------------------------------------------------------------
# Deterministic parameter initialization (fresh synthetic weights)
# ---------------------------------------------------------------------------

def init_params(key, in_channels, channels):
    oc = channels // 2
    keys = iter(jax.random.split(key, 40))

    def nrm(shape, s=0.1):
        return jax.random.normal(next(keys), shape, jnp.float32) * s

    bn_default = (jnp.ones((oc,), jnp.float32),   # gamma
                  jnp.zeros((oc,), jnp.float32),  # beta
                  jnp.zeros((oc,), jnp.float32),  # running_mean
                  jnp.ones((oc,), jnp.float32))   # running_var

    p = {
        "rgb_conv_w": nrm((channels, in_channels, 3, 3)),
        "rgb_conv_b": nrm((channels,), 0.01),
        "t_conv_w": nrm((channels, in_channels, 3, 3)),
        "t_conv_b": nrm((channels,), 0.01),
        "rgb_msc_w": nrm((channels, 3 * channels)),
        "rgb_msc_b": nrm((channels,), 0.01),
        "t_msc_w": nrm((channels, 3 * channels)),
        "t_msc_b": nrm((channels,), 0.01),
        "rgb_query_w": nrm((oc, channels)), "rgb_query_b": nrm((oc,), 0.01),
        "rgb_key_w": nrm((oc, channels)),   "rgb_key_b": nrm((oc,), 0.01),
        "rgb_value_w": nrm((oc, channels)), "rgb_value_b": nrm((oc,), 0.01),
        "rgb_W_w": nrm((channels, oc)),     "rgb_W_b": nrm((channels,), 0.01),
        "t_query_w": nrm((oc, channels)),   "t_query_b": nrm((oc,), 0.01),
        "t_key_w": nrm((oc, channels)),     "t_key_b": nrm((oc,), 0.01),
        "t_value_w": nrm((oc, channels)),   "t_value_b": nrm((oc,), 0.01),
        "t_W_w": nrm((channels, oc)),       "t_W_b": nrm((channels,), 0.01),
        "gate_rgb_w": nrm((1, 2 * channels)), "gate_rgb_b": nrm((1,), 0.01),
        "gate_t_w": nrm((1, 2 * channels)),   "gate_t_b": nrm((1,), 0.01),
        "rgb_query_bn": bn_default, "rgb_key_bn": bn_default,
        "t_query_bn": bn_default,   "t_key_bn": bn_default,
    }
    return p


# ---------------------------------------------------------------------------
# Main
# ---------------------------------------------------------------------------

if __name__ == "__main__":
    # Block(cfg=[8], in_channels=3, L=1, first_block=True, dilation_rate=1)
    B, Cin, H, W = 2, 3, 16, 16
    cfg0_channels = 8
    L = 1

    key = jax.random.PRNGKey(0)
    k_params, k_rgb, k_t = jax.random.split(key, 3)
    params = init_params(k_params, Cin, cfg0_channels)

    RGB = jax.random.normal(k_rgb, (B, Cin, H, W), jnp.float32)
    T = jax.random.normal(k_t, (B, Cin, H, W), jnp.float32)

    fwd = jax.jit(functools.partial(block_forward, L=L))
    new_RGB, new_T, new_shared = fwd(params, RGB, T)
    jax.block_until_ready((new_RGB, new_T, new_shared))

    assert new_RGB.shape == (B, cfg0_channels, H, W)
    assert new_T.shape == (B, cfg0_channels, H, W)
    assert new_shared.shape == (B, cfg0_channels, H, W)
    assert bool(jnp.all(jnp.isfinite(new_RGB)))
    assert bool(jnp.all(jnp.isfinite(new_T)))
    assert bool(jnp.all(jnp.isfinite(new_shared)))
    print("KERNEL_OK")
</pallas_src>

<mosaic_0001>
module attributes {stable_mosaic.version = 11 : i64} {
  func.func @_conv_kernel(%arg0: i32, %arg1: memref<1x27x512xbf16, #tpu.memory_space<vmem>>, %arg2: memref<1x8x27xbf16, #tpu.memory_space<vmem>>, %arg3: memref<1x8x1xf32, #tpu.memory_space<vmem>>, %arg4: memref<1x8x512xf32, #tpu.memory_space<vmem>>) attributes {dimension_semantics = [#tpu.dimension_semantics<parallel>], iteration_bounds = array<i64: 2>, scalar_prefetch = 0 : i64, scratch_operands = 0 : i64, tpu.core_type = #tpu.core_type<tc>, window_params = [{transform_indices = @transform_0, window_bounds = array<i64: 1, 27, 512>}, {transform_indices = @transform_1, window_bounds = array<i64: 1, 8, 27>}, {transform_indices = @transform_2, window_bounds = array<i64: 1, 8, 1>}, {transform_indices = @transform_3, window_bounds = array<i64: 1, 8, 512>}]} {
    %c0 = arith.constant 0 : index
    %c0_0 = arith.constant 0 : index
    %c0_1 = arith.constant 0 : index
    %0 = vector.load %arg2[%c0, %c0_0, %c0_1] : memref<1x8x27xbf16, #tpu.memory_space<vmem>>, vector<1x8x27xbf16>
    %1 = vector.shape_cast %0 : vector<1x8x27xbf16> to vector<8x27xbf16>
    %c0_2 = arith.constant 0 : index
    %c0_3 = arith.constant 0 : index
    %c0_4 = arith.constant 0 : index
    %2 = vector.load %arg1[%c0_2, %c0_3, %c0_4] : memref<1x27x512xbf16, #tpu.memory_space<vmem>>, vector<1x27x512xbf16>
    %3 = vector.shape_cast %2 : vector<1x27x512xbf16> to vector<27x512xbf16>
    %cst = arith.constant dense<0.000000e+00> : vector<8x512xf32>
    %4 = tpu.matmul %1, %3, %cst {dimension_numbers = #tpu.dot_dimension_numbers<[1], [0], [0], [1], [0, 0, 1, 1], [], []>} : vector<8x27xbf16>, vector<27x512xbf16>, vector<8x512xf32> -> vector<8x512xf32>
    %c0_5 = arith.constant 0 : index
    %c0_6 = arith.constant 0 : index
    %c0_7 = arith.constant 0 : index
    %5 = vector.load %arg3[%c0_5, %c0_6, %c0_7] : memref<1x8x1xf32, #tpu.memory_space<vmem>>, vector<1x8x1xf32>
    %6 = vector.shape_cast %5 : vector<1x8x1xf32> to vector<8x1xf32>
    %7 = vector.broadcast %6 : vector<8x1xf32> to vector<8x512xf32>
    %8 = arith.addf %4, %7 : vector<8x512xf32>
    %cst_8 = arith.constant 0.000000e+00 : f32
    %9 = vector.broadcast %cst_8 : f32 to vector<8x512xf32>
    %10 = arith.maximumf %8, %9 : vector<8x512xf32>
    %c0_9 = arith.constant 0 : index
    %c0_10 = arith.constant 0 : index
    %c0_11 = arith.constant 0 : index
    %11 = vector.load %arg4[%c0_9, %c0_10, %c0_11] : memref<1x8x512xf32, #tpu.memory_space<vmem>>, vector<1x8x512xf32>
    %12 = vector.shape_cast %11 : vector<1x8x512xf32> to vector<8x512xf32>
    %13 = vector.shape_cast %10 : vector<8x512xf32> to vector<1x8x512xf32>
    tpu.vector_store %arg4[%c0_9, %c0_10, %c0_11], %13 {strides = array<i32>} : memref<1x8x512xf32, #tpu.memory_space<vmem>>, vector<1x8x512xf32>,
    return
  }
  func.func @transform_0(%arg0: i32) -> (i32, i32, i32) {
    %c0_i32 = arith.constant 0 : i32
    %c0_i32_0 = arith.constant 0 : i32
    %c0_i32_1 = arith.constant 0 : i32
    return %arg0, %c0_i32, %c0_i32_0 : i32, i32, i32
  }
  func.func @transform_1(%arg0: i32) -> (i32, i32, i32) {
    %c0_i32 = arith.constant 0 : i32
    %c0_i32_0 = arith.constant 0 : i32
    %c0_i32_1 = arith.constant 0 : i32
    return %arg0, %c0_i32, %c0_i32_0 : i32, i32, i32
  }
  func.func @transform_2(%arg0: i32) -> (i32, i32, i32) {
    %c0_i32 = arith.constant 0 : i32
    %c0_i32_0 = arith.constant 0 : i32
    %c0_i32_1 = arith.constant 0 : i32
    return %arg0, %c0_i32, %c0_i32_0 : i32, i32, i32
  }
  func.func @transform_3(%arg0: i32) -> (i32, i32, i32) {
    %c0_i32 = arith.constant 0 : i32
    %c0_i32_0 = arith.constant 0 : i32
    %c0_i32_1 = arith.constant 0 : i32
    return %arg0, %c0_i32, %c0_i32_0 : i32, i32, i32
  }
}

module attributes {stable_mosaic.version = 11 : i64} {
  func.func @_msc_kernel(%arg0: i32, %arg1: memref<1x8x512xbf16, #tpu.memory_space<vmem>>, %arg2: memref<1x8x512xbf16, #tpu.memory_space<vmem>>, %arg3: memref<1x8x512xbf16, #tpu.memory_space<vmem>>, %arg4: memref<1x8x8xbf16, #tpu.memory_space<vmem>>, %arg5: memref<1x8x8xbf16, #tpu.memory_space<vmem>>, %arg6: memref<1x8x8xbf16, #tpu.memory_space<vmem>>, %arg7: memref<1x8x1xf32, #tpu.memory_space<vmem>>, %arg8: memref<1x8x512xf32, #tpu.memory_space<vmem>>) attributes {dimension_semantics = [#tpu.dimension_semantics<parallel>], iteration_bounds = array<i64: 2>, scalar_prefetch = 0 : i64, scratch_operands = 0 : i64, tpu.core_type = #tpu.core_type<tc>, window_params = [{transform_indices = @transform_0, window_bounds = array<i64: 1, 8, 512>}, {transform_indices = @transform_1, window_bounds = array<i64: 1, 8, 512>}, {transform_indices = @transform_2, window_bounds = array<i64: 1, 8, 512>}, {transform_indices = @transform_3, window_bounds = array<i64: 1, 8, 8>}, {transform_indices = @transform_4, window_bounds = array<i64: 1, 8, 8>}, {transform_indices = @transform_5, window_bounds = array<i64: 1, 8, 8>}, {transform_indices = @transform_6, window_bounds = array<i64: 1, 8, 1>}, {transform_indices = @transform_7, window_bounds = array<i64: 1, 8, 512>}]} {
    %c0 = arith.constant 0 : index
    %c0_0 = arith.constant 0 : index
    %c0_1 = arith.constant 0 : index
    %0 = vector.load %arg4[%c0, %c0_0, %c0_1] : memref<1x8x8xbf16, #tpu.memory_space<vmem>>, vector<1x8x8xbf16>
    %1 = vector.shape_cast %0 : vector<1x8x8xbf16> to vector<8x8xbf16>
    %c0_2 = arith.constant 0 : index
    %c0_3 = arith.constant 0 : index
    %c0_4 = arith.constant 0 : index
    %2 = vector.load %arg1[%c0_2, %c0_3, %c0_4] : memref<1x8x512xbf16, #tpu.memory_space<vmem>>, vector<1x8x512xbf16>
    %3 = vector.shape_cast %2 : vector<1x8x512xbf16> to vector<8x512xbf16>
    %cst = arith.constant dense<0.000000e+00> : vector<8x512xf32>
    %4 = tpu.matmul %1, %3, %cst {dimension_numbers = #tpu.dot_dimension_numbers<[1], [0], [0], [1], [0, 0, 1, 1], [], []>} : vector<8x8xbf16>, vector<8x512xbf16>, vector<8x512xf32> -> vector<8x512xf32>
    %c0_5 = arith.constant 0 : index
    %c0_6 = arith.constant 0 : index
    %c0_7 = arith.constant 0 : index
    %5 = vector.load %arg5[%c0_5, %c0_6, %c0_7] : memref<1x8x8xbf16, #tpu.memory_space<vmem>>, vector<1x8x8xbf16>
    %6 = vector.shape_cast %5 : vector<1x8x8xbf16> to vector<8x8xbf16>
    %c0_8 = arith.constant 0 : index
    %c0_9 = arith.constant 0 : index
    %c0_10 = arith.constant 0 : index
    %7 = vector.load %arg2[%c0_8, %c0_9, %c0_10] : memref<1x8x512xbf16, #tpu.memory_space<vmem>>, vector<1x8x512xbf16>
    %8 = vector.shape_cast %7 : vector<1x8x512xbf16> to vector<8x512xbf16>
    %cst_11 = arith.constant dense<0.000000e+00> : vector<8x512xf32>
    %9 = tpu.matmul %6, %8, %cst_11 {dimension_numbers = #tpu.dot_dimension_numbers<[1], [0], [0], [1], [0, 0, 1, 1], [], []>} : vector<8x8xbf16>, vector<8x512xbf16>, vector<8x512xf32> -> vector<8x512xf32>
    %10 = arith.addf %4, %9 : vector<8x512xf32>
    %c0_12 = arith.constant 0 : index
    %c0_13 = arith.constant 0 : index
    %c0_14 = arith.constant 0 : index
    %11 = vector.load %arg6[%c0_12, %c0_13, %c0_14] : memref<1x8x8xbf16, #tpu.memory_space<vmem>>, vector<1x8x8xbf16>
    %12 = vector.shape_cast %11 : vector<1x8x8xbf16> to vector<8x8xbf16>
    %c0_15 = arith.constant 0 : index
    %c0_16 = arith.constant 0 : index
    %c0_17 = arith.constant 0 : index
    %13 = vector.load %arg3[%c0_15, %c0_16, %c0_17] : memref<1x8x512xbf16, #tpu.memory_space<vmem>>, vector<1x8x512xbf16>
    %14 = vector.shape_cast %13 : vector<1x8x512xbf16> to vector<8x512xbf16>
    %cst_18 = arith.constant dense<0.000000e+00> : vector<8x512xf32>
    %15 = tpu.matmul %12, %14, %cst_18 {dimension_numbers = #tpu.dot_dimension_numbers<[1], [0], [0], [1], [0, 0, 1, 1], [], []>} : vector<8x8xbf16>, vector<8x512xbf16>, vector<8x512xf32> -> vector<8x512xf32>
    %16 = arith.addf %10, %15 : vector<8x512xf32>
    %c0_19 = arith.constant 0 : index
    %c0_20 = arith.constant 0 : index
    %c0_21 = arith.constant 0 : index
    %17 = vector.load %arg7[%c0_19, %c0_20, %c0_21] : memref<1x8x1xf32, #tpu.memory_space<vmem>>, vector<1x8x1xf32>
    %18 = vector.shape_cast %17 : vector<1x8x1xf32> to vector<8x1xf32>
    %19 = vector.broadcast %18 : vector<8x1xf32> to vector<8x512xf32>
    %20 = arith.addf %16, %19 : vector<8x512xf32>
    %cst_22 = arith.constant 0.000000e+00 : f32
    %21 = vector.broadcast %cst_22 : f32 to vector<8x512xf32>
    %22 = arith.maximumf %20, %21 : vector<8x512xf32>
    %c0_23 = arith.constant 0 : index
    %c0_24 = arith.constant 0 : index
    %c0_25 = arith.constant 0 : index
    %23 = vector.load %arg8[%c0_23, %c0_24, %c0_25] : memref<1x8x512xf32, #tpu.memory_space<vmem>>, vector<1x8x512xf32>
    %24 = vector.shape_cast %23 : vector<1x8x512xf32> to vector<8x512xf32>
    %25 = vector.shape_cast %22 : vector<8x512xf32> to vector<1x8x512xf32>
    tpu.vector_store %arg8[%c0_23, %c0_24, %c0_25], %25 {strides = array<i32>} : memref<1x8x512xf32, #tpu.memory_space<vmem>>, vector<1x8x512xf32>,
    return
  }
  func.func @transform_0(%arg0: i32) -> (i32, i32, i32) {
    %c0_i32 = arith.constant 0 : i32
    %c0_i32_0 = arith.constant 0 : i32
    %c0_i32_1 = arith.constant 0 : i32
    return %arg0, %c0_i32, %c0_i32_0 : i32, i32, i32
  }
  func.func @transform_1(%arg0: i32) -> (i32, i32, i32) {
    %c0_i32 = arith.constant 0 : i32
    %c0_i32_0 = arith.constant 0 : i32
    %c0_i32_1 = arith.constant 0 : i32
    return %arg0, %c0_i32, %c0_i32_0 : i32, i32, i32
  }
  func.func @transform_2(%arg0: i32) -> (i32, i32, i32) {
    %c0_i32 = arith.constant 0 : i32
    %c0_i32_0 = arith.constant 0 : i32
    %c0_i32_1 = arith.constant 0 : i32
    return %arg0, %c0_i32, %c0_i32_0 : i32, i32, i32
  }
  func.func @transform_3(%arg0: i32) -> (i32, i32, i32) {
    %c0_i32 = arith.constant 0 : i32
    %c0_i32_0 = arith.constant 0 : i32
    %c0_i32_1 = arith.constant 0 : i32
    return %arg0, %c0_i32, %c0_i32_0 : i32, i32, i32
  }
  func.func @transform_4(%arg0: i32) -> (i32, i32, i32) {
    %c0_i32 = arith.constant 0 : i32
    %c0_i32_0 = arith.constant 0 : i32
    %c0_i32_1 = arith.constant 0 : i32
    return %arg0, %c0_i32, %c0_i32_0 : i32, i32, i32
  }
  func.func @transform_5(%arg0: i32) -> (i32, i32, i32) {
    %c0_i32 = arith.constant 0 : i32
    %c0_i32_0 = arith.constant 0 : i32
    %c0_i32_1 = arith.constant 0 : i32
    return %arg0, %c0_i32, %c0_i32_0 : i32, i32, i32
  }
  func.func @transform_6(%arg0: i32) -> (i32, i32, i32) {
    %c0_i32 = arith.constant 0 : i32
    %c0_i32_0 = arith.constant 0 : i32
    %c0_i32_1 = arith.constant 0 : i32
    return %arg0, %c0_i32, %c0_i32_0 : i32, i32, i32
  }
  func.func @transform_7(%arg0: i32) -> (i32, i32, i32) {
    %c0_i32 = arith.constant 0 : i32
    %c0_i32_0 = arith.constant 0 : i32
    %c0_i32_1 = arith.constant 0 : i32
    return %arg0, %c0_i32, %c0_i32_0 : i32, i32, i32
  }
}

module attributes {stable_mosaic.version = 11 : i64} {
  func.func @_attn_tail_kernel(%arg0: i32, %arg1: memref<2x8x256xbf16, #tpu.memory_space<vmem>>, %arg2: memref<2x256x8xbf16, #tpu.memory_space<vmem>>, %arg3: memref<2x8x256xf32, #tpu.memory_space<vmem>>, %arg4: memref<2x8x4xbf16, #tpu.memory_space<vmem>>, %arg5: memref<2x1x4xf32, #tpu.memory_space<vmem>>, %arg6: memref<2x2x4x8xbf16, #tpu.memory_space<vmem>>, %arg7: memref<2x2x4x1xf32, #tpu.memory_space<vmem>>, %arg8: memref<2x2x4xf32, #tpu.memory_space<vmem>>, %arg9: memref<2x1xf32, #tpu.memory_space<vmem>>, %arg10: memref<1x8x256xf32, #tpu.memory_space<vmem>>, %arg11: memref<1x8x256xf32, #tpu.memory_space<vmem>>, %arg12: memref<1x8x256xf32, #tpu.memory_space<vmem>>) attributes {dimension_semantics = [#tpu.dimension_semantics<parallel>], iteration_bounds = array<i64: 2>, scalar_prefetch = 0 : i64, scratch_operands = 0 : i64, tpu.core_type = #tpu.core_type<tc>, window_params = [{transform_indices = @transform_0, window_bounds = array<i64: 2, 8, 256>}, {transform_indices = @transform_1, window_bounds = array<i64: 2, 256, 8>}, {transform_indices = @transform_2, window_bounds = array<i64: 2, 8, 256>}, {pipeline_mode = #tpu.pipeline_mode<synchronous>, transform_indices = @transform_3, window_bounds = array<i64: 2, 8, 4>}, {pipeline_mode = #tpu.pipeline_mode<synchronous>, transform_indices = @transform_4, window_bounds = array<i64: 2, 1, 4>}, {pipeline_mode = #tpu.pipeline_mode<synchronous>, transform_indices = @transform_5, window_bounds = array<i64: 2, 2, 4, 8>}, {pipeline_mode = #tpu.pipeline_mode<synchronous>, transform_indices = @transform_6, window_bounds = array<i64: 2, 2, 4, 1>}, {pipeline_mode = #tpu.pipeline_mode<synchronous>, transform_indices = @transform_7, window_bounds = array<i64: 2, 2, 4>}, {pipeline_mode = #tpu.pipeline_mode<synchronous>, transform_indices = @transform_8, window_bounds = array<i64: 2, 1>}, {transform_indices = @transform_9, window_bounds = array<i64: 1, 8, 256>}, {transform_indices = @transform_10, window_bounds = array<i64: 1, 8, 256>}, {transform_indices = @transform_11, window_bounds = array<i64: 1, 8, 256>}]} {
    %c0 = arith.constant 0 : index
    %c0_0 = arith.constant 0 : index
    %c0_1 = arith.constant 0 : index
    %0 = vector.load %arg1[%c0, %c0_0, %c0_1] : memref<2x8x256xbf16, #tpu.memory_space<vmem>>, vector<1x8x256xbf16>
    %1 = vector.shape_cast %0 : vector<1x8x256xbf16> to vector<8x256xbf16>
    %c0_2 = arith.constant 0 : index
    %c0_3 = arith.constant 0 : index
    %c0_4 = arith.constant 0 : index
    %2 = vector.load %arg2[%c0_2, %c0_3, %c0_4] : memref<2x256x8xbf16, #tpu.memory_space<vmem>>, vector<1x256x8xbf16>
    %3 = vector.shape_cast %2 : vector<1x256x8xbf16> to vector<256x8xbf16>
    %c0_5 = arith.constant 0 : index
    %c0_6 = arith.constant 0 : index
    %c0_7 = arith.constant 0 : index
    %4 = vector.load %arg4[%c0_5, %c0_6, %c0_7] : memref<2x8x4xbf16, #tpu.memory_space<vmem>>, vector<1x8x4xbf16>
    %5 = vector.shape_cast %4 : vector<1x8x4xbf16> to vector<8x4xbf16>
    %cst = arith.constant dense<0.000000e+00> : vector<256x4xf32>
    %6 = tpu.matmul %3, %5, %cst {dimension_numbers = #tpu.dot_dimension_numbers<[1], [0], [0], [1], [0, 0, 1, 1], [], []>} : vector<256x8xbf16>, vector<8x4xbf16>, vector<256x4xf32> -> vector<256x4xf32>
    %c0_8 = arith.constant 0 : index
    %c0_9 = arith.constant 0 : index
    %c0_10 = arith.constant 0 : index
    %7 = vector.load %arg5[%c0_8, %c0_9, %c0_10] : memref<2x1x4xf32, #tpu.memory_space<vmem>>, vector<1x1x4xf32>
    %8 = vector.shape_cast %7 : vector<1x1x4xf32> to vector<1x4xf32>
    %9 = vector.broadcast %8 : vector<1x4xf32> to vector<256x4xf32>
    %10 = arith.addf %6, %9 : vector<256x4xf32>
    %cst_11 = arith.constant 0.000000e+00 : f32
    %11 = vector.broadcast %cst_11 : f32 to vector<256x4xf32>
    %12 = arith.maximumf %10, %11 : vector<256x4xf32>
    %c0_12 = arith.constant 0 : index
    %c0_13 = arith.constant 0 : index
    %c0_14 = arith.constant 0 : index
    %c0_15 = arith.constant 0 : index
    %13 = vector.load %arg6[%c0_12, %c0_13, %c0_14, %c0_15] : memref<2x2x4x8xbf16, #tpu.memory_space<vmem>>, vector<1x1x4x8xbf16>
    %14 = vector.shape_cast %13 : vector<1x1x4x8xbf16> to vector<4x8xbf16>
    %cst_16 = arith.constant dense<0.000000e+00> : vector<4x256xf32>
    %15 = tpu.matmul %14, %1, %cst_16 {dimension_numbers = #tpu.dot_dimension_numbers<[1], [0], [0], [1], [0, 0, 1, 1], [], []>} : vector<4x8xbf16>, vector<8x256xbf16>, vector<4x256xf32> -> vector<4x256xf32>
    %c0_17 = arith.constant 0 : index
    %c0_18 = arith.constant 0 : index
    %c0_19 = arith.constant 0 : index
    %c0_20 = arith.constant 0 : index
    %16 = vector.load %arg7[%c0_17, %c0_18, %c0_19, %c0_20] : memref<2x2x4x1xf32, #tpu.memory_space<vmem>>, vector<1x1x4x1xf32>
    %17 = vector.shape_cast %16 : vector<1x1x4x1xf32> to vector<4x1xf32>
    %18 = vector.broadcast %17 : vector<4x1xf32> to vector<4x256xf32>
    %19 = arith.addf %15, %18 : vector<4x256xf32>
    %cst_21 = arith.constant 0.000000e+00 : f32
    %20 = vector.broadcast %cst_21 : f32 to vector<4x256xf32>
    %21 = arith.maximumf %19, %20 : vector<4x256xf32>
    %c0_22 = arith.constant 0 : index
    %c1 = arith.constant 1 : index
    %c0_23 = arith.constant 0 : index
    %c0_24 = arith.constant 0 : index
    %22 = vector.load %arg6[%c0_22, %c1, %c0_23, %c0_24] : memref<2x2x4x8xbf16, #tpu.memory_space<vmem>>, vector<1x1x4x8xbf16>
    %23 = vector.shape_cast %22 : vector<1x1x4x8xbf16> to vector<4x8xbf16>
    %cst_25 = arith.constant dense<0.000000e+00> : vector<4x256xf32>
    %24 = tpu.matmul %23, %1, %cst_25 {dimension_numbers = #tpu.dot_dimension_numbers<[1], [0], [0], [1], [0, 0, 1, 1], [], []>} : vector<4x8xbf16>, vector<8x256xbf16>, vector<4x256xf32> -> vector<4x256xf32>
    %c0_26 = arith.constant 0 : index
    %c1_27 = arith.constant 1 : index
    %c0_28 = arith.constant 0 : index
    %c0_29 = arith.constant 0 : index
    %25 = vector.load %arg7[%c0_26, %c1_27, %c0_28, %c0_29] : memref<2x2x4x1xf32, #tpu.memory_space<vmem>>, vector<1x1x4x1xf32>
    %26 = vector.shape_cast %25 : vector<1x1x4x1xf32> to vector<4x1xf32>
    %27 = vector.broadcast %26 : vector<4x1xf32> to vector<4x256xf32>
    %28 = arith.addf %24, %27 : vector<4x256xf32>
    %c1_30 = arith.constant 1 : index
    %c0_31 = arith.constant 0 : index
    %c0_32 = arith.constant 0 : index
    %29 = vector.load %arg1[%c1_30, %c0_31, %c0_32] : memref<2x8x256xbf16, #tpu.memory_space<vmem>>, vector<1x8x256xbf16>
    %30 = vector.shape_cast %29 : vector<1x8x256xbf16> to vector<8x256xbf16>
    %c1_33 = arith.constant 1 : index
    %c0_34 = arith.constant 0 : index
    %c0_35 = arith.constant 0 : index
    %31 = vector.load %arg2[%c1_33, %c0_34, %c0_35] : memref<2x256x8xbf16, #tpu.memory_space<vmem>>, vector<1x256x8xbf16>
    %32 = vector.shape_cast %31 : vector<1x256x8xbf16> to vector<256x8xbf16>
    %c1_36 = arith.constant 1 : index
    %c0_37 = arith.constant 0 : index
    %c0_38 = arith.constant 0 : index
    %33 = vector.load %arg4[%c1_36, %c0_37, %c0_38] : memref<2x8x4xbf16, #tpu.memory_space<vmem>>, vector<1x8x4xbf16>
    %34 = vector.shape_cast %33 : vector<1x8x4xbf16> to vector<8x4xbf16>
    %cst_39 = arith.constant dense<0.000000e+00> : vector<256x4xf32>
    %35 = tpu.matmul %32, %34, %cst_39 {dimension_numbers = #tpu.dot_dimension_numbers<[1], [0], [0], [1], [0, 0, 1, 1], [], []>} : vector<256x8xbf16>, vector<8x4xbf16>, vector<256x4xf32> -> vector<256x4xf32>
    %c1_40 = arith.constant 1 : index
    %c0_41 = arith.constant 0 : index
    %c0_42 = arith.constant 0 : index
    %36 = vector.load %arg5[%c1_40, %c0_41, %c0_42] : memref<2x1x4xf32, #tpu.memory_space<vmem>>, vector<1x1x4xf32>
    %37 = vector.shape_cast %36 : vector<1x1x4xf32> to vector<1x4xf32>
    %38 = vector.broadcast %37 : vector<1x4xf32> to vector<256x4xf32>
    %39 = arith.addf %35, %38 : vector<256x4xf32>
    %cst_43 = arith.constant 0.000000e+00 : f32
    %40 = vector.broadcast %cst_43 : f32 to vector<256x4xf32>
    %41 = arith.maximumf %39, %40 : vector<256x4xf32>
    %c1_44 = arith.constant 1 : index
    %c0_45 = arith.constant 0 : index
    %c0_46 = arith.constant 0 : index
    %c0_47 = arith.constant 0 : index
    %42 = vector.load %arg6[%c1_44, %c0_45, %c0_46, %c0_47] : memref<2x2x4x8xbf16, #tpu.memory_space<vmem>>, vector<1x1x4x8xbf16>
    %43 = vector.shape_cast %42 : vector<1x1x4x8xbf16> to vector<4x8xbf16>
    %cst_48 = arith.constant dense<0.000000e+00> : vector<4x256xf32>
    %44 = tpu.matmul %43, %30, %cst_48 {dimension_numbers = #tpu.dot_dimension_numbers<[1], [0], [0], [1], [0, 0, 1, 1], [], []>} : vector<4x8xbf16>, vector<8x256xbf16>, vector<4x256xf32> -> vector<4x256xf32>
    %c1_49 = arith.constant 1 : index
    %c0_50 = arith.constant 0 : index
    %c0_51 = arith.constant 0 : index
    %c0_52 = arith.constant 0 : index
    %45 = vector.load %arg7[%c1_49, %c0_50, %c0_51, %c0_52] : memref<2x2x4x1xf32, #tpu.memory_space<vmem>>, vector<1x1x4x1xf32>
    %46 = vector.shape_cast %45 : vector<1x1x4x1xf32> to vector<4x1xf32>
    %47 = vector.broadcast %46 : vector<4x1xf32> to vector<4x256xf32>
    %48 = arith.addf %44, %47 : vector<4x256xf32>
    %cst_53 = arith.constant 0.000000e+00 : f32
    %49 = vector.broadcast %cst_53 : f32 to vector<4x256xf32>
    %50 = arith.maximumf %48, %49 : vector<4x256xf32>
    %c1_54 = arith.constant 1 : index
    %c1_55 = arith.constant 1 : index
    %c0_56 = arith.constant 0 : index
    %c0_57 = arith.constant 0 : index
    %51 = vector.load %arg6[%c1_54, %c1_55, %c0_56, %c0_57] : memref<2x2x4x8xbf16, #tpu.memory_space<vmem>>, vector<1x1x4x8xbf16>
    %52 = vector.shape_cast %51 : vector<1x1x4x8xbf16> to vector<4x8xbf16>
    %cst_58 = arith.constant dense<0.000000e+00> : vector<4x256xf32>
    %53 = tpu.matmul %52, %30, %cst_58 {dimension_numbers = #tpu.dot_dimension_numbers<[1], [0], [0], [1], [0, 0, 1, 1], [], []>} : vector<4x8xbf16>, vector<8x256xbf16>, vector<4x256xf32> -> vector<4x256xf32>
    %c1_59 = arith.constant 1 : index
    %c1_60 = arith.constant 1 : index
    %c0_61 = arith.constant 0 : index
    %c0_62 = arith.constant 0 : index
    %54 = vector.load %arg7[%c1_59, %c1_60, %c0_61, %c0_62] : memref<2x2x4x1xf32, #tpu.memory_space<vmem>>, vector<1x1x4x1xf32>
    %55 = vector.shape_cast %54 : vector<1x1x4x1xf32> to vector<4x1xf32>
    %56 = vector.broadcast %55 : vector<4x1xf32> to vector<4x256xf32>
    %57 = arith.addf %53, %56 : vector<4x256xf32>
    %58 = arith.truncf %41 : vector<256x4xf32> to vector<256x4xbf16>
    %59 = arith.truncf %21 : vector<4x256xf32> to vector<4x256xbf16>
    %60 = vector.extract_strided_slice %58 {offsets = [0, 0], sizes = [128, 4], strides = [1, 1]} : vector<256x4xbf16> to vector<128x4xbf16>
    %61 = vector.extract_strided_slice %59 {offsets = [0, 0], sizes = [4, 128], strides = [1, 1]} : vector<4x256xbf16> to vector<4x128xbf16>
    %cst_63 = arith.constant dense<0.000000e+00> : vector<128x128xf32>
    %62 = tpu.matmul %60, %61, %cst_63 {dimension_numbers = #tpu.dot_dimension_numbers<[1], [0], [0], [1], [0, 0, 1, 1], [], []>} : vector<128x4xbf16>, vector<4x128xbf16>, vector<128x128xf32> -> vector<128x128xf32>
    %63 = vector.extract_strided_slice %58 {offsets = [128, 0], sizes = [128, 4], strides = [1, 1]} : vector<256x4xbf16> to vector<128x4xbf16>
    %64 = vector.extract_strided_slice %59 {offsets = [0, 128], sizes = [4, 128], strides = [1, 1]} : vector<4x256xbf16> to vector<4x128xbf16>
    %cst_64 = arith.constant dense<0.000000e+00> : vector<128x128xf32>
    %65 = tpu.matmul %63, %64, %cst_64 {dimension_numbers = #tpu.dot_dimension_numbers<[1], [0], [0], [1], [0, 0, 1, 1], [], []>} : vector<128x4xbf16>, vector<4x128xbf16>, vector<128x128xf32> -> vector<128x128xf32>
    %66 = arith.addf %62, %65 : vector<128x128xf32>
    %cst_65 = arith.constant 0.353553385 : f32
    %67 = vector.broadcast %cst_65 : f32 to vector<128x128xf32>
    %68 = arith.mulf %66, %67 : vector<128x128xf32>
    %cst_66 = arith.constant dense<0xFF800000> : vector<128xf32>
    %69 = vector.multi_reduction <maximumf>, %68, %cst_66 [1] : vector<128x128xf32> to vector<128xf32>
    %70 = vector.shape_cast %69 : vector<128xf32> to vector<128x1xf32>
    %71 = vector.broadcast %70 : vector<128x1xf32> to vector<128x128xf32>
    %72 = arith.subf %68, %71 : vector<128x128xf32>
    %73 = math.exp %72 : vector<128x128xf32>
    %cst_67 = arith.constant dense<0.000000e+00> : vector<128xf32>
    %74 = vector.multi_reduction <add>, %73, %cst_67 [1] : vector<128x128xf32> to vector<128xf32>
    %75 = vector.shape_cast %74 : vector<128xf32> to vector<128x1xf32>
    %cst_68 = arith.constant 1.000000e+00 : f32
    %76 = vector.broadcast %cst_68 : f32 to vector<128x1xf32>
    %77 = arith.divf %76, %75 : vector<128x1xf32>
    %78 = vector.broadcast %77 : vector<128x1xf32> to vector<128x128xf32>
    %79 = arith.mulf %73, %78 : vector<128x128xf32>
    %80 = arith.truncf %79 : vector<128x128xf32> to vector<128x128xbf16>
    %81 = arith.truncf %28 : vector<4x256xf32> to vector<4x256xbf16>
    %82 = vector.extract_strided_slice %81 {offsets = [0, 0], sizes = [4, 128], strides = [1, 1]} : vector<4x256xbf16> to vector<4x128xbf16>
    %cst_69 = arith.constant dense<0.000000e+00> : vector<4x128xf32>
    %83 = tpu.matmul %82, %80, %cst_69 {dimension_numbers = #tpu.dot_dimension_numbers<[1], [1], [0], [0], [0, 0, 1, 0], [], []>} : vector<4x128xbf16>, vector<128x128xbf16>, vector<4x128xf32> -> vector<4x128xf32>
    %84 = vector.extract_strided_slice %81 {offsets = [0, 128], sizes = [4, 128], strides = [1, 1]} : vector<4x256xbf16> to vector<4x128xbf16>
    %cst_70 = arith.constant dense<0.000000e+00> : vector<4x128xf32>
    %85 = tpu.matmul %84, %80, %cst_70 {dimension_numbers = #tpu.dot_dimension_numbers<[1], [1], [0], [0], [0, 0, 1, 0], [], []>} : vector<4x128xbf16>, vector<128x128xbf16>, vector<4x128xf32> -> vector<4x128xf32>
    %86 = tpu.concatenate %83, %85 in 1 : vector<4x128xf32>, vector<4x128xf32> -> vector<4x256xf32>
    %87 = arith.truncf %12 : vector<256x4xf32> to vector<256x4xbf16>
    %88 = arith.truncf %50 : vector<4x256xf32> to vector<4x256xbf16>
    %89 = vector.extract_strided_slice %87 {offsets = [0, 0], sizes = [128, 4], strides = [1, 1]} : vector<256x4xbf16> to vector<128x4xbf16>
    %90 = vector.extract_strided_slice %88 {offsets = [0, 0], sizes = [4, 128], strides = [1, 1]} : vector<4x256xbf16> to vector<4x128xbf16>
    %cst_71 = arith.constant dense<0.000000e+00> : vector<128x128xf32>
    %91 = tpu.matmul %89, %90, %cst_71 {dimension_numbers = #tpu.dot_dimension_numbers<[1], [0], [0], [1], [0, 0, 1, 1], [], []>} : vector<128x4xbf16>, vector<4x128xbf16>, vector<128x128xf32> -> vector<128x128xf32>
    %92 = vector.extract_strided_slice %87 {offsets = [128, 0], sizes = [128, 4], strides = [1, 1]} : vector<256x4xbf16> to vector<128x4xbf16>
    %93 = vector.extract_strided_slice %88 {offsets = [0, 128], sizes = [4, 128], strides = [1, 1]} : vector<4x256xbf16> to vector<4x128xbf16>
    %cst_72 = arith.constant dense<0.000000e+00> : vector<128x128xf32>
    %94 = tpu.matmul %92, %93, %cst_72 {dimension_numbers = #tpu.dot_dimension_numbers<[1], [0], [0], [1], [0, 0, 1, 1], [], []>} : vector<128x4xbf16>, vector<4x128xbf16>, vector<128x128xf32> -> vector<128x128xf32>
    %95 = arith.addf %91, %94 : vector<128x128xf32>
    %cst_73 = arith.constant 0.353553385 : f32
    %96 = vector.broadcast %cst_73 : f32 to vector<128x128xf32>
    %97 = arith.mulf %95, %96 : vector<128x128xf32>
    %cst_74 = arith.constant dense<0xFF800000> : vector<128xf32>
    %98 = vector.multi_reduction <maximumf>, %97, %cst_74 [1] : vector<128x128xf32> to vector<128xf32>
    %99 = vector.shape_cast %98 : vector<128xf32> to vector<128x1xf32>
    %100 = vector.broadcast %99 : vector<128x1xf32> to vector<128x128xf32>
    %101 = arith.subf %97, %100 : vector<128x128xf32>
    %102 = math.exp %101 : vector<128x128xf32>
    %cst_75 = arith.constant dense<0.000000e+00> : vector<128xf32>
    %103 = vector.multi_reduction <add>, %102, %cst_75 [1] : vector<128x128xf32> to vector<128xf32>
    %104 = vector.shape_cast %103 : vector<128xf32> to vector<128x1xf32>
    %cst_76 = arith.constant 1.000000e+00 : f32
    %105 = vector.broadcast %cst_76 : f32 to vector<128x1xf32>
    %106 = arith.divf %105, %104 : vector<128x1xf32>
    %107 = vector.broadcast %106 : vector<128x1xf32> to vector<128x128xf32>
    %108 = arith.mulf %102, %107 : vector<128x128xf32>
    %109 = arith.truncf %108 : vector<128x128xf32> to vector<128x128xbf16>
    %110 = arith.truncf %57 : vector<4x256xf32> to vector<4x256xbf16>
    %111 = vector.extract_strided_slice %110 {offsets = [0, 0], sizes = [4, 128], strides = [1, 1]} : vector<4x256xbf16> to vector<4x128xbf16>
    %cst_77 = arith.constant dense<0.000000e+00> : vector<4x128xf32>
    %112 = tpu.matmul %111, %109, %cst_77 {dimension_numbers = #tpu.dot_dimension_numbers<[1], [1], [0], [0], [0, 0, 1, 0], [], []>} : vector<4x128xbf16>, vector<128x128xbf16>, vector<4x128xf32> -> vector<4x128xf32>
    %113 = vector.extract_strided_slice %110 {offsets = [0, 128], sizes = [4, 128], strides = [1, 1]} : vector<4x256xbf16> to vector<4x128xbf16>
    %cst_78 = arith.constant dense<0.000000e+00> : vector<4x128xf32>
    %114 = tpu.matmul %113, %109, %cst_78 {dimension_numbers = #tpu.dot_dimension_numbers<[1], [1], [0], [0], [0, 0, 1, 0], [], []>} : vector<4x128xbf16>, vector<128x128xbf16>, vector<4x128xf32> -> vector<4x128xf32>
    %115 = tpu.concatenate %112, %114 in 1 : vector<4x128xf32>, vector<4x128xf32> -> vector<4x256xf32>
    %c0_79 = arith.constant 0 : index
    %c0_80 = arith.constant 0 : index
    %c0_81 = arith.constant 0 : index
    %116 = vector.load %arg8[%c0_79, %c0_80, %c0_81] : memref<2x2x4xf32, #tpu.memory_space<vmem>>, vector<1x2x4xf32>
    %117 = vector.shape_cast %116 : vector<1x2x4xf32> to vector<2x4xf32>
    %cst_82 = arith.constant dense<0.000000e+00> : vector<2x256xf32>
    %118 = tpu.matmul %117, %86, %cst_82 {dimension_numbers = #tpu.dot_dimension_numbers<[1], [0], [0], [1], [0, 0, 1, 1], [], []>} : vector<2x4xf32>, vector<4x256xf32>, vector<2x256xf32> -> vector<2x256xf32>
    %c1_83 = arith.constant 1 : index
    %c0_84 = arith.constant 0 : index
    %c0_85 = arith.constant 0 : index
    %119 = vector.load %arg8[%c1_83, %c0_84, %c0_85] : memref<2x2x4xf32, #tpu.memory_space<vmem>>, vector<1x2x4xf32>
    %120 = vector.shape_cast %119 : vector<1x2x4xf32> to vector<2x4xf32>
    %cst_86 = arith.constant dense<0.000000e+00> : vector<2x256xf32>
    %121 = tpu.matmul %120, %115, %cst_86 {dimension_numbers = #tpu.dot_dimension_numbers<[1], [0], [0], [1], [0, 0, 1, 1], [], []>} : vector<2x4xf32>, vector<4x256xf32>, vector<2x256xf32> -> vector<2x256xf32>
    %122 = arith.addf %118, %121 : vector<2x256xf32>
    %c0_87 = arith.constant 0 : index
    %c0_88 = arith.constant 0 : index
    %123 = vector.load %arg9[%c0_87, %c0_88] : memref<2x1xf32, #tpu.memory_space<vmem>>, vector<2x1xf32>
    %124 = vector.broadcast %123 : vector<2x1xf32> to vector<2x256xf32>
    %125 = arith.addf %122, %124 : vector<2x256xf32>
    %126 = vector.extract_strided_slice %125 {offsets = [0, 0], sizes = [1, 256], strides = [1, 1]} : vector<2x256xf32> to vector<1x256xf32>
    %127 = vector.extract_strided_slice %125 {offsets = [1, 0], sizes = [1, 256], strides = [1, 1]} : vector<2x256xf32> to vector<1x256xf32>
    %128 = arith.maximumf %126, %127 : vector<1x256xf32>
    %129 = arith.subf %126, %128 : vector<1x256xf32>
    %130 = math.exp %129 : vector<1x256xf32>
    %131 = arith.subf %127, %128 : vector<1x256xf32>
    %132 = math.exp %131 : vector<1x256xf32>
    %133 = arith.addf %130, %132 : vector<1x256xf32>
    %cst_89 = arith.constant 1.000000e+00 : f32
    %134 = vector.broadcast %cst_89 : f32 to vector<1x256xf32>
    %135 = arith.divf %134, %133 : vector<1x256xf32>
    %c0_90 = arith.constant 0 : index
    %c0_91 = arith.constant 0 : index
    %c0_92 = arith.constant 0 : index
    %136 = vector.load %arg3[%c0_90, %c0_91, %c0_92] : memref<2x8x256xf32, #tpu.memory_space<vmem>>, vector<1x8x256xf32>
    %137 = vector.shape_cast %136 : vector<1x8x256xf32> to vector<8x256xf32>
    %c1_93 = arith.constant 1 : index
    %c0_94 = arith.constant 0 : index
    %c0_95 = arith.constant 0 : index
    %138 = vector.load %arg3[%c1_93, %c0_94, %c0_95] : memref<2x8x256xf32, #tpu.memory_space<vmem>>, vector<1x8x256xf32>
    %139 = vector.shape_cast %138 : vector<1x8x256xf32> to vector<8x256xf32>
    %140 = arith.mulf %130, %135 : vector<1x256xf32>
    %141 = vector.broadcast %140 : vector<1x256xf32> to vector<8x256xf32>
    %142 = arith.mulf %137, %141 : vector<8x256xf32>
    %143 = arith.mulf %132, %135 : vector<1x256xf32>
    %144 = vector.broadcast %143 : vector<1x256xf32> to vector<8x256xf32>
    %145 = arith.mulf %139, %144 : vector<8x256xf32>
    %146 = arith.addf %142, %145 : vector<8x256xf32>
    %c0_96 = arith.constant 0 : index
    %c0_97 = arith.constant 0 : index
    %c0_98 = arith.constant 0 : index
    %147 = vector.load %arg12[%c0_96, %c0_97, %c0_98] : memref<1x8x256xf32, #tpu.memory_space<vmem>>, vector<1x8x256xf32>
    %148 = vector.shape_cast %147 : vector<1x8x256xf32> to vector<8x256xf32>
    %149 = vector.shape_cast %146 : vector<8x256xf32> to vector<1x8x256xf32>
    tpu.vector_store %arg12[%c0_96, %c0_97, %c0_98], %149 {strides = array<i32>} : memref<1x8x256xf32, #tpu.memory_space<vmem>>, vector<1x8x256xf32>,
    %150 = arith.addf %137, %146 : vector<8x256xf32>
    %cst_99 = arith.constant 5.000000e-01 : f32
    %151 = vector.broadcast %cst_99 : f32 to vector<8x256xf32>
    %152 = arith.mulf %150, %151 : vector<8x256xf32>
    %cst_100 = arith.constant 0.000000e+00 : f32
    %153 = vector.broadcast %cst_100 : f32 to vector<8x256xf32>
    %154 = arith.maximumf %152, %153 : vector<8x256xf32>
    %c0_101 = arith.constant 0 : index
    %c0_102 = arith.constant 0 : index
    %c0_103 = arith.constant 0 : index
    %155 = vector.load %arg10[%c0_101, %c0_102, %c0_103] : memref<1x8x256xf32, #tpu.memory_space<vmem>>, vector<1x8x256xf32>
    %156 = vector.shape_cast %155 : vector<1x8x256xf32> to vector<8x256xf32>
    %157 = vector.shape_cast %154 : vector<8x256xf32> to vector<1x8x256xf32>
    tpu.vector_store %arg10[%c0_101, %c0_102, %c0_103], %157 {strides = array<i32>} : memref<1x8x256xf32, #tpu.memory_space<vmem>>, vector<1x8x256xf32>,
    %158 = arith.addf %139, %146 : vector<8x256xf32>
    %cst_104 = arith.constant 5.000000e-01 : f32
    %159 = vector.broadcast %cst_104 : f32 to vector<8x256xf32>
    %160 = arith.mulf %158, %159 : vector<8x256xf32>
    %cst_105 = arith.constant 0.000000e+00 : f32
    %161 = vector.broadcast %cst_105 : f32 to vector<8x256xf32>
    %162 = arith.maximumf %160, %161 : vector<8x256xf32>
    %c0_106 = arith.constant 0 : index
    %c0_107 = arith.constant 0 : index
    %c0_108 = arith.constant 0 : index
    %163 = vector.load %arg11[%c0_106, %c0_107, %c0_108] : memref<1x8x256xf32, #tpu.memory_space<vmem>>, vector<1x8x256xf32>
    %164 = vector.shape_cast %163 : vector<1x8x256xf32> to vector<8x256xf32>
    %165 = vector.shape_cast %162 : vector<8x256xf32> to vector<1x8x256xf32>
    tpu.vector_store %arg11[%c0_106, %c0_107, %c0_108], %165 {strides = array<i32>} : memref<1x8x256xf32, #tpu.memory_space<vmem>>, vector<1x8x256xf32>,
    return
  }
  func.func @transform_0(%arg0: i32) -> (i32, i32, i32) {
    %c0_i32 = arith.constant 0 : i32
    %c0_i32_0 = arith.constant 0 : i32
    %c0_i32_1 = arith.constant 0 : i32
    return %c0_i32, %c0_i32_0, %arg0 : i32, i32, i32
  }
  func.func @transform_1(%arg0: i32) -> (i32, i32, i32) {
    %c0_i32 = arith.constant 0 : i32
    %c0_i32_0 = arith.constant 0 : i32
    %c0_i32_1 = arith.constant 0 : i32
    return %c0_i32, %arg0, %c0_i32_0 : i32, i32, i32
  }
  func.func @transform_2(%arg0: i32) -> (i32, i32, i32) {
    %c0_i32 = arith.constant 0 : i32
    %c0_i32_0 = arith.constant 0 : i32
    %c0_i32_1 = arith.constant 0 : i32
    return %c0_i32, %c0_i32_0, %arg0 : i32, i32, i32
  }
  func.func @transform_3(%arg0: i32) -> (i32, i32, i32) {
    %c0_i32 = arith.constant 0 : i32
    %c0_i32_0 = arith.constant 0 : i32
    %c0_i32_1 = arith.constant 0 : i32
    %c0_i32_2 = arith.constant 0 : i32
    return %c0_i32, %c0_i32_0, %c0_i32_1 : i32, i32, i32
  }
  func.func @transform_4(%arg0: i32) -> (i32, i32, i32) {
    %c0_i32 = arith.constant 0 : i32
    %c0_i32_0 = arith.constant 0 : i32
    %c0_i32_1 = arith.constant 0 : i32
    %c0_i32_2 = arith.constant 0 : i32
    return %c0_i32, %c0_i32_0, %c0_i32_1 : i32, i32, i32
  }
  func.func @transform_5(%arg0: i32) -> (i32, i32, i32, i32) {
    %c0_i32 = arith.constant 0 : i32
    %c0_i32_0 = arith.constant 0 : i32
    %c0_i32_1 = arith.constant 0 : i32
    %c0_i32_2 = arith.constant 0 : i32
    %c0_i32_3 = arith.constant 0 : i32
    return %c0_i32, %c0_i32_0, %c0_i32_1, %c0_i32_2 : i32, i32, i32, i32
  }
  func.func @transform_6(%arg0: i32) -> (i32, i32, i32, i32) {
    %c0_i32 = arith.constant 0 : i32
    %c0_i32_0 = arith.constant 0 : i32
    %c0_i32_1 = arith.constant 0 : i32
    %c0_i32_2 = arith.constant 0 : i32
    %c0_i32_3 = arith.constant 0 : i32
    return %c0_i32, %c0_i32_0, %c0_i32_1, %c0_i32_2 : i32, i32, i32, i32
  }
  func.func @transform_7(%arg0: i32) -> (i32, i32, i32) {
    %c0_i32 = arith.constant 0 : i32
    %c0_i32_0 = arith.constant 0 : i32
    %c0_i32_1 = arith.constant 0 : i32
    %c0_i32_2 = arith.constant 0 : i32
    return %c0_i32, %c0_i32_0, %c0_i32_1 : i32, i32, i32
  }
  func.func @transform_8(%arg0: i32) -> (i32, i32) {
    %c0_i32 = arith.constant 0 : i32
    %c0_i32_0 = arith.constant 0 : i32
    %c0_i32_1 = arith.constant 0 : i32
    return %c0_i32, %c0_i32_0 : i32, i32
  }
  func.func @transform_9(%arg0: i32) -> (i32, i32, i32) {
    %c0_i32 = arith.constant 0 : i32
    %c0_i32_0 = arith.constant 0 : i32
    %c0_i32_1 = arith.constant 0 : i32
    return %arg0, %c0_i32, %c0_i32_0 : i32, i32, i32
  }
  func.func @transform_10(%arg0: i32) -> (i32, i32, i32) {
    %c0_i32 = arith.constant 0 : i32
    %c0_i32_0 = arith.constant 0 : i32
    %c0_i32_1 = arith.constant 0 : i32
    return %arg0, %c0_i32, %c0_i32_0 : i32, i32, i32
  }
  func.func @transform_11(%arg0: i32) -> (i32, i32, i32) {
    %c0_i32 = arith.constant 0 : i32
    %c0_i32_0 = arith.constant 0 : i32
    %c0_i32_1 = arith.constant 0 : i32
    return %arg0, %c0_i32, %c0_i32_0 : i32, i32, i32
  }
}

</mosaic_0001>

<bundles_post_ra>
// kernel: block_forward.3
= control target key start
LH: loop header
LB: loop body
LE: loop exit
PB: predicated region body
PF: predicated region fallthrough
CT: control target
= control target key end

     0   :  { %s524_s12 = smov 0   ;;  %s553_s0 = inlined_call_operand.vmem [shape: bf16[2,27,512], index: 0, kind: input, shape index: {}]   ;;  %s554_s1 = inlined_call_operand.vmem [shape: bf16[2,8,27], index: 1, kind: input, shape index: {}]   ;;  %s555_s2 = inlined_call_operand.vmem [shape: f32[2,8,1], index: 2, kind: input, shape index: {}]   ;;  %s556_s3 = inlined_call_operand.vmem [shape: f32[2,8,512], index: 3, kind: output, shape index: {}]  }
   0x1 LB: > { %s446_s13 = sadd.s32 4294967295, %s500_s12   ;;  %p450_p0 = scmp.ge.s32.totalorder %s500_s12, 1  ;;  %s500_s12 = sphi %s524_s12, %s13_s12  }
   0x2   : > { %p155_p1 = scmp.lt.s32.totalorder %s500_s12, 3 }
   0x4   : > { %p156_p2 = pnand %p450_p0, %p155_p1 }
   0x5   : > { %p187_p3 = scmp.lt.s32.totalorder (!%p156_p2), %s446_s13, 1  ;;  %vm261_vm0 = vcmask (!%p156_p2), 1044480   ;;  %v502_v0 = vmov (!%p156_p2), 0   ;;  %vm262_vm1 = vcmask (!%p156_p2), 1045504   ;;  %v503_v1 = vmov (!%p156_p2), 65535  }
   0x6   : > { %159 = sbr.rel (%p156_p2) target bundleno = 243 (0xf3), region = 32  ;;  %309 = vmatprep.mubr.bf16.mxu0 (!%p156_p2), %v502_v0  ;;  %350 = vmatprep.mubr.bf16.mxu1 (!%p156_p2), %v502_v0  ;;  %v263_v2 = vsel (!%p156_p2), %vm261_vm0, 4294967295, %v503_v1  ;;  %vm257_vm2 = vcmask (!%p156_p2), 220160  }
   0x7   : > { %481 = vset.pattern.permute.xlu0 (!%p156_p2), %v502_v0  ;;  %v264_v5 = vsel (!%p156_p2), %vm262_vm1, %v263_v2, 0 }
   0xd   : > { %s558_s13 = smov (!%p187_p3, %s446_s13), 1 }
   0xe   : > { %s469_s14 = sshll.u32 %s558_s13, 6  ;;  %s454_s18 = sshll.u32 %s558_s13, 3 }
   0xf   : > { %s191_s17 = scalar_lea.vmem %s553_s0, %s469_s14  ;;  %s199_s21 = scalar_lea.vmem %s555_s2, %s454_s18 }
  0x10   : > { %v482_v3 = vld [vmem:[%s191_s17 + $0x4] ss:$16 sps:$4 sm:$0xff]   ;;  %v484_v4 = vld [vmem:[%s191_s17 + $0xc] ss:$16 sps:$4 sm:$0xff]   ;;  %v486_v6 = vld [vmem:[%s191_s17] ss:$16 sps:$4 sm:$0xff]  }
  0x11   : > { %277 = vmatprep.subr.bf16.mxu0 %v482_v3  ;;  %v487_v7 = vld [vmem:[%s191_s17 + $0x8] ss:$16 sps:$4 sm:$0xff]   ;;  %s453_s22 = sshll.u32 %s558_s13, 2  ;;  %318 = vmatprep.subr.bf16.mxu1 %v484_v4  ;;  %v488_v8 = vld [vmem:[%s191_s17 + $0x24] ss:$16 sps:$4 sm:$0x3f]  }
  0x12   : > { %278 = vmatpush1.bf16.msra.mxu0 %v486_v6  ;;  %319 = vmatpush1.bf16.msra.mxu1 %v487_v7  ;;  %v490_v9 = vld [vmem:[%s191_s17 + $0x2c] ss:$16 sps:$4 sm:$0x3f]   ;;  %v215_v10 = vld [vmem:[%s199_s21] sm:$0xff]  ;;  %v269_v11 = vand.u32 %v488_v8, %v264_v5  ;;  %s195_s25 = scalar_lea.vmem %s554_s1, %s453_s22  ;;  %s470_s26 = sshll.u32 %s558_s13, 5 }
  0x13   : > { %v492_v12 = vld [vmem:[%s191_s17 + $0x20] ss:$16 sps:$4 sm:$0x3f]   ;;  %v493_v13 = vld [vmem:[%s191_s17 + $0x28] ss:$16 sps:$4 sm:$0x3f]   ;;  %218 = vperm.xlu0 %481, %v215_v10   ;;  %v275_v14 = vand.u32 %v490_v9, %v264_v5  ;;  %s204_s29 = scalar_lea.vmem %s556_s3, %s470_s26 }
  0x14   : > { %279 = vmatprep.subr.bf16.mxu0 %v269_v11  ;;  %v266_v15 = vand.u32 %v492_v12, %v264_v5  ;;  %v272_v16 = vand.u32 %v493_v13, %v264_v5  ;;  %v206_v17 = vld [vmem:[%s195_s25] sm:$0xf] }
  0x15   : > { %320 = vmatprep.subr.bf16.mxu1 %v275_v14 }
  0x16   : > { %280 = vmatpush1.bf16.msra.mxu0 %v266_v15  ;;  %321 = vmatpush1.bf16.msra.mxu1 %v272_v16 }
  0x19   : > { %465 = vmatmul.mubr.msk.bf16.vlgmr.msra.gmra.mrb[0].mxu0 %vm257_vm2, %v206_v17  ;;  %466 = vmatmul.mubr.msk.bf16.vlgmr.msra.gmra.mrb[0].mxu1 %vm257_vm2, %v206_v17 }
  0x92   : > { %v219_v18 = vpop.permute.xlu0 %218 }
  0xec   : > { %v311_v19 = vpop.f32.mrb[0].mxu0  ;;  %v352_v20 = vpop.f32.mrb[0].mxu1 }
  0xed   : > { %v312_v21 = vadd.f32 %v311_v19, %v219_v18  ;;  %v353_v22 = vadd.f32 %v352_v20, %v219_v18  ;;  %v313_v23 = vpop.f32.mrb[1].mxu0  ;;  %v354_v24 = vpop.f32.mrb[1].mxu1 }
  0xee   : > { %v314_v25 = vadd.f32 %v313_v23, %v219_v18  ;;  %v355_v26 = vadd.f32 %v354_v24, %v219_v18  ;;  %v315_v27 = vpop.f32.mrb[2].mxu0  ;;  %v356_v28 = vpop.f32.mrb[2].mxu1 }
  0xef   : > { %v359_v29 = vmax.f32 %v312_v21, 0.0  ;;  %v361_v30 = vmax.f32 %v353_v22, 0.0  ;;  %v316_v31 = vpop.f32.mrb[3].mxu0  ;;  %v357_v32 = vpop.f32.mrb[3].mxu1 }
  0xf0   : > { %v360_v33 = vmax.f32 %v314_v25, 0.0  ;;  %v362_v34 = vmax.f32 %v355_v26, 0.0 }
  0xf1   : > { %363 = vst [vmem:[%s204_s29] sm:$0xff] %v359_v29  ;;  %365 = vst [vmem:[%s204_s29 + $0x10] sm:$0xff] %v361_v30 }
  0xf2   : > { %364 = vst [vmem:[%s204_s29 + $0x8] sm:$0xff] %v360_v33  ;;  %366 = vst [vmem:[%s204_s29 + $0x18] sm:$0xff] %v362_v34 }
  0xf3 PF: > { %s13_s12 = sadd.s32 1, %s500_s12  }
  0xf4   : > { %p10_p4 = scmp.ge.s32.totalorder %s13_s12, 4  }
  0xf6   :  { %12 = sbr.rel (!%p10_p4) target bundleno = 1 (0x1), region = 68 }

// kernel: block_forward.4
= control target key start
LH: loop header
LB: loop body
LE: loop exit
PB: predicated region body
PF: predicated region fallthrough
CT: control target
= control target key end

     0   :  { %s987_s24 = smov 0   ;;  %s1051_s0 = inlined_call_operand.vmem [shape: bf16[2,8,512], index: 0, kind: input, shape index: {}]   ;;  %s1052_s1 = inlined_call_operand.vmem [shape: bf16[2,8,512], index: 1, kind: input, shape index: {}]   ;;  %s1053_s2 = inlined_call_operand.vmem [shape: bf16[2,8,512], index: 2, kind: input, shape index: {}]   ;;  %s1054_s3 = inlined_call_operand.vmem [shape: bf16[2,8,8], index: 3, kind: input, shape index: {}]   ;;  %s1055_s4 = inlined_call_operand.vmem [shape: bf16[2,8,8], index: 4, kind: input, shape index: {}]   ;;  %s1056_s5 = inlined_call_operand.vmem [shape: bf16[2,8,8], index: 5, kind: input, shape index: {}]   ;;  %s1057_s6 = inlined_call_operand.vmem [shape: f32[2,8,1], index: 6, kind: input, shape index: {}]   ;;  %s1058_s7 = inlined_call_operand.vmem [shape: f32[2,8,512], index: 7, kind: output, shape index: {}]  }
   0x1 LB: > { %s869_s25 = sadd.s32 4294967295, %s944_s24   ;;  %p873_p0 = scmp.ge.s32.totalorder %s944_s24, 1  ;;  %s944_s24 = sphi %s987_s24, %s17_s24  }
   0x2   : > { %p293_p1 = scmp.lt.s32.totalorder %s944_s24, 3 }
   0x4   : > { %p294_p2 = pnand %p873_p0, %p293_p1 }
   0x5   : > { %p351_p3 = scmp.lt.s32.totalorder (!%p294_p2), %s869_s25, 1  ;;  %v946_v0 = vmov (!%p294_p2), 0   ;;  %vm408_vm0 = vcmask (!%p294_p2), 1043456   ;;  %vm404_vm1 = vcmask (!%p294_p2), 64512  }
   0x6   : > { %297 = sbr.rel (%p294_p2) target bundleno = 259 (0x103), region = 48  ;;  %453 = vmatprep.mubr.bf16.mxu0 (!%p294_p2), %v946_v0  ;;  %494 = vmatprep.mubr.bf16.mxu1 (!%p294_p2), %v946_v0 }
   0x7   : > { %925 = vset.pattern.permute.xlu0 (!%p294_p2), %v946_v0 }
   0xd   : > { %s1060_s25 = smov (!%p351_p3, %s869_s25), 1 }
   0xe   : > { %s912_s26 = sshll.u32 %s1060_s25, 4  ;;  %s999_s27 = sshll.u32 %s1060_s25, 2 }
   0xf   : > { %s355_s30 = scalar_lea.vmem %s1051_s0, %s912_s26  ;;  %s360_s10 = scalar_lea.vmem %s1052_s1, %s912_s26 }
  0x10   : > { %s365_s13 = scalar_lea.vmem %s1053_s2, %s912_s26  ;;  %v392_v1 = vld [vmem:[%s360_s10] sm:$0xff]  ;;  %v393_v2 = vld [vmem:[%s360_s10 + $0x8] sm:$0xff]  ;;  %s373_s16 = scalar_lea.vmem %s1055_s4, %s999_s27 }
  0x11   : > { %v389_v3 = vld [vmem:[%s355_s30] sm:$0xff]  ;;  %v887_v4 = vcombine.high %v392_v1, %v392_v1  ;;  %v889_v5 = vcombine.high %v393_v2, %v393_v2  ;;  %v886_v6 = vcombine.low %v392_v1, %v392_v1  ;;  %v888_v7 = vcombine.low %v393_v2, %v393_v2  ;;  %v390_v8 = vld [vmem:[%s355_s30 + $0x8] sm:$0xff]  ;;  %s883_s17 = sshll.u32 %s1060_s25, 3  ;;  %s369_s23 = scalar_lea.vmem %s1054_s3, %s999_s27 }
  0x12   : > { %v895_v9 = vcombine.high %v389_v3, %v389_v3  ;;  %v897_v10 = vcombine.high %v390_v8, %v390_v8  ;;  %v894_v11 = vcombine.low %v389_v3, %v389_v3  ;;  %v896_v12 = vcombine.low %v390_v8, %v390_v8  ;;  %v611_v15 = vld [vmem:[%s365_s13] sm:$0xff]  ;;  %v612_v16 = vld [vmem:[%s365_s13 + $0x8] sm:$0xff]  ;;  %s381_s20 = scalar_lea.vmem %s1057_s6, %s883_s17  ;;  %s377_s29 = scalar_lea.vmem %s1056_s5, %s999_s27 }
  0x13   : > { %890 = vmatprep.subr.msk.bf16.mxu0 %vm408_vm0, %v887_v4  ;;  %892 = vmatprep.subr.msk.bf16.mxu1 %vm408_vm0, %v889_v5  ;;  %v410_v13 = vsel %vm408_vm0, %v886_v6, 0  ;;  %v416_v14 = vsel %vm408_vm0, %v888_v7, 0  ;;  %v391_v17 = vld [vmem:[%s373_s16] sm:$0xf]  ;;  %v903_v21 = vcombine.high %v611_v15, %v611_v15  ;;  %v905_v22 = vcombine.high %v612_v16, %v612_v16  ;;  %s915_s27 = sshll.u32 %s1060_s25, 5 }
  0x14   : > { %422 = vmatpush1.bf16.msra.mxu0 %v410_v13  ;;  %463 = vmatpush1.bf16.msra.mxu1 %v416_v14  ;;  %v724_v18 = vld [vmem:[%s381_s20] sm:$0xff]  ;;  %v517_v19 = vsel %vm408_vm0, %v894_v11, 0  ;;  %v523_v20 = vsel %vm408_vm0, %v896_v12, 0  ;;  %v902_v23 = vcombine.low %v611_v15, %v611_v15  ;;  %v904_v24 = vcombine.low %v612_v16, %v612_v16  ;;  %s386_s9 = scalar_lea.vmem %s1058_s7, %s915_s27 }
  0x15   : > { %898 = vmatprep.subr.msk.bf16.mxu0 %vm408_vm0, %v895_v9  ;;  %900 = vmatprep.subr.msk.bf16.mxu1 %vm408_vm0, %v897_v10  ;;  %v388_v25 = vld [vmem:[%s369_s23] sm:$0xf] }
  0x16   : > { %727 = vperm.xlu0 %925, %v724_v18   ;;  %v627_v26 = vsel %vm408_vm0, %v902_v23, 0  ;;  %v633_v27 = vsel %vm408_vm0, %v904_v24, 0  ;;  %v610_v28 = vld [vmem:[%s377_s29] sm:$0xf] }
  0x17   : > { %891 = vmatmul.mubr.msk.bf16.vlgmr.msra.gmra.mrb[0].mxu0 %vm404_vm1, %v391_v17  ;;  %893 = vmatmul.mubr.msk.bf16.vlgmr.msra.gmra.mrb[0].mxu1 %vm404_vm1, %v391_v17 }
  0x18   : > { %529 = vmatpush1.bf16.msra.mxu0 %v517_v19  ;;  %570 = vmatpush1.bf16.msra.mxu1 %v523_v20 }
  0x19   : > { %560 = vmatprep.mubr.bf16.mxu0 %v946_v0  ;;  %601 = vmatprep.mubr.bf16.mxu1 %v946_v0 }
  0x1a   : > { %906 = vmatprep.subr.msk.bf16.mxu0 %vm408_vm0, %v903_v21  ;;  %908 = vmatprep.subr.msk.bf16.mxu1 %vm408_vm0, %v905_v22 }
  0x1f   : > { %899 = vmatmul.mubr.msk.bf16.vlgmr.msra.gmra.mrb[4].mxu0 %vm404_vm1, %v388_v25  ;;  %901 = vmatmul.mubr.msk.bf16.vlgmr.msra.gmra.mrb[4].mxu1 %vm404_vm1, %v388_v25 }
  0x20   : > { %639 = vmatpush1.bf16.msra.mxu0 %v627_v26  ;;  %680 = vmatpush1.bf16.msra.mxu1 %v633_v27 }
  0x21   : > { %670 = vmatprep.mubr.bf16.mxu0 %v946_v0  ;;  %711 = vmatprep.mubr.bf16.mxu1 %v946_v0 }
  0x27   : > { %907 = vmatmul.mubr.msk.bf16.vlgmr.msra.gmra.mrb[8].mxu0 %vm404_vm1, %v610_v28  ;;  %909 = vmatmul.mubr.msk.bf16.vlgmr.msra.gmra.mrb[8].mxu1 %vm404_vm1, %v610_v28 }
  0x95   : > { %v728_v49 = vpop.permute.xlu0 %727 }
  0xea   : > { %v455_v29 = vpop.f32.mrb[0].mxu0  ;;  %v496_v30 = vpop.f32.mrb[0].mxu1 }
  0xeb   : > { %v457_v31 = vpop.f32.mrb[1].mxu0  ;;  %v498_v32 = vpop.f32.mrb[1].mxu1 }
  0xec   : > { %v459_v33 = vpop.f32.mrb[2].mxu0  ;;  %v500_v34 = vpop.f32.mrb[2].mxu1 }
  0xed   : > { %v460_v35 = vpop.f32.mrb[3].mxu0  ;;  %v501_v36 = vpop.f32.mrb[3].mxu1 }
  0xf2   : > { %v562_v37 = vpop.f32.mrb[4].mxu0  ;;  %v603_v38 = vpop.f32.mrb[4].mxu1 }
  0xf3   : > { %v563_v39 = vadd.f32 %v562_v37, %v455_v29  ;;  %v604_v40 = vadd.f32 %v603_v38, %v496_v30  ;;  %v564_v41 = vpop.f32.mrb[5].mxu0  ;;  %v605_v42 = vpop.f32.mrb[5].mxu1 }
  0xf4   : > { %v565_v43 = vadd.f32 %v564_v41, %v457_v31  ;;  %v606_v44 = vadd.f32 %v605_v42, %v498_v32  ;;  %v566_v45 = vpop.f32.mrb[6].mxu0  ;;  %v607_v46 = vpop.f32.mrb[6].mxu1 }
  0xf5   : > { %v567_v47 = vpop.f32.mrb[7].mxu0  ;;  %v608_v48 = vpop.f32.mrb[7].mxu1 }
  0xfa   : > { %v672_v50 = vpop.f32.mrb[8].mxu0  ;;  %v713_v51 = vpop.f32.mrb[8].mxu1 }
  0xfb   : > { %v720_v52 = vadd.f32 %v672_v50, %v563_v39  ;;  %v722_v53 = vadd.f32 %v713_v51, %v604_v40  ;;  %v674_v54 = vpop.f32.mrb[9].mxu0  ;;  %v715_v55 = vpop.f32.mrb[9].mxu1 }
  0xfc   : > { %v721_v56 = vadd.f32 %v674_v54, %v565_v43  ;;  %v723_v57 = vadd.f32 %v715_v55, %v606_v44  ;;  %v676_v58 = vpop.f32.mrb[10].mxu0  ;;  %v717_v59 = vpop.f32.mrb[10].mxu1 }
  0xfd   : > { %v730_v60 = vadd.f32 %v728_v49, %v720_v52  ;;  %v732_v61 = vadd.f32 %v728_v49, %v722_v53  ;;  %v677_v62 = vpop.f32.mrb[11].mxu0  ;;  %v718_v63 = vpop.f32.mrb[11].mxu1 }
  0xfe   : > { %v731_v0 = vadd.f32 %v728_v49, %v721_v56  ;;  %v733_v1 = vadd.f32 %v728_v49, %v723_v57 }
  0xff   : > { %v734_v2 = vmax.f32 %v730_v60, 0.0  ;;  %v736_v3 = vmax.f32 %v732_v61, 0.0 }
 0x100   : > { %v735_v4 = vmax.f32 %v731_v0, 0.0  ;;  %v737_v5 = vmax.f32 %v733_v1, 0.0 }
 0x101   : > { %738 = vst [vmem:[%s386_s9] sm:$0xff] %v734_v2  ;;  %740 = vst [vmem:[%s386_s9 + $0x10] sm:$0xff] %v736_v3 }
 0x102   : > { %739 = vst [vmem:[%s386_s9 + $0x8] sm:$0xff] %v735_v4  ;;  %741 = vst [vmem:[%s386_s9 + $0x18] sm:$0xff] %v737_v5 }
 0x103 PF: > { %s17_s24 = sadd.s32 1, %s944_s24  }
 0x104   : > { %p14_p4 = scmp.ge.s32.totalorder %s17_s24, 4  }
 0x106   :  { %16 = sbr.rel (!%p14_p4) target bundleno = 1 (0x1), region = 96 }

// kernel: block_forward.5
= control target key start
LH: loop header
LB: loop body
LE: loop exit
PB: predicated region body
PF: predicated region fallthrough
CT: control target
= control target key end

     0   :  { %s4129_s17 = smov 0   ;;  %s4131_s18 = smov 0   ;;  %s4888_s0 = inlined_call_operand.vmem [shape: bf16[2,8,512], index: 0, kind: input, shape index: {}]   ;;  %s4889_s1 = inlined_call_operand.vmem [shape: bf16[2,512,8], index: 1, kind: input, shape index: {}]   ;;  %s4890_s2 = inlined_call_operand.vmem [shape: f32[2,8,512], index: 2, kind: input, shape index: {}]   ;;  %s4891_s3 = inlined_call_operand.vmem [shape: bf16[2,8,4], index: 3, kind: input, shape index: {}]   ;;  %s4892_s4 = inlined_call_operand.vmem [shape: f32[2,1,4], index: 4, kind: input, shape index: {}]   ;;  %s4893_s5 = inlined_call_operand.vmem [shape: bf16[2,2,4,8], index: 5, kind: input, shape index: {}]   ;;  %s4894_s6 = inlined_call_operand.vmem [shape: f32[2,2,4,1], index: 6, kind: input, shape index: {}]   ;;  %s4895_s7 = inlined_call_operand.vmem [shape: f32[2,2,4], index: 7, kind: input, shape index: {}]   ;;  %s4896_s8 = inlined_call_operand.vmem [shape: f32[2,1], index: 8, kind: input, shape index: {}]   ;;  %s4897_s9 = inlined_call_operand.vmem [shape: f32[2,8,256], index: 9, kind: output, shape index: {0}]   ;;  %s4898_s10 = inlined_call_operand.vmem [shape: f32[2,8,256], index: 10, kind: output, shape index: {1}]   ;;  %s4899_s11 = inlined_call_operand.vmem [shape: f32[2,8,256], index: 11, kind: output, shape index: {2}]  }
   0x1   :  { %s4133_s19 = smov 0  }
   0x2 LB: > { %s3280_s20 = sadd.s32 4294967295, %s4064_s19   ;;  %s4146_s21 = sadd.s32 1, %s4064_s19   ;;  %s4064_s19 = sphi %s4133_s19, %s4903_s19   ;;  %s4060_s18 = sphi %s4131_s18, %s4902_s18   ;;  %s4056_s17 = sphi %s4129_s17, %s4901_s17  }
   0x3   : > { %s26_s22 = ssub.s32 %s4064_s19, %s4146_s21  ;;  %s29_s23 = sadd.s32 1, %s4060_s18 }
   0x4   : > { %p27_p0 = scmp.eq.s32.totalorder %s26_s22, 0  ;;  %p36_p1 = scmp.ne.s32.totalorder %s4060_s18, %s4056_s17 }
   0x5   : > { %p37_p2 = scmp.eq.s32.totalorder %s4064_s19, 0  ;;  %p3283_p4 = scmp.ge.s32.totalorder %s4064_s19, 2 }
   0x6   : > { %s4155_s24 = scalar_select %p27_p0, %s4060_s18, %s29_s23  }
   0x7   : > { %p4157_p3 = por %p37_p2, %p36_p1  ;;  %336 = sbr.rel (%p3283_p4) target bundleno = 48 (0x30), region = 40 }
   0xe   : > { %339 = sbr.rel (!%p4157_p3) target bundleno = 21 (0x15), region = 44  ;;  %s341_s26 = sand.u32 (%p4157_p3), 1, %s4060_s18  }
   0xf   : > { %s3465_s27 = sshll.u32 (%p4157_p3), %s4064_s19, 3  ;;  %s3284_s28 = sshll.u32 (%p4157_p3), %s341_s26, 4 }
  0x10   : > { %s346_s12 = scalar_lea.vmem (%p4157_p3), %s4888_s0, %s3465_s27  ;;  %s343_s13 = scalar_lea.vmem (%p4157_p3), [#allocation2], %s3284_s28 }
  0x11   : > { %v376_v0 = vld [vmem:[%s346_s12] sm:$0xff] (%p4157_p3)  ;;  %v378_v1 = vld [vmem:[%s346_s12 + $0x10] sm:$0xff] (%p4157_p3) }
  0x12   : > { %377 = vst [vmem:[%s343_s13] sm:$0xff] (%p4157_p3), %v376_v0  ;;  %379 = vst [vmem:[%s343_s13 + $0x8] sm:$0xff] (%p4157_p3), %v378_v1 }
  0x15 PF: > { %385 = sbr.rel (!%p4157_p3) target bundleno = 41 (0x29), region = 82  ;;  %s387_s14 = sand.u32 (%p4157_p3), 1, %s4060_s18  }
  0x16   : > { %s3466_s15 = sshll.u32 (%p4157_p3), %s4064_s19, 7  ;;  %s3287_s16 = sshll.u32 (%p4157_p3), %s387_s14, 8 }
  0x17   : > { %s4176_s26 = scalar_lea.vmem (%p4157_p3), %s4889_s1, %s3466_s15  ;;  %s4181_s27 = scalar_lea.vmem (%p4157_p3), [#allocation3], %s3287_s16 }
  0x18   : > { %v408_v2 = vld [vmem:[%s4176_s26] sm:$0xff] (%p4157_p3)   ;;  %v412_v3 = vld [vmem:[%s4176_s26 + $0x8] sm:$0xff] (%p4157_p3)   ;;  %v416_v4 = vld [vmem:[%s4176_s26 + $0x10] sm:$0xff] (%p4157_p3)  }
  0x19   : > { %409 = vst [vmem:[%s4181_s27] sm:$0xff] (%p4157_p3), %v408_v2   ;;  %413 = vst [vmem:[%s4181_s27 + $0x8] sm:$0xff] (%p4157_p3), %v412_v3   ;;  %v420_v5 = vld [vmem:[%s4176_s26 + $0x18] sm:$0xff] (%p4157_p3)   ;;  %v424_v6 = vld [vmem:[%s4176_s26 + $0x20] sm:$0xff] (%p4157_p3)  }
  0x1a   : > { %417 = vst [vmem:[%s4181_s27 + $0x10] sm:$0xff] (%p4157_p3), %v416_v4   ;;  %v428_v7 = vld [vmem:[%s4176_s26 + $0x28] sm:$0xff] (%p4157_p3)   ;;  %421 = vst [vmem:[%s4181_s27 + $0x18] sm:$0xff] (%p4157_p3), %v420_v5   ;;  %v432_v8 = vld [vmem:[%s4176_s26 + $0x30] sm:$0xff] (%p4157_p3)  }
  0x1b   : > { %425 = vst [vmem:[%s4181_s27 + $0x20] sm:$0xff] (%p4157_p3), %v424_v6   ;;  %429 = vst [vmem:[%s4181_s27 + $0x28] sm:$0xff] (%p4157_p3), %v428_v7   ;;  %v436_v9 = vld [vmem:[%s4176_s26 + $0x38] sm:$0xff] (%p4157_p3)   ;;  %v440_v10 = vld [vmem:[%s4176_s26 + $0x40] sm:$0xff] (%p4157_p3)  }
  0x1c   : > { %433 = vst [vmem:[%s4181_s27 + $0x30] sm:$0xff] %v432_v8   ;;  %437 = vst [vmem:[%s4181_s27 + $0x38] sm:$0xff] %v436_v9   ;;  %v444_v11 = vld [vmem:[%s4176_s26 + $0x48] sm:$0xff]   ;;  %v448_v12 = vld [vmem:[%s4176_s26 + $0x50] sm:$0xff]  }
  0x1d   : > { %441 = vst [vmem:[%s4181_s27 + $0x40] sm:$0xff] %v440_v10   ;;  %v452_v13 = vld [vmem:[%s4176_s26 + $0x58] sm:$0xff]   ;;  %445 = vst [vmem:[%s4181_s27 + $0x48] sm:$0xff] %v444_v11   ;;  %v456_v14 = vld [vmem:[%s4176_s26 + $0x60] sm:$0xff]  }
  0x1e   : > { %449 = vst [vmem:[%s4181_s27 + $0x50] sm:$0xff] %v448_v12   ;;  %453 = vst [vmem:[%s4181_s27 + $0x58] sm:$0xff] %v452_v13   ;;  %v460_v15 = vld [vmem:[%s4176_s26 + $0x68] sm:$0xff]   ;;  %v464_v16 = vld [vmem:[%s4176_s26 + $0x70] sm:$0xff]  }
  0x1f   : > { %457 = vst [vmem:[%s4181_s27 + $0x60] sm:$0xff] %v456_v14   ;;  %461 = vst [vmem:[%s4181_s27 + $0x68] sm:$0xff] %v460_v15   ;;  %v468_v17 = vld [vmem:[%s4176_s26 + $0x78] sm:$0xff]   ;;  %v472_v18 = vld [vmem:[%s4176_s26 + $0x100] sm:$0xff]  }
  0x20   : > { %465 = vst [vmem:[%s4181_s27 + $0x70] sm:$0xff] %v464_v16   ;;  %v476_v19 = vld [vmem:[%s4176_s26 + $0x108] sm:$0xff]   ;;  %469 = vst [vmem:[%s4181_s27 + $0x78] sm:$0xff] %v468_v17   ;;  %v480_v20 = vld [vmem:[%s4176_s26 + $0x110] sm:$0xff]  }
  0x21   : > { %473 = vst [vmem:[%s4181_s27 + $0x80] sm:$0xff] %v472_v18   ;;  %477 = vst [vmem:[%s4181_s27 + $0x88] sm:$0xff] %v476_v19   ;;  %v484_v21 = vld [vmem:[%s4176_s26 + $0x118] sm:$0xff]   ;;  %v488_v22 = vld [vmem:[%s4176_s26 + $0x120] sm:$0xff]  }
  0x22   : > { %481 = vst [vmem:[%s4181_s27 + $0x90] sm:$0xff] %v480_v20   ;;  %485 = vst [vmem:[%s4181_s27 + $0x98] sm:$0xff] %v484_v21   ;;  %v492_v23 = vld [vmem:[%s4176_s26 + $0x128] sm:$0xff]   ;;  %v496_v24 = vld [vmem:[%s4176_s26 + $0x130] sm:$0xff]  }
  0x23   : > { %489 = vst [vmem:[%s4181_s27 + $0xa0] sm:$0xff] %v488_v22   ;;  %v500_v25 = vld [vmem:[%s4176_s26 + $0x138] sm:$0xff]   ;;  %493 = vst [vmem:[%s4181_s27 + $0xa8] sm:$0xff] %v492_v23   ;;  %v504_v26 = vld [vmem:[%s4176_s26 + $0x140] sm:$0xff]  }
  0x24   : > { %497 = vst [vmem:[%s4181_s27 + $0xb0] sm:$0xff] %v496_v24   ;;  %501 = vst [vmem:[%s4181_s27 + $0xb8] sm:$0xff] %v500_v25   ;;  %v508_v27 = vld [vmem:[%s4176_s26 + $0x148] sm:$0xff]   ;;  %v512_v28 = vld [vmem:[%s4176_s26 + $0x150] sm:$0xff]  }
  0x25   : > { %505 = vst [vmem:[%s4181_s27 + $0xc0] sm:$0xff] %v504_v26   ;;  %509 = vst [vmem:[%s4181_s27 + $0xc8] sm:$0xff] %v508_v27   ;;  %v516_v29 = vld [vmem:[%s4176_s26 + $0x158] sm:$0xff]   ;;  %v520_v30 = vld [vmem:[%s4176_s26 + $0x160] sm:$0xff]  }
  0x26   : > { %513 = vst [vmem:[%s4181_s27 + $0xd0] sm:$0xff] %v512_v28   ;;  %v524_v31 = vld [vmem:[%s4176_s26 + $0x168] sm:$0xff]   ;;  %517 = vst [vmem:[%s4181_s27 + $0xd8] sm:$0xff] %v516_v29   ;;  %v528_v32 = vld [vmem:[%s4176_s26 + $0x170] sm:$0xff]  }
  0x27   : > { %521 = vst [vmem:[%s4181_s27 + $0xe0] sm:$0xff] %v520_v30   ;;  %525 = vst [vmem:[%s4181_s27 + $0xe8] sm:$0xff] %v524_v31   ;;  %v532_v33 = vld [vmem:[%s4176_s26 + $0x178] sm:$0xff]  }
  0x28   : > { %529 = vst [vmem:[%s4181_s27 + $0xf0] sm:$0xff] %v528_v32   ;;  %533 = vst [vmem:[%s4181_s27 + $0xf8] sm:$0xff] %v532_v33  }
  0x29 PF: > { %686 = sbr.rel (!%p4157_p3) target bundleno = 48 (0x30), region = 123  ;;  %s688_s28 = sand.u32 (%p4157_p3), 1, %s4060_s18  }
  0x2a   : > { %s3467_s29 = sshll.u32 (%p4157_p3), %s4064_s19, 4  ;;  %s3290_s30 = sshll.u32 (%p4157_p3), %s688_s28, 5 }
  0x2b   : > { %s693_s14 = scalar_lea.vmem (%p4157_p3), %s4890_s2, %s3467_s29  ;;  %s690_s15 = scalar_lea.vmem (%p4157_p3), [#allocation4], %s3290_s30 }
  0x2c   : > { %v706_v34 = vld [vmem:[%s693_s14] sm:$0xff] (%p4157_p3)  ;;  %v708_v35 = vld [vmem:[%s693_s14 + $0x8] sm:$0xff] (%p4157_p3) }
  0x2d   : > { %v710_v36 = vld [vmem:[%s693_s14 + $0x20] sm:$0xff] (%p4157_p3)  ;;  %707 = vst [vmem:[%s690_s15] sm:$0xff] (%p4157_p3), %v706_v34  ;;  %709 = vst [vmem:[%s690_s15 + $0x8] sm:$0xff] (%p4157_p3), %v708_v35  ;;  %v712_v37 = vld [vmem:[%s693_s14 + $0x28] sm:$0xff] (%p4157_p3) }
  0x2e   : > { %711 = vst [vmem:[%s690_s15 + $0x10] sm:$0xff] (%p4157_p3), %v710_v36  ;;  %713 = vst [vmem:[%s690_s15 + $0x18] sm:$0xff] (%p4157_p3), %v712_v37 }
  0x30 PF: > { %p3293_p5 = scmp.ge.s32.totalorder %s4064_s19, 1  ;;  %p718_p6 = scmp.lt.s32.totalorder %s4064_s19, 3 }
  0x32   : > { %p719_p7 = pnand %p3293_p5, %p718_p6 }
  0x33   : > { %v848_v38 = vld [vmem:[%s4891_s3] sm:$0xf] (!%p719_p7)  ;;  %vm985_vm0 = vcmask (!%p719_p7), 1043456   ;;  %s4257_s22 = sand.u32 (!%p719_p7), 1, %s4056_s17   ;;  %v4066_v40 = vmov (!%p719_p7), 0   ;;  %vm936_vm1 = vcmask (!%p719_p7), 64512  }
  0x34   : > { %722 = sbr.rel (%p719_p7) target bundleno = 2127 (0x84f), region = 146  ;;  %3831 = vmatprep.subr.msk.bf16.mxu0 (!%p719_p7), %vm985_vm0, %v848_v38  ;;  %v987_v39 = vsel (!%p719_p7), %vm985_vm0, %v848_v38, 0  ;;  %s3295_s23 = sshll.u32 (!%p719_p7), %s4257_s22, 8  ;;  %1290 = vmatprep.mubr.bf16.mxu1 (!%p719_p7), %v4066_v40  ;;  %v3377_v47 = vld [vmem:[%s4891_s3 + $0x4] sm:$0xf] (!%p719_p7)  ;;  %vm1805_vm2 = vcmask (!%p719_p7), 31744  }
  0x35   : > { %s3294_s26 = sshll.u32 (!%p719_p7), %s4257_s22, 4  ;;  %3578 = vmatpush3.bf16.msra.mxu0 (!%p719_p7), %v987_v39  ;;  %3864 = vset.pattern.permute.xlu0 (!%p719_p7), %v4066_v40  ;;  %s4265_s27 = scalar_lea.vmem (!%p719_p7), [#allocation3], %s3295_s23  ;;  %v3340_v49 = vld [vmem:[%s4893_s5 + $0x2] sm:$0x3] (!%p719_p7)  ;;  %v1473_v52 = vsel (!%p719_p7), %vm985_vm0, %v3377_v47, 0  ;;  %vm1830_vm3 = vcmask (!%p719_p7), 1041408  }
  0x36   : > { %v3866_v41 = vld [vmem:[%s4265_s27] sm:$0xff] (!%p719_p7)   ;;  %3865 = vset.pattern.permute.xlu1 (!%p719_p7), %v4066_v40  ;;  %v3867_v42 = vld [vmem:[%s4265_s27 + $0x8] sm:$0xff] (!%p719_p7)   ;;  %s4271_s17 = scalar_lea.vmem (!%p719_p7), [#allocation2], %s3294_s26  ;;  %v3869_v45 = vld [vmem:[%s4265_s27 + $0x10] sm:$0xff] (!%p719_p7)   ;;  %vm4068_vm4 = vmmov (!%p719_p7), 0   ;;  %s3296_s30 = sshll.u32 (!%p719_p7), %s4257_s22, 5 }
  0x37   : > { %3579 = vmatprep.mubr.msk.bf16.mxu0 (!%p719_p7), %vm936_vm1, %v3866_v41  ;;  %v815_v43 = vld [vmem:[%s4271_s17] sm:$0xff] (!%p719_p7)  ;;  %v3871_v50 = vld [vmem:[%s4265_s27 + $0x18] sm:$0xff] (!%p719_p7)   ;;  %v3873_v54 = vld [vmem:[%s4265_s27 + $0x28] sm:$0xff] (!%p719_p7)   ;;  %p799_p8 = scmp.lt.s32.totalorder (!%p719_p7), %s3280_s20, 1  ;;  %s741_s12 = scalar_lea.vmem (!%p719_p7), [#allocation4], %s3296_s30 }
  0x38   : > { %3580 = vmatmul.mubr.msk.bf16.vlgmr.msra.gmra.mrb[0].mxu0 (!%p719_p7), %vm936_vm1, %v3867_v42  ;;  %v3337_v44 = vcombine.high (!%p719_p7), %v815_v43, %v815_v43  ;;  %v3336_v46 = vcombine.low (!%p719_p7), %v815_v43, %v815_v43  ;;  %v3872_v51 = vld [vmem:[%s4265_s27 + $0x20] sm:$0xff] (!%p719_p7)   ;;  %v3877_v55 = vld [vmem:[%s4265_s27 + $0x88] sm:$0xff] (!%p719_p7)   ;;  %v3880_v56 = vld [vmem:[%s4265_s27 + $0x90] sm:$0xff] (!%p719_p7)  }
  0x39   : > { %3583 = vmatprep.mubr.msk.bf16.mxu0 (!%p719_p7), %vm936_vm1, %v3869_v45  ;;  %v3876_v53 = vld [vmem:[%s4265_s27 + $0x80] sm:$0xff] (!%p719_p7)   ;;  %v3874_v57 = vld [vmem:[%s4265_s27 + $0x30] sm:$0xff] (!%p719_p7)   ;;  %v3875_v58 = vld [vmem:[%s4265_s27 + $0x38] sm:$0xff] (!%p719_p7)  }
  0x3a   : > { %3338 = vmatprep.subr.msk.bf16.mxu0 (!%p719_p7), %vm985_vm0, %v3337_v44  ;;  %v1198_v48 = vsel (!%p719_p7), %vm985_vm0, %v3336_v46, 0  ;;  %3342 = vmatprep.subr.msk.bf16.mxu1 (!%p719_p7), %vm985_vm0, %v3337_v44  ;;  %v3881_v59 = vld [vmem:[%s4265_s27 + $0x98] sm:$0xff] (!%p719_p7)   ;;  %v3884_v60 = vld [vmem:[%s4265_s27 + $0xa0] sm:$0xff] (!%p719_p7)   ;;  %v3879_v62 = vld [vmem:[%s4265_s27 + $0x48] sm:$0xff] (!%p719_p7)  }
  0x3b   : > { %1204 = vmatpush1.bf16.msra.mxu0 %v1198_v48  ;;  %1259 = vmatpush1.bf16.msra.mxu1 %v1198_v48  ;;  %v3878_v61 = vld [vmem:[%s4265_s27 + $0x40] sm:$0xff]   ;;  %v3885_v63 = vld [vmem:[%s4265_s27 + $0xa8] sm:$0xff]   ;;  %v3888_v0 = vld [vmem:[%s4265_s27 + $0xb0] sm:$0xff]   ;;  %s4905_s20 = smov (!%p799_p8, %s3280_s20), 1 }
  0x3c   : > { %3832 = vmatprep.subr.msk.bf16.mxu1 %vm985_vm0, %v3377_v47  ;;  %v3882_v1 = vld [vmem:[%s4265_s27 + $0x50] sm:$0xff]   ;;  %v1183_v2 = vld [vmem:[%s4894_s6] sm:$0xf]  ;;  %v3889_v3 = vld [vmem:[%s4265_s27 + $0xb8] sm:$0xff]   ;;  %s3468_s22 = sshll.u32 %s4905_s20, 4 }
  0x3d   : > { %1186 = vperm.xlu0 %3864, %v1183_v2   ;;  %v3883_v4 = vld [vmem:[%s4265_s27 + $0x58] sm:$0xff]   ;;  %v3892_v5 = vld [vmem:[%s4265_s27 + $0xc0] sm:$0xff]   ;;  %v3893_v7 = vld [vmem:[%s4265_s27 + $0xc8] sm:$0xff]   ;;  %s813_s14 = scalar_lea.vmem %s4899_s11, %s3468_s22  ;;  %s803_s25 = scalar_lea.vmem %s4897_s9, %s3468_s22 }
  0x3e   : > { %3343 = vmatmul.mubr.msk.bf16.vlgmr.msra.gmra.mrb[0].mxu1 %vm936_vm1, %v3340_v49  ;;  %v3886_v6 = vld [vmem:[%s4265_s27 + $0x60] sm:$0xff]   ;;  %v3887_v8 = vld [vmem:[%s4265_s27 + $0x68] sm:$0xff]   ;;  %v3894_v9 = vld [vmem:[%s4265_s27 + $0xd0] sm:$0xff]   ;;  %s808_s26 = scalar_lea.vmem %s4898_s10, %s3468_s22 }
  0x3f   : > { %3612 = vmatpush3.bf16.msra.mxu1 %v1473_v52  ;;  %3613 = vmatprep.mubr.msk.bf16.mxu1 %vm936_vm1, %v3876_v53  ;;  %v3890_v10 = vld [vmem:[%s4265_s27 + $0x70] sm:$0xff]   ;;  %v3895_v11 = vld [vmem:[%s4265_s27 + $0xd8] sm:$0xff]   ;;  %v3896_v13 = vld [vmem:[%s4265_s27 + $0xe0] sm:$0xff]  }
  0x40   : > { %3584 = vmatmul.mubr.msk.bf16.gmra.mrb[4].mxu0 %vm936_vm1, %v3871_v50  ;;  %v3891_v12 = vld [vmem:[%s4265_s27 + $0x78] sm:$0xff]   ;;  %v3897_v14 = vld [vmem:[%s4265_s27 + $0xe8] sm:$0xff]   ;;  %v3898_v15 = vld [vmem:[%s4265_s27 + $0xf0] sm:$0xff]  }
  0x41   : > { %3587 = vmatprep.mubr.msk.bf16.mxu0 %vm936_vm1, %v3872_v51  ;;  %v1182_v16 = vld [vmem:[%s4893_s5] sm:$0x3]  ;;  %v3899_v17 = vld [vmem:[%s4265_s27 + $0xf8] sm:$0xff]   ;;  %v3412_v22 = vld [vmem:[%s4893_s5 + $0x4] sm:$0x3] }
  0x42   : > { %v3344_v18 = vld [vmem:[%s4271_s17 + $0x8] sm:$0xff]  ;;  %v3418_v23 = vld [vmem:[%s4893_s5 + $0x6] sm:$0x3]  ;;  %v4372_v24 = vld [vmem:[%s4892_s4] ss:$0 sm:$0xff] }
  0x43   : > { %v3415_v19 = vcombine.high %v3344_v18, %v3344_v18  ;;  %v3414_v20 = vcombine.low %v3344_v18, %v3344_v18  ;;  %v4393_v53 = vld [vmem:[%s4892_s4 + $0x1] ss:$0 sm:$0xff] }
  0x45   : > { %3416 = vmatprep.subr.msk.bf16.mxu0 %vm985_vm0, %v3415_v19  ;;  %v1686_v21 = vsel %vm985_vm0, %v3414_v20, 0 }
  0x46   : > { %3614 = vmatmul.mubr.msk.bf16.vlgmr.msra.gmra.mrb[4].mxu1 %vm936_vm1, %v3877_v55 }
  0x47   : > { %3617 = vmatprep.mubr.msk.bf16.mxu1 %vm936_vm1, %v3880_v56 }
  0x48   : > { %3588 = vmatmul.mubr.msk.bf16.gmra.mrb[8].mxu0 %vm936_vm1, %v3873_v54 }
  0x49   : > { %3591 = vmatprep.mubr.msk.bf16.mxu0 %vm936_vm1, %v3874_v57 }
  0x4e   : > { %3618 = vmatmul.mubr.msk.bf16.gmra.mrb[8].mxu1 %vm936_vm1, %v3881_v59 }
  0x4f   : > { %3621 = vmatprep.mubr.msk.bf16.mxu1 %vm936_vm1, %v3884_v60 }
  0x50   : > { %3592 = vmatmul.mubr.msk.bf16.gmra.mrb[12].mxu0 %vm936_vm1, %v3875_v58 }
  0x51   : > { %3595 = vmatprep.mubr.msk.bf16.mxu0 %vm936_vm1, %v3878_v61 }
  0x56   : > { %3622 = vmatmul.mubr.msk.bf16.gmra.mrb[12].mxu1 %vm936_vm1, %v3885_v63 }
  0x57   : > { %3625 = vmatprep.mubr.msk.bf16.mxu1 %vm936_vm1, %v3888_v0 }
  0x58   : > { %3596 = vmatmul.mubr.msk.bf16.gmra.mrb[16].mxu0 %vm936_vm1, %v3879_v62 }
  0x59   : > { %3599 = vmatprep.mubr.msk.bf16.mxu0 %vm936_vm1, %v3882_v1 }
  0x5e   : > { %3626 = vmatmul.mubr.msk.bf16.gmra.mrb[16].mxu1 %vm936_vm1, %v3889_v3 }
  0x5f   : > { %3629 = vmatprep.mubr.msk.bf16.mxu1 %vm936_vm1, %v3892_v5 }
  0x60   : > { %3600 = vmatmul.mubr.msk.bf16.gmra.mrb[20].mxu0 %vm936_vm1, %v3883_v4 }
  0x61   : > { %3603 = vmatprep.mubr.msk.bf16.mxu0 %vm936_vm1, %v3886_v6 }
  0x66   : > { %3630 = vmatmul.mubr.msk.bf16.gmra.mrb[20].mxu1 %vm936_vm1, %v3893_v7 }
  0x67   : > { %3633 = vmatprep.mubr.msk.bf16.mxu1 %vm936_vm1, %v3894_v9 }
  0x68   : > { %3604 = vmatmul.mubr.msk.bf16.gmra.mrb[24].mxu0 %vm936_vm1, %v3887_v8 }
  0x69   : > { %3607 = vmatprep.mubr.msk.bf16.mxu0 %vm936_vm1, %v3890_v10 }
  0x6e   : > { %3634 = vmatmul.mubr.msk.bf16.gmra.mrb[24].mxu1 %vm936_vm1, %v3895_v11 }
  0x6f   : > { %3637 = vmatprep.mubr.msk.bf16.mxu1 %vm936_vm1, %v3896_v13 }
  0x70   : > { %3608 = vmatmul.mubr.msk.bf16.gmra.mrb[28].mxu0 %vm936_vm1, %v3891_v12 }
  0x71   : > { %1235 = vmatprep.mubr.bf16.mxu0 %v4066_v40 }
  0x76   : > { %3638 = vmatmul.mubr.msk.bf16.gmra.mrb[28].mxu1 %vm936_vm1, %v3897_v14 }
  0x77   : > { %3641 = vmatprep.mubr.msk.bf16.mxu1 %vm936_vm1, %v3898_v15 }
  0x78   : > { %3339 = vmatmul.mubr.msk.bf16.vlgmr.msra.gmra.mrb[32].mxu0 %vm936_vm1, %v1182_v16 }
  0x79   : > { %1723 = vmatprep.mubr.bf16.mxu0 %v4066_v40  ;;  %1692 = vmatpush1.bf16.msra.mxu0 %v1686_v21 }
  0x7a   : > { %3420 = vmatprep.subr.msk.bf16.mxu0 %vm985_vm0, %v3415_v19 }
  0x7e   : > { %3642 = vmatmul.mubr.msk.bf16.gmra.mrb[32].mxu1 %vm936_vm1, %v3899_v17 }
  0x80   : > { %3417 = vmatmul.mubr.msk.bf16.vlgmr.msra.gmra.mrb[36].mxu0 %vm936_vm1, %v3412_v22 }
  0x81   : > { %1747 = vmatpush1.bf16.msra.mxu0 %v1686_v21  ;;  %1778 = vmatprep.mubr.bf16.mxu0 %v4066_v40 }
  0x88   : > { %3421 = vmatmul.mubr.msk.bf16.vlgmr.msra.gmra.mrb[40].mxu0 %vm936_vm1, %v3418_v23 }
 0x10b   : > { %v3581_v25 = vpop.f32.mrb[0].mxu0 }
 0x10c   : > { %v1032_v26 = vadd.f32 %v3581_v25, %v4372_v24  ;;  %v1023_v27 = vpop.f32.mrb[1].mxu0 }
 0x10d   : > { %v1024_v28 = vadd.f32 %v4372_v24, %v1023_v27  ;;  %v3582_v29 = vpop.f32.mrb[2].mxu0 }
 0x10e   : > { %v1035_v30 = vadd.f32 %v3582_v29, %v4372_v24  ;;  %v1026_v31 = vpop.f32.mrb[3].mxu0  ;;  %v1152_v33 = vmax.f32 %v1032_v26, 0.0 }
 0x10f   : > { %v1027_v32 = vadd.f32 %v4372_v24, %v1026_v31  ;;  %v1150_v35 = vmax.f32 %v1024_v28, 0.0 }
 0x110   : > { %v1153_v34 = vmax.f32 %v1035_v30, 0.0 }
 0x111   : > { %v1151_v36 = vmax.f32 %v1027_v32, 0.0  ;;  %v4380_v38 = vpop.f32.mrb[0].mxu1 }
 0x112   : > { %v4378_v37 = vpack.c.bf16 %v1153_v34, %v1152_v33  ;;  %v4384_v41 = vpop.f32.mrb[1].mxu1 }
 0x113   : > { %v4382_v39 = vpack.c.bf16 %v1151_v36, %v1150_v35  ;;  %v3585_v40 = vpop.f32.mrb[4].mxu0  ;;  %v1296_v44 = vpop.f32.mrb[2].mxu1 }
 0x114   : > { %v1048_v42 = vadd.f32 %v3585_v40, %v4372_v24  ;;  %v1039_v43 = vpop.f32.mrb[5].mxu0  ;;  %v1297_v47 = vpop.f32.mrb[3].mxu1 }
 0x115   : > { %v1040_v45 = vadd.f32 %v4372_v24, %v1039_v43  ;;  %v3586_v46 = vpop.f32.mrb[6].mxu0 }
 0x116   : > { %v1051_v48 = vadd.f32 %v3586_v46, %v4372_v24  ;;  %v1042_v49 = vpop.f32.mrb[7].mxu0  ;;  %v1156_v51 = vmax.f32 %v1048_v42, 0.0 }
 0x117   : > { %v1043_v50 = vadd.f32 %v4372_v24, %v1042_v49  ;;  %v1154_v54 = vmax.f32 %v1040_v45, 0.0 }
 0x118   : > { %v1157_v52 = vmax.f32 %v1051_v48, 0.0 }
 0x119   : > { %v1155_v55 = vmax.f32 %v1043_v50, 0.0  ;;  %v3615_v57 = vpop.f32.mrb[4].mxu1 }
 0x11a   : > { %v4395_v56 = vpack.c.bf16 %v1157_v52, %v1156_v51  ;;  %v1518_v60 = vadd.f32 %v3615_v57, %v4393_v53  ;;  %v1509_v61 = vpop.f32.mrb[5].mxu1 }
 0x11b   : > { %v4397_v58 = vpack.c.bf16 %v1155_v55, %v1154_v54  ;;  %v3589_v59 = vpop.f32.mrb[8].mxu0  ;;  %v1510_v0 = vadd.f32 %v4393_v53, %v1509_v61  ;;  %v3616_v1 = vpop.f32.mrb[6].mxu1 }
 0x11c   : > { %v1064_v62 = vadd.f32 %v3589_v59, %v4372_v24  ;;  %v1055_v63 = vpop.f32.mrb[9].mxu0  ;;  %v1638_v4 = vmax.f32 %v1518_v60, 0.0  ;;  %v1521_v5 = vadd.f32 %v3616_v1, %v4393_v53  ;;  %v1512_v6 = vpop.f32.mrb[7].mxu1 }
 0x11d   : > { %v1056_v2 = vadd.f32 %v4372_v24, %v1055_v63  ;;  %v3590_v3 = vpop.f32.mrb[10].mxu0  ;;  %v1636_v9 = vmax.f32 %v1510_v0, 0.0  ;;  %v1513_v10 = vadd.f32 %v4393_v53, %v1512_v6 }
 0x11e   : > { %v1067_v7 = vadd.f32 %v3590_v3, %v4372_v24  ;;  %v1058_v8 = vpop.f32.mrb[11].mxu0  ;;  %v1639_v12 = vmax.f32 %v1521_v5, 0.0  ;;  %v1160_v13 = vmax.f32 %v1064_v62, 0.0 }
 0x11f   : > { %v1059_v11 = vadd.f32 %v4372_v24, %v1058_v8  ;;  %v1637_v15 = vmax.f32 %v1513_v10, 0.0  ;;  %v1158_v16 = vmax.f32 %v1056_v2, 0.0 }
 0x120   : > { %v1161_v14 = vmax.f32 %v1067_v7, 0.0  ;;  %v4407_v18 = vpack.c.bf16 %v1639_v12, %v1638_v4 }
 0x121   : > { %v1159_v17 = vmax.f32 %v1059_v11, 0.0  ;;  %v4411_v20 = vpack.c.bf16 %v1637_v15, %v1636_v9  ;;  %v3619_v21 = vpop.f32.mrb[8].mxu1 }
 0x122   : > { %v4409_v19 = vpack.c.bf16 %v1161_v14, %v1160_v13  ;;  %v1534_v25 = vadd.f32 %v3619_v21, %v4393_v53  ;;  %v1525_v26 = vpop.f32.mrb[9].mxu1 }
 0x123   : > { %v4413_v22 = vpack.c.bf16 %v1159_v17, %v1158_v16  ;;  %v3593_v23 = vpop.f32.mrb[12].mxu0  ;;  %v1526_v29 = vadd.f32 %v4393_v53, %v1525_v26  ;;  %v3620_v30 = vpop.f32.mrb[10].mxu1 }
 0x124   : > { %v1080_v27 = vadd.f32 %v3593_v23, %v4372_v24  ;;  %v1071_v28 = vpop.f32.mrb[13].mxu0  ;;  %v1642_v33 = vmax.f32 %v1534_v25, 0.0  ;;  %v1537_v34 = vadd.f32 %v3620_v30, %v4393_v53  ;;  %v1528_v35 = vpop.f32.mrb[11].mxu1 }
 0x125   : > { %v1072_v31 = vadd.f32 %v4372_v24, %v1071_v28  ;;  %v3594_v32 = vpop.f32.mrb[14].mxu0  ;;  %v1640_v42 = vmax.f32 %v1526_v29, 0.0  ;;  %v1529_v43 = vadd.f32 %v4393_v53, %v1528_v35 }
 0x126   : > { %v1083_v36 = vadd.f32 %v3594_v32, %v4372_v24  ;;  %v1074_v40 = vpop.f32.mrb[15].mxu0  ;;  %v1643_v45 = vmax.f32 %v1537_v34, 0.0  ;;  %v1164_v46 = vmax.f32 %v1080_v27, 0.0 }
 0x127   : > { %v1075_v44 = vadd.f32 %v4372_v24, %v1074_v40  ;;  %v1641_v48 = vmax.f32 %v1529_v43, 0.0  ;;  %v1162_v49 = vmax.f32 %v1072_v31, 0.0 }
 0x128   : > { %v1165_v47 = vmax.f32 %v1083_v36, 0.0  ;;  %v4423_v51 = vpack.c.bf16 %v1643_v45, %v1642_v33 }
 0x129   : > { %v1163_v50 = vmax.f32 %v1075_v44, 0.0  ;;  %v4427_v54 = vpack.c.bf16 %v1641_v48, %v1640_v42  ;;  %v3623_v55 = vpop.f32.mrb[12].mxu1 }
 0x12a   : > { %v4425_v52 = vpack.c.bf16 %v1165_v47, %v1164_v46  ;;  %v1550_v60 = vadd.f32 %v3623_v55, %v4393_v53  ;;  %v1541_v61 = vpop.f32.mrb[13].mxu1 }
 0x12b   : > { %v4429_v57 = vpack.c.bf16 %v1163_v50, %v1162_v49  ;;  %v3597_v59 = vpop.f32.mrb[16].mxu0  ;;  %v1542_v0 = vadd.f32 %v4393_v53, %v1541_v61  ;;  %v3624_v1 = vpop.f32.mrb[14].mxu1 }
 0x12c   : > { %v1096_v62 = vadd.f32 %v3597_v59, %v4372_v24  ;;  %v1087_v63 = vpop.f32.mrb[17].mxu0  ;;  %v1646_v4 = vmax.f32 %v1550_v60, 0.0  ;;  %v1553_v5 = vadd.f32 %v3624_v1, %v4393_v53  ;;  %v1544_v6 = vpop.f32.mrb[15].mxu1 }
 0x12d   : > { %v1088_v2 = vadd.f32 %v4372_v24, %v1087_v63  ;;  %v3598_v3 = vpop.f32.mrb[18].mxu0  ;;  %v1644_v9 = vmax.f32 %v1542_v0, 0.0  ;;  %v1545_v10 = vadd.f32 %v4393_v53, %v1544_v6 }
 0x12e   : > { %v1099_v7 = vadd.f32 %v3598_v3, %v4372_v24  ;;  %v1090_v8 = vpop.f32.mrb[19].mxu0  ;;  %v1647_v12 = vmax.f32 %v1553_v5, 0.0  ;;  %v1168_v13 = vmax.f32 %v1096_v62, 0.0 }
 0x12f   : > { %v1091_v11 = vadd.f32 %v4372_v24, %v1090_v8  ;;  %v1645_v15 = vmax.f32 %v1545_v10, 0.0  ;;  %v1166_v16 = vmax.f32 %v1088_v2, 0.0 }
 0x130   : > { %v1169_v14 = vmax.f32 %v1099_v7, 0.0  ;;  %v4439_v21 = vpack.c.bf16 %v1647_v12, %v1646_v4 }
 0x131   : > { %v1167_v17 = vmax.f32 %v1091_v11, 0.0  ;;  %v4443_v25 = vpack.c.bf16 %v1645_v15, %v1644_v9  ;;  %v3627_v26 = vpop.f32.mrb[16].mxu1 }
 0x132   : > { %v4441_v23 = vpack.c.bf16 %v1169_v14, %v1168_v13  ;;  %v1566_v29 = vadd.f32 %v3627_v26, %v4393_v53  ;;  %v1557_v30 = vpop.f32.mrb[17].mxu1 }
 0x133   : > { %v4445_v27 = vpack.c.bf16 %v1167_v17, %v1166_v16  ;;  %v3601_v28 = vpop.f32.mrb[20].mxu0  ;;  %v1558_v33 = vadd.f32 %v4393_v53, %v1557_v30  ;;  %v3628_v34 = vpop.f32.mrb[18].mxu1 }
 0x134   : > { %v1112_v31 = vadd.f32 %v3601_v28, %v4372_v24  ;;  %v1103_v32 = vpop.f32.mrb[21].mxu0  ;;  %v1650_v40 = vmax.f32 %v1566_v29, 0.0  ;;  %v1569_v42 = vadd.f32 %v3628_v34, %v4393_v53  ;;  %v1560_v43 = vpop.f32.mrb[19].mxu1 }
 0x135   : > { %v1104_v35 = vadd.f32 %v4372_v24, %v1103_v32  ;;  %v3602_v36 = vpop.f32.mrb[22].mxu0  ;;  %v1648_v46 = vmax.f32 %v1558_v33, 0.0  ;;  %v1561_v47 = vadd.f32 %v4393_v53, %v1560_v43 }
 0x136   : > { %v1115_v44 = vadd.f32 %v3602_v36, %v4372_v24  ;;  %v1106_v45 = vpop.f32.mrb[23].mxu0  ;;  %v1651_v49 = vmax.f32 %v1569_v42, 0.0  ;;  %v1172_v50 = vmax.f32 %v1112_v31, 0.0 }
 0x137   : > { %v1107_v48 = vadd.f32 %v4372_v24, %v1106_v45  ;;  %v1649_v59 = vmax.f32 %v1561_v47, 0.0  ;;  %v1170_v60 = vmax.f32 %v1104_v35, 0.0 }
 0x138   : > { %v1173_v55 = vmax.f32 %v1115_v44, 0.0  ;;  %v4455_v62 = vpack.c.bf16 %v1651_v49, %v1650_v40 }
 0x139   : > { %v1171_v61 = vmax.f32 %v1107_v48, 0.0  ;;  %v4459_v0 = vpack.c.bf16 %v1649_v59, %v1648_v46  ;;  %v3631_v1 = vpop.f32.mrb[20].mxu1 }
 0x13a   : > { %v4457_v63 = vpack.c.bf16 %v1173_v55, %v1172_v50  ;;  %v1582_v4 = vadd.f32 %v3631_v1, %v4393_v53  ;;  %v1573_v5 = vpop.f32.mrb[21].mxu1 }
 0x13b   : > { %v4461_v2 = vpack.c.bf16 %v1171_v61, %v1170_v60  ;;  %v3605_v3 = vpop.f32.mrb[24].mxu0  ;;  %v1574_v8 = vadd.f32 %v4393_v53, %v1573_v5  ;;  %v3632_v9 = vpop.f32.mrb[22].mxu1 }
 0x13c   : > { %v1128_v6 = vadd.f32 %v3605_v3, %v4372_v24  ;;  %v1119_v7 = vpop.f32.mrb[25].mxu0  ;;  %v1654_v12 = vmax.f32 %v1582_v4, 0.0  ;;  %v1585_v13 = vadd.f32 %v3632_v9, %v4393_v53  ;;  %v1576_v14 = vpop.f32.mrb[23].mxu1 }
 0x13d   : > { %v1120_v10 = vadd.f32 %v4372_v24, %v1119_v7  ;;  %v3606_v11 = vpop.f32.mrb[26].mxu0  ;;  %v1652_v17 = vmax.f32 %v1574_v8, 0.0  ;;  %v1577_v26 = vadd.f32 %v4393_v53, %v1576_v14  ;;  %v1187_v14 = vpop.permute.xlu0 %1186 }
 0x13e   : > { %v1131_v15 = vadd.f32 %v3606_v11, %v4372_v24  ;;  %v1122_v16 = vpop.f32.mrb[27].mxu0  ;;  %v1655_v29 = vmax.f32 %v1585_v13, 0.0  ;;  %v1176_v30 = vmax.f32 %v1128_v6, 0.0 }
 0x13f   : > { %v1123_v28 = vadd.f32 %v4372_v24, %v1122_v16  ;;  %v1653_v32 = vmax.f32 %v1577_v26, 0.0  ;;  %v1174_v33 = vmax.f32 %v1120_v10, 0.0 }
 0x140   : > { %v1177_v31 = vmax.f32 %v1131_v15, 0.0  ;;  %v4471_v35 = vpack.c.bf16 %v1655_v29, %v1654_v12 }
 0x141   : > { %v1175_v34 = vmax.f32 %v1123_v28, 0.0  ;;  %v1795_v40 = vpack.c.bf16 %v1653_v32, %v1652_v17  ;;  %v3635_v42 = vpop.f32.mrb[24].mxu1 }
 0x142   : > { %v4473_v36 = vpack.c.bf16 %v1177_v31, %v1176_v30  ;;  %v1598_v45 = vadd.f32 %v3635_v42, %v4393_v53  ;;  %v1589_v46 = vpop.f32.mrb[25].mxu1 }
 0x143   : > { %v4475_v43 = vpack.c.bf16 %v1175_v34, %v1174_v33  ;;  %v3609_v44 = vpop.f32.mrb[28].mxu0  ;;  %v1590_v49 = vadd.f32 %v4393_v53, %v1589_v46  ;;  %v3636_v50 = vpop.f32.mrb[26].mxu1  ;;  %3647 = vmatprep.mubr.msk.bf16.mxu0 %vm1805_vm2, %v1795_v40 }
 0x144   : > { %v1144_v47 = vadd.f32 %v3609_v44, %v4372_v24  ;;  %v1135_v48 = vpop.f32.mrb[29].mxu0  ;;  %v1658_v60 = vmax.f32 %v1598_v45, 0.0  ;;  %v1601_v61 = vadd.f32 %v3636_v50, %v4393_v53  ;;  %v1592_v1 = vpop.f32.mrb[27].mxu1 }
 0x145   : > { %v1136_v55 = vadd.f32 %v4372_v24, %v1135_v48  ;;  %v3610_v59 = vpop.f32.mrb[30].mxu0  ;;  %v1656_v5 = vmax.f32 %v1590_v49, 0.0  ;;  %v1593_v6 = vadd.f32 %v4393_v53, %v1592_v1 }
 0x146   : > { %v1147_v3 = vadd.f32 %v3610_v59, %v4372_v24  ;;  %v1138_v4 = vpop.f32.mrb[31].mxu0  ;;  %v1659_v8 = vmax.f32 %v1601_v61, 0.0  ;;  %v1180_v9 = vmax.f32 %v1144_v47, 0.0 }
 0x147   : > { %v1139_v7 = vadd.f32 %v4372_v24, %v1138_v4  ;;  %v1657_v11 = vmax.f32 %v1593_v6, 0.0  ;;  %v1178_v12 = vmax.f32 %v1136_v55, 0.0 }
 0x148   : > { %v1181_v10 = vmax.f32 %v1147_v3, 0.0  ;;  %v1798_v15 = vpack.c.bf16 %v1659_v8, %v1658_v60 }
 0x149   : > { %v1179_v13 = vmax.f32 %v1139_v7, 0.0  ;;  %v1797_v17 = vpack.c.bf16 %v1657_v11, %v1656_v5  ;;  %v3639_v26 = vpop.f32.mrb[28].mxu1 }
 0x14a   : > { %v4486_v16 = vpack.c.bf16 %v1181_v10, %v1180_v9  ;;  %v1614_v30 = vadd.f32 %v3639_v26, %v4393_v53  ;;  %v1605_v31 = vpop.f32.mrb[29].mxu1 }
 0x14b   : > { %v4488_v28 = vpack.c.bf16 %v1179_v13, %v1178_v12  ;;  %v1237_v29 = vpop.f32.mrb[32].mxu0  ;;  %v1606_v33 = vadd.f32 %v4393_v53, %v1605_v31  ;;  %v3640_v34 = vpop.f32.mrb[30].mxu1 }
 0x14c   : > { %v1238_v32 = vadd.f32 %v1237_v29, %v1187_v14  ;;  %v1239_v24 = vpop.f32.mrb[33].mxu0  ;;  %v1662_v44 = vmax.f32 %v1614_v30, 0.0  ;;  %v1617_v45 = vadd.f32 %v3640_v34, %v4393_v53  ;;  %v1608_v46 = vpop.f32.mrb[31].mxu1 }
 0x14d   : > { %v1240_v40 = vadd.f32 %v1239_v24, %v1187_v14  ;;  %v1241_v42 = vpop.f32.mrb[34].mxu0  ;;  %v1660_v48 = vmax.f32 %v1606_v33, 0.0  ;;  %v1609_v49 = vadd.f32 %v4393_v53, %v1608_v46 }
 0x14e   : > { %v1242_v47 = vpop.f32.mrb[35].mxu0  ;;  %v1244_v50 = vmax.f32 %v1238_v32, 0.0  ;;  %v1663_v59 = vmax.f32 %v1617_v45, 0.0 }
 0x14f   : > { %v1245_v55 = vmax.f32 %v1240_v40, 0.0  ;;  %v1661_v60 = vmax.f32 %v1609_v49, 0.0 }
 0x150   : > { %v1800_v1 = vpack.c.bf16 %v1663_v59, %v1662_v44  ;;  %v1803_v5 = vpack.c.bf16 %v1244_v50, %v1244_v50 }
 0x151   : > { %v1804_v61 = vpack.c.bf16 %v1245_v55, %v1245_v55  ;;  %v1799_v3 = vpack.c.bf16 %v1661_v60, %v1660_v48  ;;  %v3643_v4 = vpop.f32.mrb[32].mxu1 }
 0x152   : > { %v1630_v7 = vadd.f32 %v3643_v4, %v4393_v53  ;;  %v1621_v8 = vpop.f32.mrb[33].mxu1  ;;  %v1956_v29 = vsel %vm1830_vm3, %v1803_v5, 0 }
 0x153   : > { %3833 = vmatprep.subr.msk.bf16.mxu0 %vm1830_vm3, %v1804_v61  ;;  %v1832_v6 = vsel %vm1830_vm3, %v1804_v61, 0  ;;  %v1622_v9 = vadd.f32 %v4393_v53, %v1621_v8  ;;  %v3644_v10 = vpop.f32.mrb[34].mxu1 }
 0x154   : > { %3646 = vmatpush3.bf16.msra.mxu0 %v1832_v6  ;;  %v1666_v11 = vmax.f32 %v1630_v7, 0.0  ;;  %v1633_v12 = vadd.f32 %v3644_v10, %v4393_v53  ;;  %v1624_v13 = vpop.f32.mrb[35].mxu1 }
 0x155   : > { %3834 = vmatprep.subr.msk.bf16.mxu0 %vm1830_vm3, %v1803_v5  ;;  %v1664_v14 = vmax.f32 %v1622_v9, 0.0  ;;  %v1625_v26 = vadd.f32 %v4393_v53, %v1624_v13  ;;  %v4528_v53 = vpop.f32.mrb[36].mxu0 }
 0x156   : > { %v1667_v30 = vmax.f32 %v1633_v12, 0.0 }
 0x157   : > { %3648 = vmatmul.mubr.msk.bf16.vlgmr.msra.gmra.mrb[44].mxu0 %vm1805_vm2, %v4471_v35  ;;  %v1665_v31 = vmax.f32 %v1625_v26, 0.0 }
 0x158   : > { %3664 = vmatpush3.bf16.msra.mxu0 %v1956_v29  ;;  %3651 = vmatprep.mubr.msk.bf16.mxu0 %vm1805_vm2, %v1797_v17  ;;  %v1802_v32 = vpack.c.bf16 %v1667_v30, %v1666_v11 }
 0x159   : > { %v1801_v24 = vpack.c.bf16 %v1665_v31, %v1664_v14 }
 0x15f   : > { %3652 = vmatmul.mubr.msk.bf16.gmra.mrb[48].mxu0 %vm1805_vm2, %v1798_v15 }
 0x160   : > { %3655 = vmatprep.mubr.msk.bf16.mxu0 %vm1805_vm2, %v1799_v3 }
 0x167   : > { %3656 = vmatmul.mubr.msk.bf16.gmra.mrb[52].mxu0 %vm1805_vm2, %v1800_v1 }
 0x168   : > { %3659 = vmatprep.mubr.msk.bf16.mxu0 %vm1805_vm2, %v1801_v24 }
 0x16f   : > { %3660 = vmatmul.mubr.msk.bf16.gmra.mrb[56].mxu0 %vm1805_vm2, %v1802_v32 }
 0x170   : > { %3665 = vmatprep.mubr.msk.bf16.mxu0 %vm1805_vm2, %v4411_v20 }
 0x177   : > { %3666 = vmatmul.mubr.msk.bf16.vlgmr.msra.gmra.mrb[44].mxu0 %vm1805_vm2, %v4407_v18  ;;  %v4530_v18 = vpop.f32.mrb[37].mxu0 }
 0x178   : > { %3669 = vmatprep.mubr.msk.bf16.mxu0 %vm1805_vm2, %v4427_v54  ;;  %v1729_v20 = vpop.f32.mrb[38].mxu0 }
 0x17f   : > { %3670 = vmatmul.mubr.msk.bf16.gmra.mrb[48].mxu0 %vm1805_vm2, %v4423_v51  ;;  %v1730_v51 = vpop.f32.mrb[39].mxu0 }
 0x180   : > { %3673 = vmatprep.mubr.msk.bf16.mxu0 %vm1805_vm2, %v4443_v25  ;;  %v4532_v54 = vpop.f32.mrb[40].mxu0 }
 0x181   : > { %v4534_v25 = vpop.f32.mrb[41].mxu0 }
 0x187   : > { %3674 = vmatmul.mubr.msk.bf16.gmra.mrb[52].mxu0 %vm1805_vm2, %v4439_v21  ;;  %v1784_v21 = vpop.f32.mrb[42].mxu0 }
 0x188   : > { %3677 = vmatprep.mubr.msk.bf16.mxu0 %vm1805_vm2, %v4459_v0  ;;  %v1785_v35 = vpop.f32.mrb[43].mxu0 }
 0x18f   : > { %3678 = vmatmul.mubr.msk.bf16.gmra.mrb[56].mxu0 %vm1805_vm2, %v4455_v62 }
 0x190   : > { %3741 = vmatprep.mubr.msk.bf16.mxu0 %vm1805_vm2, %v4382_v39 }
 0x24a   : > { %v3667_v15 = vpop.f32.mrb[44].mxu0 }
 0x24b   : > { %v1992_v0 = vpop.f32.mrb[45].mxu0  ;;  %v2057_v39 = vmul.f32 0.35355338, %v3667_v15 }
 0x24c   : > { %v2055_v17 = vmul.f32 0.35355338, %v1992_v0  ;;  %v3668_v33 = vpop.f32.mrb[46].mxu0 }
 0x24d   : > { %v1995_v62 = vpop.f32.mrb[47].mxu0  ;;  %v2058_v46 = vmul.f32 0.35355338, %v3668_v33 }
 0x24e   : > { %v2056_v34 = vmul.f32 0.35355338, %v1995_v62  ;;  %2071 = vmax.xlane.f32.xlu0 %v2055_v17 }
 0x250   : > { %2073 = vmax.xlane.f32.xlu1 %v2056_v34 }
 0x252   : > { %v3671_v40 = vpop.f32.mrb[48].mxu0 }
 0x253   : > { %v2008_v42 = vpop.f32.mrb[49].mxu0  ;;  %v2061_v61 = vmul.f32 0.35355338, %v3671_v40 }
 0x254   : > { %2075 = vmax.xlane.f32.xlu1 %v2057_v39  ;;  %v3672_v44 = vpop.f32.mrb[50].mxu0  ;;  %v2059_v47 = vmul.f32 0.35355338, %v2008_v42 }
 0x255   : > { %v2011_v45 = vpop.f32.mrb[51].mxu0  ;;  %v2062_v7 = vmul.f32 0.35355338, %v3672_v44 }
 0x256   : > { %v2060_v60 = vmul.f32 0.35355338, %v2011_v45 }
 0x258   : > { %2077 = vmax.xlane.f32.xlu1 %v2058_v46 }
 0x25a   : > { %v3675_v48 = vpop.f32.mrb[52].mxu0 }
 0x25b   : > { %v4536_v49 = vmul.f32 0.35355338, %v3675_v48  ;;  %v2024_v50 = vpop.f32.mrb[53].mxu0 }
 0x25c   : > { %2079 = vmax.xlane.f32.xlu1 %v2059_v47  ;;  %v3676_v55 = vpop.f32.mrb[54].mxu0  ;;  %v2063_v9 = vmul.f32 0.35355338, %v2024_v50 }
 0x25d   : > { %2091 = vmax.xlane.f32.xlu0 %v4536_v49  ;;  %v2027_v59 = vpop.f32.mrb[55].mxu0  ;;  %v4548_v11 = vmul.f32 0.35355338, %v3676_v55 }
 0x25e   : > { %v4545_v10 = vmul.f32 0.35355338, %v2027_v59 }
 0x260   : > { %2081 = vmax.xlane.f32.xlu1 %v2060_v60 }
 0x262   : > { %v3679_v1 = vpop.f32.mrb[56].mxu0 }
 0x263   : > { %v2040_v3 = vpop.f32.mrb[57].mxu0  ;;  %v4542_v8 = vmul.f32 0.35355338, %v3679_v1 }
 0x264   : > { %v4539_v4 = vmul.f32 0.35355338, %v2040_v3  ;;  %2083 = vmax.xlane.f32.xlu1 %v2061_v61  ;;  %v3680_v5 = vpop.f32.mrb[58].mxu0 }
 0x265   : > { %v2043_v6 = vpop.f32.mrb[59].mxu0  ;;  %v4554_v13 = vmul.f32 0.35355338, %v3680_v5 }
 0x266   : > { %2095 = vmax.xlane.f32.xlu0 %v4539_v4  ;;  %v4551_v12 = vmul.f32 0.35355338, %v2043_v6 }
 0x268   : > { %2085 = vmax.xlane.f32.xlu1 %v2062_v7 }
 0x26a   : > { %2099 = vmax.xlane.f32.xlu0 %v4542_v8 }
 0x26c   : > { %2087 = vmax.xlane.f32.xlu1 %v2063_v9 }
 0x270   : > { %2089 = vmax.xlane.f32.xlu1 %v4545_v10 }
 0x274   : > { %2093 = vmax.xlane.f32.xlu1 %v4548_v11 }
 0x278   : > { %2097 = vmax.xlane.f32.xlu1 %v4551_v12 }
 0x27c   : > { %2101 = vmax.xlane.f32.xlu1 %v4554_v13 }
 0x2db   : > { %v2072_v14 = vpop.xlane.xlu0 %2071 }
 0x2dc   : > { %v2103_v26 = vsub.f32 %v2055_v17, %v2072_v14 }
 0x2dd   : > { %v2074_v29 = vpop.xlane.xlu1 %2073 }
 0x2de   : > { %v2119_v30 = vmul.f32 1.442695, %v2103_v26  ;;  %v2104_v31 = vsub.f32 %v2056_v34, %v2074_v29 }
 0x2e0   : > { %3902 = vpow2.f32 %v2119_v30  ;;  %v2121_v32 = vmul.f32 1.442695, %v2104_v31 }
 0x2e1   : > { %v2076_v24 = vpop.xlane.xlu1 %2075 }
 0x2e2   : > { %3904 = vpow2.f32 %v2121_v32  ;;  %v2105_v20 = vsub.f32 %v2057_v39, %v2076_v24 }
 0x2e4   : > { %v2123_v51 = vmul.f32 1.442695, %v2105_v20 }
 0x2e5   : > { %v2078_v21 = vpop.xlane.xlu1 %2077 }
 0x2e6   : > { %3906 = vpow2.f32 %v2123_v51  ;;  %v2106_v35 = vsub.f32 %v2058_v46, %v2078_v21 }
 0x2e8   : > { %v2125_v15 = vmul.f32 1.442695, %v2106_v35 }
 0x2e9   : > { %v2080_v0 = vpop.xlane.xlu1 %2079 }
 0x2ea   : > { %v4557_v33 = vpop.eup %3902  ;;  %3908 = vpow2.f32 %v2125_v15  ;;  %v2107_v62 = vsub.f32 %v2059_v47, %v2080_v0  ;;  %v2092_v47 = vpop.xlane.xlu0 %2091 }
 0x2eb   : > { %2151 = vadd.xlane.f32.xlu0 %v4557_v33  ;;  %v2113_v5 = vsub.f32 %v4536_v49, %v2092_v47 }
 0x2ec   : > { %v4560_v17 = vpop.eup %3904  ;;  %v2127_v34 = vmul.f32 1.442695, %v2107_v62 }
 0x2ed   : > { %v2082_v40 = vpop.xlane.xlu1 %2081  ;;  %2153 = vadd.xlane.f32.xlu1 %v4560_v17  ;;  %v2139_v29 = vmul.f32 1.442695, %v2113_v5 }
 0x2ee   : > { %3910 = vpow2.f32 %v2127_v34  ;;  %v2108_v39 = vsub.f32 %v2060_v60, %v2082_v40  ;;  %v4067_v34 = vmov 0.0  }
 0x2ef   : > { %3681 = vmatprep.subr.bf16.mxu1 %v4067_v34  ;;  %3697 = vmatprep.mubr.msk.bf16.mxu1 %vm4068_vm4, %v4067_v34 }
 0x2f0   : > { %v4563_v42 = vpop.eup %3906  ;;  %v2129_v44 = vmul.f32 1.442695, %v2108_v39 }
 0x2f1   : > { %v2084_v45 = vpop.xlane.xlu1 %2083  ;;  %2155 = vadd.xlane.f32.xlu0 %v4563_v42 }
 0x2f2   : > { %3912 = vpow2.f32 %v2129_v44  ;;  %v2109_v46 = vsub.f32 %v2061_v61, %v2084_v45 }
 0x2f3   : > { %v2096_v60 = vpop.xlane.xlu0 %2095 }
 0x2f4   : > { %v4566_v48 = vpop.eup %3908  ;;  %v2131_v50 = vmul.f32 1.442695, %v2109_v46  ;;  %v2115_v30 = vsub.f32 %v4539_v4, %v2096_v60 }
 0x2f5   : > { %v2086_v55 = vpop.xlane.xlu1 %2085  ;;  %2157 = vadd.xlane.f32.xlu1 %v4566_v48 }
 0x2f6   : > { %3914 = vpow2.f32 %v2131_v50  ;;  %v2110_v59 = vsub.f32 %v2062_v7, %v2086_v55  ;;  %v2143_v20 = vmul.f32 1.442695, %v2115_v30  ;;  %v3413_v55 = vld [vmem:[%s4894_s6 + $0x8] sm:$0xf] }
 0x2f7   : > { %v2100_v7 = vpop.xlane.xlu0 %2099 }
 0x2f8   : > { %v4569_v1 = vpop.eup %3910  ;;  %v2133_v3 = vmul.f32 1.442695, %v2110_v59  ;;  %v3341_v59 = vld [vmem:[%s4894_s6 + $0x4] sm:$0xf] }
 0x2f9   : > { %v2088_v6 = vpop.xlane.xlu1 %2087  ;;  %2159 = vadd.xlane.f32.xlu0 %v4569_v1 }
 0x2fa   : > { %3916 = vpow2.f32 %v2133_v3  ;;  %v2111_v61 = vsub.f32 %v2063_v9, %v2088_v6  ;;  %v2117_v9 = vsub.f32 %v4542_v8, %v2100_v7 }
 0x2fc   : > { %v4573_v14 = vpop.eup %3912  ;;  %v2135_v26 = vmul.f32 1.442695, %v2111_v61  ;;  %v2147_v15 = vmul.f32 1.442695, %v2117_v9 }
 0x2fd   : > { %v2090_v31 = vpop.xlane.xlu1 %2089  ;;  %2161 = vadd.xlane.f32.xlu1 %v4573_v14 }
 0x2fe   : > { %3918 = vpow2.f32 %v2135_v26  ;;  %v2112_v32 = vsub.f32 %v4545_v10, %v2090_v31 }
 0x2ff   : > { %3920 = vpow2.f32 %v2139_v29 }
 0x300   : > { %v4578_v24 = vpop.eup %3914  ;;  %v2137_v49 = vmul.f32 1.442695, %v2112_v32 }
 0x301   : > { %v2094_v51 = vpop.xlane.xlu1 %2093  ;;  %2163 = vadd.xlane.f32.xlu0 %v4578_v24 }
 0x302   : > { %3922 = vpow2.f32 %v2137_v49  ;;  %v2114_v4 = vsub.f32 %v4548_v11, %v2094_v51 }
 0x303   : > { %3924 = vpow2.f32 %v2143_v20 }
 0x304   : > { %v4583_v21 = vpop.eup %3916  ;;  %v2141_v35 = vmul.f32 1.442695, %v2114_v4 }
 0x305   : > { %2165 = vadd.xlane.f32.xlu1 %v4583_v21  ;;  %v2098_v10 = vpop.xlane.xlu1 %2097 }
 0x306   : > { %3926 = vpow2.f32 %v2141_v35  ;;  %v2116_v0 = vsub.f32 %v4551_v12, %v2098_v10 }
 0x307   : > { %3928 = vpow2.f32 %v2147_v15 }
 0x308   : > { %v4587_v62 = vpop.eup %3918  ;;  %v2145_v8 = vmul.f32 1.442695, %v2116_v0 }
 0x309   : > { %2167 = vadd.xlane.f32.xlu0 %v4587_v62  ;;  %v2102_v11 = vpop.xlane.xlu1 %2101  ;;  %v4592_v39 = vpop.eup %3920 }
 0x30a   : > { %3930 = vpow2.f32 %v2145_v8  ;;  %v2118_v40 = vsub.f32 %v4554_v13, %v2102_v11 }
 0x30c   : > { %v4594_v44 = vpop.eup %3922  ;;  %v2149_v45 = vmul.f32 1.442695, %v2118_v40 }
 0x30d   : > { %2171 = vadd.xlane.f32.xlu0 %v4592_v39  ;;  %2169 = vadd.xlane.f32.xlu1 %v4594_v44  ;;  %v4598_v12 = vpop.eup %3924 }
 0x30e   : > { %3932 = vpow2.f32 %v2149_v45 }
 0x310   : > { %v4600_v46 = vpop.eup %3926 }
 0x311   : > { %2175 = vadd.xlane.f32.xlu0 %v4598_v12  ;;  %2173 = vadd.xlane.f32.xlu1 %v4600_v46  ;;  %v4604_v47 = vpop.eup %3928 }
 0x314   : > { %v4606_v13 = vpop.eup %3930 }
 0x315   : > { %2179 = vadd.xlane.f32.xlu0 %v4604_v47  ;;  %2177 = vadd.xlane.f32.xlu1 %v4606_v13 }
 0x318   : > { %v4610_v50 = vpop.eup %3932 }
 0x319   : > { %2181 = vadd.xlane.f32.xlu1 %v4610_v50 }
 0x32a   : > { %1674 = vperm.xlu1 %3865, %v3413_v55  }
 0x32b   : > { %1252 = vperm.xlu0 %3864, %v3341_v59  }
 0x378   : > { %v2152_v60 = vpop.xlane.xlu0 %2151 }
 0x379   : > { %3934 = vrcp.f32 %v2152_v60 }
 0x37a   : > { %v2154_v3 = vpop.xlane.xlu1 %2153 }
 0x37b   : > { %3936 = vrcp.f32 %v2154_v3 }
 0x37e   : > { %v2156_v5 = vpop.xlane.xlu0 %2155 }
 0x37f   : > { %3938 = vrcp.f32 %v2156_v5 }
 0x382   : > { %v2158_v6 = vpop.xlane.xlu1 %2157 }
 0x383   : > { %v3935_v61 = vpop.eup %3934  ;;  %3940 = vrcp.f32 %v2158_v6 }
 0x384   : > { %v2215_v30 = vmul.f32 %v3935_v61, %v4557_v33 }
 0x385   : > { %v3937_v26 = vpop.eup %3936 }
 0x386   : > { %v2160_v29 = vpop.xlane.xlu0 %2159  ;;  %v2216_v31 = vmul.f32 %v3937_v26, %v4560_v17 }
 0x387   : > { %3942 = vrcp.f32 %v2160_v29 }
 0x388   : > { %v4623_v7 = vpack.c.bf16 %v2216_v31, %v2215_v30 }
 0x389   : > { %v3939_v49 = vpop.eup %3938 }
 0x38a   : > { %3682 = vmatpush3.bf16.xpose.msra.mxu1 %v4623_v7  ;;  %v2162_v32 = vpop.xlane.xlu1 %2161  ;;  %v2217_v51 = vmul.f32 %v3939_v49, %v4563_v42 }
 0x38b   : > { %3944 = vrcp.f32 %v2162_v32  ;;  %3683 = vmatprep.subr.bf16.mxu1 %v4067_v34 }
 0x38d   : > { %v3941_v20 = vpop.eup %3940 }
 0x38e   : > { %v2164_v9 = vpop.xlane.xlu0 %2163  ;;  %v2218_v4 = vmul.f32 %v3941_v20, %v4566_v48 }
 0x38f   : > { %3946 = vrcp.f32 %v2164_v9 }
 0x390   : > { %v4629_v35 = vpack.c.bf16 %v2218_v4, %v2217_v51 }
 0x391   : > { %v3943_v17 = vpop.eup %3942 }
 0x392   : > { %3684 = vmatpush3.bf16.xpose.msra.mxu1 %v4629_v35  ;;  %v2166_v33 = vpop.xlane.xlu1 %2165  ;;  %v2219_v10 = vmul.f32 %v3943_v17, %v4569_v1 }
 0x393   : > { %3948 = vrcp.f32 %v2166_v33  ;;  %3685 = vmatprep.subr.bf16.mxu1 %v4067_v34 }
 0x395   : > { %v3945_v15 = vpop.eup %3944 }
 0x396   : > { %v2220_v0 = vmul.f32 %v3945_v15, %v4573_v14  ;;  %v2168_v8 = vpop.xlane.xlu0 %2167 }
 0x397   : > { %3950 = vrcp.f32 %v2168_v8 }
 0x398   : > { %v4635_v11 = vpack.c.bf16 %v2220_v0, %v2219_v10 }
 0x399   : > { %v3947_v48 = vpop.eup %3946 }
 0x39a   : > { %3686 = vmatpush3.bf16.xpose.msra.mxu1 %v4635_v11  ;;  %v2170_v42 = vpop.xlane.xlu1 %2169  ;;  %v2221_v55 = vmul.f32 %v3947_v48, %v4578_v24  ;;  %v2172_v1 = vpop.xlane.xlu0 %2171 }
 0x39b   : > { %3687 = vmatprep.subr.bf16.mxu1 %v4067_v34  ;;  %3952 = vrcp.f32 %v2170_v42 }
 0x39d   : > { %v3949_v40 = vpop.eup %3948 }
 0x39e   : > { %v2174_v45 = vpop.xlane.xlu1 %2173  ;;  %v2222_v59 = vmul.f32 %v3949_v40, %v4583_v21  ;;  %v2176_v61 = vpop.xlane.xlu0 %2175 }
 0x39f   : > { %3954 = vrcp.f32 %v2174_v45 }
 0x3a0   : > { %v4641_v14 = vpack.c.bf16 %v2222_v59, %v2221_v55  ;;  %3956 = vrcp.f32 %v2172_v1 }
 0x3a1   : > { %v3951_v3 = vpop.eup %3950 }
 0x3a2   : > { %3688 = vmatpush3.bf16.xpose.msra.mxu1 %v4641_v14  ;;  %v2178_v60 = vpop.xlane.xlu1 %2177  ;;  %v2223_v26 = vmul.f32 %v3951_v3, %v4587_v62  ;;  %v2180_v9 = vpop.xlane.xlu0 %2179 }
 0x3a3   : > { %3689 = vmatprep.subr.bf16.mxu1 %v4067_v34  ;;  %3958 = vrcp.f32 %v2178_v60 }
 0x3a4   : > { %3960 = vrcp.f32 %v2176_v61 }
 0x3a5   : > { %v3953_v5 = vpop.eup %3952 }
 0x3a6   : > { %v2182_v6 = vpop.xlane.xlu1 %2181  ;;  %v2224_v24 = vmul.f32 %v3953_v5, %v4594_v44 }
 0x3a7   : > { %3962 = vrcp.f32 %v2182_v6 }
 0x3a8   : > { %v2235_v21 = vpack.c.bf16 %v2224_v24, %v2223_v26  ;;  %3964 = vrcp.f32 %v2180_v9 }
 0x3a9   : > { %v3955_v29 = vpop.eup %3954 }
 0x3aa   : > { %v1675_v30 = vpop.permute.xlu1 %1674  ;;  %3690 = vmatpush3.bf16.xpose.msra.mxu1 %v2235_v21  ;;  %v3957_v32 = vpop.eup %3956  ;;  %v2226_v20 = vmul.f32 %v3955_v29, %v4600_v46 }
 0x3ab   : > { %v1726_v31 = vadd.f32 %v4528_v53, %v1675_v30  ;;  %3691 = vmatprep.subr.bf16.mxu1 %v4067_v34  ;;  %v2225_v62 = vmul.f32 %v3957_v32, %v4592_v39 }
 0x3ad   : > { %v1732_v49 = vmax.f32 %v1726_v31, 0.0  ;;  %v2236_v44 = vpack.c.bf16 %v2226_v20, %v2225_v62  ;;  %v3959_v33 = vpop.eup %3958 }
 0x3ae   : > { %v3961_v53 = vpop.eup %3960  ;;  %v2228_v39 = vmul.f32 %v3959_v33, %v4606_v13  ;;  %v1253_v13 = vpop.permute.xlu0 %1252 }
 0x3af   : > { %v2337_v51 = vpack.c.bf16 %v1732_v49, %v1732_v49  ;;  %v2227_v46 = vmul.f32 %v3961_v53, %v4598_v12  ;;  %v1293_v12 = vadd.f32 %v4380_v38, %v1253_v13  ;;  %v1728_v38 = vadd.f32 %v4530_v18, %v1675_v30 }
 0x3b1   : > { %3836 = vmatprep.subr.msk.bf16.mxu0 %vm1830_vm3, %v2337_v51  ;;  %v2488_v4 = vsel %vm1830_vm3, %v2337_v51, 0  ;;  %v2237_v17 = vpack.c.bf16 %v2228_v39, %v2227_v46  ;;  %v3963_v15 = vpop.eup %3962 }
 0x3b2   : > { %3740 = vmatpush3.bf16.msra.mxu0 %v2488_v4  ;;  %3692 = vmatpush3.bf16.xpose.msra.mxu1 %v2236_v44  ;;  %v3965_v10 = vpop.eup %3964  ;;  %v2230_v0 = vmul.f32 %v3963_v15, %v4610_v50 }
 0x3b3   : > { %3777 = vmatprep.subr.bf16.mxu0 %v4067_v34  ;;  %3693 = vmatprep.subr.bf16.mxu1 %v4067_v34 }
 0x3b5   : > { %3742 = vmatmul.mubr.msk.bf16.vlgmr.msra.gmra.mrb[60].mxu0 %vm1805_vm2, %v4378_v37  ;;  %v2229_v37 = vmul.f32 %v3965_v10, %v4604_v47 }
 0x3b6   : > { %3745 = vmatprep.mubr.msk.bf16.mxu0 %vm1805_vm2, %v4397_v58 }
 0x3b7   : > { %v2238_v58 = vpack.c.bf16 %v2230_v0, %v2229_v37 }
 0x3ba   : > { %3694 = vmatpush3.bf16.xpose.msra.mxu1 %v2237_v17 }
 0x3bb   : > { %3695 = vmatprep.subr.bf16.mxu1 %v4067_v34 }
 0x3bd   : > { %3746 = vmatmul.mubr.msk.bf16.gmra.mrb[64].mxu0 %vm1805_vm2, %v4395_v56  ;;  %v2239_v56 = vpack.c.bf16 %v1293_v12, %v1293_v12 }
 0x3be   : > { %3749 = vmatprep.mubr.msk.bf16.mxu0 %vm1805_vm2, %v4413_v22 }
 0x3c2   : > { %3696 = vmatpush3.bf16.xpose.msra.mxu1 %v2238_v58 }
 0x3c3   : > { %3701 = vmatprep.subr.bf16.mxu1 %v4067_v34 }
 0x3c5   : > { %3750 = vmatmul.mubr.msk.bf16.gmra.mrb[68].mxu0 %vm1805_vm2, %v4409_v19  ;;  %v1733_v19 = vmax.f32 %v1728_v38, 0.0 }
 0x3c6   : > { %3753 = vmatprep.mubr.msk.bf16.mxu0 %vm1805_vm2, %v4429_v57 }
 0x3c7   : > { %v2338_v22 = vpack.c.bf16 %v1733_v19, %v1733_v19 }
 0x3c9   : > { %3698 = vmatmul.mubr.bf16.vlgmr.msra.gmra.mrb[36].mxu1 %v2239_v56  ;;  %v2364_v47 = vsel %vm1830_vm3, %v2338_v22, 0 }
 0x3ca   : > { %3702 = vmatpush3.bf16.xpose.msra.mxu1 %v4623_v7  ;;  %3717 = vmatprep.mubr.msk.bf16.mxu1 %vm4068_vm4, %v4067_v34 }
 0x3cb   : > { %3703 = vmatprep.subr.bf16.mxu1 %v4067_v34 }
 0x3cd   : > { %3754 = vmatmul.mubr.msk.bf16.gmra.mrb[72].mxu0 %vm1805_vm2, %v4425_v52  ;;  %v1295_v52 = vadd.f32 %v4384_v41, %v1253_v13 }
 0x3ce   : > { %3793 = vmatprep.mubr.msk.bf16.mxu0 %vm4068_vm4, %v4067_v34 }
 0x3cf   : > { %v2240_v57 = vpack.c.bf16 %v1295_v52, %v1295_v52 }
 0x3d2   : > { %3704 = vmatpush3.bf16.xpose.msra.mxu1 %v4629_v35 }
 0x3d3   : > { %3705 = vmatprep.subr.bf16.mxu1 %v4067_v34 }
 0x3da   : > { %3706 = vmatpush3.bf16.xpose.msra.mxu1 %v4635_v11 }
 0x3db   : > { %3707 = vmatprep.subr.bf16.mxu1 %v4067_v34 }
 0x3e2   : > { %3708 = vmatpush3.bf16.xpose.msra.mxu1 %v4641_v14 }
 0x3e3   : > { %3709 = vmatprep.subr.bf16.mxu1 %v4067_v34 }
 0x3ea   : > { %3710 = vmatpush3.bf16.xpose.msra.mxu1 %v2235_v21 }
 0x3eb   : > { %3711 = vmatprep.subr.bf16.mxu1 %v4067_v34 }
 0x3f2   : > { %3712 = vmatpush3.bf16.xpose.msra.mxu1 %v2236_v44 }
 0x3f3   : > { %3713 = vmatprep.subr.bf16.mxu1 %v4067_v34 }
 0x3fa   : > { %3714 = vmatpush3.bf16.xpose.msra.mxu1 %v2237_v17 }
 0x3fb   : > { %3715 = vmatprep.subr.bf16.mxu1 %v4067_v34 }
 0x402   : > { %3716 = vmatpush3.bf16.xpose.msra.mxu1 %v2238_v58 }
 0x403   : > { %3835 = vmatprep.subr.msk.bf16.mxu1 %vm1830_vm3, %v2338_v22 }
 0x409   : > { %3718 = vmatmul.mubr.bf16.vlgmr.msra.gmra.mrb[40].mxu1 %v2240_v57 }
 0x40a   : > { %3722 = vmatpush3.bf16.msra.mxu1 %v2364_v47  ;;  %3723 = vmatprep.mubr.msk.bf16.mxu1 %vm1805_vm2, %v4445_v27 }
 0x40b   : > { %3757 = vmatprep.subr.bf16.mxu1 %v4067_v34 }
 0x411   : > { %3724 = vmatmul.mubr.msk.bf16.vlgmr.msra.gmra.mrb[44].mxu1 %vm1805_vm2, %v4441_v23 }
 0x412   : > { %3727 = vmatprep.mubr.msk.bf16.mxu1 %vm1805_vm2, %v4461_v2 }
 0x419   : > { %3728 = vmatmul.mubr.msk.bf16.gmra.mrb[48].mxu1 %vm1805_vm2, %v4457_v63 }
 0x41a   : > { %3731 = vmatprep.mubr.msk.bf16.mxu1 %vm1805_vm2, %v4475_v43 }
 0x421   : > { %3732 = vmatmul.mubr.msk.bf16.gmra.mrb[52].mxu1 %vm1805_vm2, %v4473_v36 }
 0x422   : > { %3735 = vmatprep.mubr.msk.bf16.mxu1 %vm1805_vm2, %v4488_v28 }
 0x429   : > { %3736 = vmatmul.mubr.msk.bf16.gmra.mrb[56].mxu1 %vm1805_vm2, %v4486_v16 }
 0x42a   : > { %3773 = vmatprep.mubr.msk.bf16.mxu1 %vm4068_vm4, %v4067_v34 }
 0x488   : > { %v3743_v41 = vpop.f32.mrb[60].mxu0 }
 0x489   : > { %v2524_v23 = vpop.f32.mrb[61].mxu0 }
 0x48a   : > { %v3744_v27 = vpop.f32.mrb[62].mxu0 }
 0x48b   : > { %v2527_v2 = vpop.f32.mrb[63].mxu0 }
 0x490   : > { %v3747_v63 = vpop.f32.mrb[64].mxu0 }
 0x491   : > { %v2540_v18 = vpop.f32.mrb[65].mxu0 }
 0x492   : > { %v3748_v50 = vpop.f32.mrb[66].mxu0 }
 0x493   : > { %v2543_v43 = vpop.f32.mrb[67].mxu0 }
 0x498   : > { %v3751_v7 = vpop.f32.mrb[68].mxu0 }
 0x499   : > { %v2556_v35 = vpop.f32.mrb[69].mxu0 }
 0x49a   : > { %v3752_v36 = vpop.f32.mrb[70].mxu0 }
 0x49b   : > { %v2559_v8 = vpop.f32.mrb[71].mxu0 }
 0x49c   : > { %v4714_v11 = vpop.f32.mrb[36].mxu1 }
 0x49d   : > { %v3699_v28 = vpop.f32.mrb[37].mxu1 }
 0x49e   : > { %v2278_v42 = vpop.f32.mrb[38].mxu1 }
 0x49f   : > { %v3700_v16 = vpop.f32.mrb[39].mxu1 }
 0x4a0   : > { %v3755_v48 = vpop.f32.mrb[72].mxu0 }
 0x4a1   : > { %v2572_v40 = vpop.f32.mrb[73].mxu0 }
 0x4a2   : > { %v3756_v45 = vpop.f32.mrb[74].mxu0 }
 0x4a3   : > { %v2575_v55 = vpop.f32.mrb[75].mxu0 }
 0x4dc   : > { %v4716_v59 = vpop.f32.mrb[40].mxu1 }
 0x4dd   : > { %v3719_v1 = vpop.f32.mrb[41].mxu1 }
 0x4de   : > { %v2318_v14 = vpop.f32.mrb[42].mxu1 }
 0x4df   : > { %v3720_v60 = vpop.f32.mrb[43].mxu1 }
 0x4e4   : > { %v3725_v3 = vpop.f32.mrb[44].mxu1 }
 0x4e5   : > { %v2533_v5 = vadd.f32 %v3743_v41, %v3725_v3  ;;  %v2400_v6 = vpop.f32.mrb[45].mxu1 }
 0x4e6   : > { %v2525_v61 = vadd.f32 %v2524_v23, %v2400_v6  ;;  %v3726_v26 = vpop.f32.mrb[46].mxu1 }
 0x4e7   : > { %v2536_v24 = vadd.f32 %v3744_v27, %v3726_v26  ;;  %v2403_v21 = vpop.f32.mrb[47].mxu1  ;;  %v2589_v51 = vmul.f32 0.35355338, %v2533_v5 }
 0x4e8   : > { %v2587_v29 = vmul.f32 0.35355338, %v2525_v61  ;;  %v2528_v30 = vadd.f32 %v2527_v2, %v2403_v21 }
 0x4e9   : > { %v4718_v32 = vmul.f32 0.35355338, %v2536_v24 }
 0x4ea   : > { %v2588_v31 = vmul.f32 0.35355338, %v2528_v30  ;;  %2603 = vmax.xlane.f32.xlu1 %v2587_v29 }
 0x4ec   : > { %v3729_v49 = vpop.f32.mrb[48].mxu1  ;;  %2605 = vmax.xlane.f32.xlu0 %v2588_v31 }
 0x4ed   : > { %v2549_v20 = vadd.f32 %v3747_v63, %v3729_v49  ;;  %v2416_v9 = vpop.f32.mrb[49].mxu1 }
 0x4ee   : > { %v2541_v62 = vadd.f32 %v2540_v18, %v2416_v9  ;;  %v3730_v44 = vpop.f32.mrb[50].mxu1  ;;  %2609 = vmax.xlane.f32.xlu1 %v4718_v32 }
 0x4ef   : > { %v2552_v4 = vadd.f32 %v3748_v50, %v3730_v44  ;;  %v2419_v33 = vpop.f32.mrb[51].mxu1  ;;  %v4721_v0 = vmul.f32 0.35355338, %v2549_v20 }
 0x4f0   : > { %v2544_v53 = vadd.f32 %v2543_v43, %v2419_v33  ;;  %2607 = vmax.xlane.f32.xlu0 %v2589_v51  ;;  %v2591_v39 = vmul.f32 0.35355338, %v2541_v62 }
 0x4f1   : > { %v4723_v37 = vmul.f32 0.35355338, %v2552_v4 }
 0x4f2   : > { %v2592_v46 = vmul.f32 0.35355338, %v2544_v53 }
 0x4f4   : > { %v3733_v17 = vpop.f32.mrb[52].mxu1  ;;  %2611 = vmax.xlane.f32.xlu0 %v2591_v39  ;;  %2613 = vmax.xlane.f32.xlu1 %v2592_v46 }
 0x4f5   : > { %v2565_v15 = vadd.f32 %v3751_v7, %v3733_v17  ;;  %v2432_v10 = vpop.f32.mrb[53].mxu1 }
 0x4f6   : > { %v2557_v13 = vadd.f32 %v2556_v35, %v2432_v10  ;;  %v3734_v58 = vpop.f32.mrb[54].mxu1 }
 0x4f7   : > { %v2568_v12 = vadd.f32 %v3752_v36, %v3734_v58  ;;  %v2435_v56 = vpop.f32.mrb[55].mxu1  ;;  %v4733_v41 = vmul.f32 0.35355338, %v2565_v15 }
 0x4f8   : > { %v2560_v38 = vadd.f32 %v2559_v8, %v2435_v56  ;;  %2615 = vmax.xlane.f32.xlu0 %v4721_v0  ;;  %2617 = vmax.xlane.f32.xlu1 %v4723_v37  ;;  %v4727_v19 = vmul.f32 0.35355338, %v2557_v13 }
 0x4f9   : > { %v4735_v23 = vmul.f32 0.35355338, %v2568_v12 }
 0x4fa   : > { %v4729_v22 = vmul.f32 0.35355338, %v2560_v38 }
 0x4fc   : > { %v3737_v52 = vpop.f32.mrb[56].mxu1  ;;  %2619 = vmax.xlane.f32.xlu0 %v4727_v19  ;;  %2621 = vmax.xlane.f32.xlu1 %v4729_v22 }
 0x4fd   : > { %v2581_v57 = vadd.f32 %v3755_v48, %v3737_v52  ;;  %v2448_v47 = vpop.f32.mrb[57].mxu1 }
 0x4fe   : > { %v2573_v27 = vadd.f32 %v2572_v40, %v2448_v47  ;;  %v3738_v2 = vpop.f32.mrb[58].mxu1 }
 0x4ff   : > { %v2584_v63 = vadd.f32 %v3756_v45, %v3738_v2  ;;  %v2451_v18 = vpop.f32.mrb[59].mxu1  ;;  %v4745_v35 = vmul.f32 0.35355338, %v2581_v57 }
 0x500   : > { %v2576_v50 = vadd.f32 %v2575_v55, %v2451_v18  ;;  %2623 = vmax.xlane.f32.xlu0 %v4733_v41  ;;  %2625 = vmax.xlane.f32.xlu1 %v4735_v23  ;;  %v4739_v43 = vmul.f32 0.35355338, %v2573_v27 }
 0x501   : > { %v4747_v36 = vmul.f32 0.35355338, %v2584_v63 }
 0x502   : > { %v4741_v7 = vmul.f32 0.35355338, %v2576_v50 }
 0x504   : > { %2627 = vmax.xlane.f32.xlu0 %v4739_v43  ;;  %2629 = vmax.xlane.f32.xlu1 %v4741_v7 }
 0x508   : > { %2631 = vmax.xlane.f32.xlu0 %v4745_v35  ;;  %2633 = vmax.xlane.f32.xlu1 %v4747_v36 }
 0x577   : > { %v2604_v8 = vpop.xlane.xlu1 %2603 }
 0x578   : > { %v2635_v28 = vsub.f32 %v2587_v29, %v2604_v8 }
 0x579   : > { %v2606_v42 = vpop.xlane.xlu0 %2605 }
 0x57a   : > { %v2651_v16 = vmul.f32 1.442695, %v2635_v28  ;;  %v2636_v48 = vsub.f32 %v2588_v31, %v2606_v42 }
 0x57b   : > { %v2610_v40 = vpop.xlane.xlu1 %2609 }
 0x57c   : > { %3966 = vpow2.f32 %v2651_v16  ;;  %v2653_v45 = vmul.f32 1.442695, %v2636_v48  ;;  %v2638_v55 = vsub.f32 %v4718_v32, %v2610_v40  ;;  %v3016_v40 = vld [vmem:[%s4896_s8] sm:$0x3] }
 0x57d   : > { %v2608_v1 = vpop.xlane.xlu0 %2607 }
 0x57e   : > { %3968 = vpow2.f32 %v2653_v45  ;;  %v2657_v14 = vmul.f32 1.442695, %v2638_v55  ;;  %v2637_v60 = vsub.f32 %v2589_v51, %v2608_v1  ;;  %v3419_v45 = vld [vmem:[%s4894_s6 + $0xc] sm:$0xf] }
 0x580   : > { %v2655_v3 = vmul.f32 1.442695, %v2637_v60  ;;  %3970 = vpow2.f32 %v2657_v14 }
 0x581   : > { %v2612_v5 = vpop.xlane.xlu0 %2611  ;;  %v2614_v6 = vpop.xlane.xlu1 %2613 }
 0x582   : > { %3972 = vpow2.f32 %v2655_v3  ;;  %v2639_v61 = vsub.f32 %v2591_v39, %v2612_v5  ;;  %v2640_v26 = vsub.f32 %v2592_v46, %v2614_v6 }
 0x584   : > { %v2659_v24 = vmul.f32 1.442695, %v2639_v61  ;;  %v2661_v21 = vmul.f32 1.442695, %v2640_v26 }
 0x585   : > { %v2616_v29 = vpop.xlane.xlu0 %2615  ;;  %v2618_v30 = vpop.xlane.xlu1 %2617 }
 0x586   : > { %v4752_v31 = vpop.eup %3966  ;;  %3974 = vpow2.f32 %v2659_v24  ;;  %v2641_v32 = vsub.f32 %v4721_v0, %v2616_v29  ;;  %v2642_v49 = vsub.f32 %v4723_v37, %v2618_v30 }
 0x587   : > { %3976 = vpow2.f32 %v2661_v21  ;;  %2683 = vadd.xlane.f32.xlu0 %v4752_v31 }
 0x588   : > { %v4757_v20 = vpop.eup %3968  ;;  %v2663_v9 = vmul.f32 1.442695, %v2641_v32  ;;  %v2665_v51 = vmul.f32 1.442695, %v2642_v49 }
 0x589   : > { %v2620_v62 = vpop.xlane.xlu0 %2619  ;;  %2685 = vadd.xlane.f32.xlu1 %v4757_v20  ;;  %v2622_v44 = vpop.xlane.xlu1 %2621 }
 0x58a   : > { %3978 = vpow2.f32 %v2663_v9  ;;  %v2643_v4 = vsub.f32 %v4727_v19, %v2620_v62  ;;  %v2644_v33 = vsub.f32 %v4729_v22, %v2622_v44  ;;  %v4762_v53 = vpop.eup %3970 }
 0x58b   : > { %3980 = vpow2.f32 %v2665_v51 }
 0x58c   : > { %v4764_v39 = vpop.eup %3972  ;;  %v2667_v46 = vmul.f32 1.442695, %v2643_v4  ;;  %v2669_v17 = vmul.f32 1.442695, %v2644_v33 }
 0x58d   : > { %v2624_v15 = vpop.xlane.xlu0 %2623  ;;  %2687 = vadd.xlane.f32.xlu0 %v4764_v39  ;;  %2689 = vadd.xlane.f32.xlu1 %v4762_v53  ;;  %v2626_v10 = vpop.xlane.xlu1 %2625 }
 0x58e   : > { %3982 = vpow2.f32 %v2667_v46  ;;  %v2645_v0 = vsub.f32 %v4733_v41, %v2624_v15  ;;  %v2646_v37 = vsub.f32 %v4735_v23, %v2626_v10 }
 0x58f   : > { %3984 = vpow2.f32 %v2669_v17 }
 0x590   : > { %v4770_v13 = vpop.eup %3974  ;;  %v2671_v58 = vmul.f32 1.442695, %v2645_v0  ;;  %v2673_v12 = vmul.f32 1.442695, %v2646_v37 }
 0x591   : > { %v4772_v56 = vpop.eup %3976  ;;  %v2628_v38 = vpop.xlane.xlu0 %2627  ;;  %2691 = vadd.xlane.f32.xlu0 %v4770_v13 }
 0x592   : > { %v2630_v19 = vpop.xlane.xlu1 %2629  ;;  %3986 = vpow2.f32 %v2671_v58  ;;  %v2647_v22 = vsub.f32 %v4739_v43, %v2628_v38  ;;  %2693 = vadd.xlane.f32.xlu1 %v4772_v56 }
 0x593   : > { %v2648_v52 = vsub.f32 %v4741_v7, %v2630_v19  ;;  %3988 = vpow2.f32 %v2673_v12 }
 0x594   : > { %v4778_v57 = vpop.eup %3978  ;;  %v2675_v47 = vmul.f32 1.442695, %v2647_v22 }
 0x595   : > { %v2677_v41 = vmul.f32 1.442695, %v2648_v52  ;;  %v4780_v23 = vpop.eup %3980  ;;  %v2632_v27 = vpop.xlane.xlu0 %2631  ;;  %2695 = vadd.xlane.f32.xlu0 %v4778_v57 }
 0x596   : > { %v2634_v2 = vpop.xlane.xlu1 %2633  ;;  %3990 = vpow2.f32 %v2675_v47  ;;  %v2649_v63 = vsub.f32 %v4745_v35, %v2632_v27  ;;  %2697 = vadd.xlane.f32.xlu1 %v4780_v23 }
 0x597   : > { %v2650_v18 = vsub.f32 %v4747_v36, %v2634_v2  ;;  %3992 = vpow2.f32 %v2677_v41 }
 0x598   : > { %v4786_v50 = vpop.eup %3982  ;;  %v2679_v43 = vmul.f32 1.442695, %v2649_v63 }
 0x599   : > { %v2681_v7 = vmul.f32 1.442695, %v2650_v18  ;;  %v4788_v8 = vpop.eup %3984  ;;  %2699 = vadd.xlane.f32.xlu0 %v4786_v50 }
 0x59a   : > { %3994 = vpow2.f32 %v2679_v43  ;;  %2701 = vadd.xlane.f32.xlu1 %v4788_v8 }
 0x59b   : > { %3996 = vpow2.f32 %v2681_v7 }
 0x59c   : > { %v4792_v28 = vpop.eup %3986 }
 0x59d   : > { %v4794_v35 = vpop.eup %3988  ;;  %2703 = vadd.xlane.f32.xlu0 %v4792_v28 }
 0x59e   : > { %2705 = vadd.xlane.f32.xlu1 %v4794_v35 }
 0x5a0   : > { %v4798_v36 = vpop.eup %3990 }
 0x5a1   : > { %v4800_v42 = vpop.eup %3992  ;;  %2707 = vadd.xlane.f32.xlu0 %v4798_v36 }
 0x5a2   : > { %2709 = vadd.xlane.f32.xlu1 %v4800_v42 }
 0x5a4   : > { %v4804_v16 = vpop.eup %3994 }
 0x5a5   : > { %v4806_v48 = vpop.eup %3996  ;;  %2711 = vadd.xlane.f32.xlu0 %v4804_v16 }
 0x5a6   : > { %2713 = vadd.xlane.f32.xlu1 %v4806_v48 }
 0x5b7   : > { %3019 = vperm.xlu1 %3865, %v3016_v40  }
 0x5bb   : > { %1740 = vperm.xlu0 %3864, %v3419_v45  }
 0x614   : > { %v2684_v55 = vpop.xlane.xlu0 %2683 }
 0x615   : > { %3998 = vrcp.f32 %v2684_v55 }
 0x616   : > { %v2686_v1 = vpop.xlane.xlu1 %2685 }
 0x617   : > { %4000 = vrcp.f32 %v2686_v1 }
 0x61a   : > { %v2688_v14 = vpop.xlane.xlu0 %2687  ;;  %v2690_v60 = vpop.xlane.xlu1 %2689 }
 0x61b   : > { %4002 = vrcp.f32 %v2688_v14 }
 0x61c   : > { %4004 = vrcp.f32 %v2690_v60 }
 0x61e   : > { %v2692_v5 = vpop.xlane.xlu0 %2691 }
 0x61f   : > { %v3999_v3 = vpop.eup %3998  ;;  %v2694_v6 = vpop.xlane.xlu1 %2693  ;;  %4006 = vrcp.f32 %v2692_v5 }
 0x620   : > { %v2747_v26 = vmul.f32 %v3999_v3, %v4752_v31  ;;  %4008 = vrcp.f32 %v2694_v6 }
 0x621   : > { %v4001_v61 = vpop.eup %4000 }
 0x622   : > { %v2748_v24 = vmul.f32 %v4001_v61, %v4757_v20  ;;  %v2696_v32 = vpop.xlane.xlu0 %2695 }
 0x623   : > { %v2698_v49 = vpop.xlane.xlu1 %2697  ;;  %4010 = vrcp.f32 %v2696_v32 }
 0x624   : > { %v2763_v21 = vpack.c.bf16 %v2748_v24, %v2747_v26  ;;  %4012 = vrcp.f32 %v2698_v49  ;;  %v2853_v24 = vld [vmem:[%s4895_s7] sm:$0x3] }
 0x625   : > { %v4003_v29 = vpop.eup %4002 }
 0x626   : > { %v4005_v30 = vpop.eup %4004  ;;  %3758 = vmatpush3.bf16.xpose.msra.mxu1 %v2763_v21  ;;  %3778 = vmatpush3.bf16.xpose.msra.mxu0 %v2763_v21  ;;  %v2749_v9 = vmul.f32 %v4003_v29, %v4764_v39  ;;  %v2700_v44 = vpop.xlane.xlu0 %2699 }
 0x627   : > { %3759 = vmatprep.subr.bf16.mxu1 %v4067_v34  ;;  %3779 = vmatprep.subr.bf16.mxu0 %v4067_v34  ;;  %v2750_v51 = vmul.f32 %v4005_v30, %v4762_v53  ;;  %v2702_v4 = vpop.xlane.xlu1 %2701  ;;  %4014 = vrcp.f32 %v2700_v44 }
 0x628   : > { %4016 = vrcp.f32 %v2702_v4 }
 0x629   : > { %v4007_v31 = vpop.eup %4006  ;;  %v2764_v20 = vpack.c.bf16 %v2750_v51, %v2749_v9 }
 0x62a   : > { %v4009_v62 = vpop.eup %4008  ;;  %v2751_v33 = vmul.f32 %v4007_v31, %v4770_v13  ;;  %v2704_v15 = vpop.xlane.xlu0 %2703 }
 0x62b   : > { %v2752_v46 = vmul.f32 %v4009_v62, %v4772_v56  ;;  %v2706_v10 = vpop.xlane.xlu1 %2705  ;;  %4018 = vrcp.f32 %v2704_v15 }
 0x62c   : > { %4020 = vrcp.f32 %v2706_v10 }
 0x62d   : > { %v4011_v53 = vpop.eup %4010  ;;  %v2765_v39 = vpack.c.bf16 %v2752_v46, %v2751_v33 }
 0x62e   : > { %3760 = vmatpush3.bf16.xpose.msra.mxu1 %v2764_v20  ;;  %3780 = vmatpush3.bf16.xpose.msra.mxu0 %v2764_v20  ;;  %v4013_v17 = vpop.eup %4012  ;;  %v2753_v0 = vmul.f32 %v4011_v53, %v4778_v57  ;;  %v2708_v56 = vpop.xlane.xlu0 %2707 }
 0x62f   : > { %3761 = vmatprep.subr.bf16.mxu1 %v4067_v34  ;;  %3781 = vmatprep.subr.bf16.mxu0 %v4067_v34  ;;  %v2754_v37 = vmul.f32 %v4013_v17, %v4780_v23  ;;  %v2710_v38 = vpop.xlane.xlu1 %2709  ;;  %4022 = vrcp.f32 %v2708_v56  ;;  %v3069_v56 = vlaneseq }
 0x630   : > { %4024 = vrcp.f32 %v2710_v38 }
 0x631   : > { %v4015_v13 = vpop.eup %4014  ;;  %v2766_v58 = vpack.c.bf16 %v2754_v37, %v2753_v0  ;;  %v3070_v38 = vshrl.u32 %v3069_v56, 7 }
 0x632   : > { %v4017_v12 = vpop.eup %4016  ;;  %v2755_v19 = vmul.f32 %v4015_v13, %v4786_v50  ;;  %v2712_v41 = vpop.xlane.xlu0 %2711 }
 0x633   : > { %v2756_v22 = vmul.f32 %v4017_v12, %v4788_v8  ;;  %v2714_v23 = vpop.xlane.xlu1 %2713  ;;  %4026 = vrcp.f32 %v2712_v41  ;;  %v3089_v41 = vsub.s32 1, %v3070_v38 }
 0x634   : > { %4028 = vrcp.f32 %v2714_v23 }
 0x635   : > { %v4019_v52 = vpop.eup %4018  ;;  %v2767_v57 = vpack.c.bf16 %v2756_v22, %v2755_v19  ;;  %v3071_v19 = vsub.s32 0, %v3070_v38 }
 0x636   : > { %3762 = vmatpush3.bf16.xpose.msra.mxu1 %v2765_v39  ;;  %3782 = vmatpush3.bf16.xpose.msra.mxu0 %v2765_v39  ;;  %v4021_v47 = vpop.eup %4020  ;;  %v2757_v27 = vmul.f32 %v4019_v52, %v4792_v28 }
 0x637   : > { %3763 = vmatprep.subr.bf16.mxu1 %v4067_v34  ;;  %3783 = vmatprep.subr.bf16.mxu0 %v4067_v34  ;;  %v2758_v2 = vmul.f32 %v4021_v47, %v4794_v35  ;;  %v3020_v21 = vpop.permute.xlu1 %3019 }
 0x639   : > { %v4023_v63 = vpop.eup %4022  ;;  %v2768_v18 = vpack.c.bf16 %v2758_v2, %v2757_v27 }
 0x63a   : > { %v4025_v50 = vpop.eup %4024  ;;  %v2759_v43 = vmul.f32 %v4023_v63, %v4798_v36  ;;  %v1741_v55 = vpop.permute.xlu0 %1740 }
 0x63b   : > { %v2760_v7 = vmul.f32 %v4025_v50, %v4800_v42  ;;  %v1781_v36 = vadd.f32 %v4532_v54, %v1741_v55  ;;  %v1783_v42 = vadd.f32 %v4534_v25, %v1741_v55  ;;  %v3461_v50 = vld [vmem:[%s741_s12 + $0x10] sm:$0xff] }
 0x63d   : > { %v4027_v8 = vpop.eup %4026  ;;  %v2769_v40 = vpack.c.bf16 %v2760_v7, %v2759_v43  ;;  %v2771_v14 = vpack.c.bf16 %v1781_v36, %v1781_v36  ;;  %v2772_v60 = vpack.c.bf16 %v1783_v42, %v1783_v42 }
 0x63e   : > { %3764 = vmatpush3.bf16.xpose.msra.mxu1 %v2766_v58  ;;  %3784 = vmatpush3.bf16.xpose.msra.mxu0 %v2766_v58  ;;  %v4029_v28 = vpop.eup %4028  ;;  %v2761_v35 = vmul.f32 %v4027_v8, %v4804_v16  ;;  %v3454_v16 = vld [vmem:[%s4895_s7 + $0x2] sm:$0x3] }
 0x63f   : > { %3765 = vmatprep.subr.bf16.mxu1 %v4067_v34  ;;  %3785 = vmatprep.subr.bf16.mxu0 %v4067_v34  ;;  %v2762_v45 = vmul.f32 %v4029_v28, %v4806_v48  ;;  %v3462_v28 = vld [vmem:[%s741_s12 + $0x18] sm:$0xff] }
 0x641   : > { %v2770_v1 = vpack.c.bf16 %v2762_v45, %v2761_v35 }
 0x646   : > { %3766 = vmatpush3.bf16.xpose.msra.mxu1 %v2767_v57  ;;  %3786 = vmatpush3.bf16.xpose.msra.mxu0 %v2767_v57 }
 0x647   : > { %3767 = vmatprep.subr.bf16.mxu1 %v4067_v34  ;;  %3787 = vmatprep.subr.bf16.mxu0 %v4067_v34 }
 0x64e   : > { %3768 = vmatpush3.bf16.xpose.msra.mxu1 %v2768_v18  ;;  %3788 = vmatpush3.bf16.xpose.msra.mxu0 %v2768_v18  ;;  %v3062_v18 = vld [vmem:[%s741_s12] sm:$0xff] }
 0x64f   : > { %3769 = vmatprep.subr.bf16.mxu1 %v4067_v34  ;;  %3789 = vmatprep.subr.bf16.mxu0 %v4067_v34 }
 0x656   : > { %3770 = vmatpush3.bf16.xpose.msra.mxu1 %v2769_v40  ;;  %3790 = vmatpush3.bf16.xpose.msra.mxu0 %v2769_v40  ;;  %v3063_v40 = vld [vmem:[%s741_s12 + $0x8] sm:$0xff] }
 0x657   : > { %3771 = vmatprep.subr.bf16.mxu1 %v4067_v34  ;;  %3791 = vmatprep.subr.bf16.mxu0 %v4067_v34 }
 0x65e   : > { %3772 = vmatpush3.bf16.xpose.msra.mxu1 %v2770_v1  ;;  %3792 = vmatpush3.bf16.xpose.msra.mxu0 %v2770_v1 }
 0x665   : > { %3774 = vmatmul.mubr.bf16.vlgmr.msra.gmra.mrb[60].mxu1 %v2771_v14  ;;  %3794 = vmatmul.mubr.bf16.vlgmr.msra.gmra.mrb[76].mxu0 %v2772_v60 }
 0x666   : > { %2929 = vmatprep.mubr.f32.mxu1 %v4067_v34 }
 0x738   : > { %v2807_v3 = vpop.f32.mrb[60].mxu1  ;;  %v2847_v5 = vpop.f32.mrb[76].mxu0 }
 0x739   : > { %v3775_v48 = vpop.f32.mrb[61].mxu1  ;;  %v3795_v6 = vpop.f32.mrb[77].mxu0  ;;  %3455 = vmatprep.subr.msk.mxu1 %vm985_vm0, %v2847_v5 }
 0x73a   : > { %v2810_v61 = vpop.f32.mrb[62].mxu1  ;;  %v2850_v54 = vpop.f32.mrb[78].mxu0  ;;  %3456 = vmatpush1.msk.msra.mxu1 %vm985_vm0, %v2807_v3 }
 0x73b   : > { %v3776_v25 = vpop.f32.mrb[63].mxu1  ;;  %v3796_v26 = vpop.f32.mrb[79].mxu0  ;;  %3457 = vmatmul.mubr.msk.f32.vlgmr.msra.gmra.mrb[64].mxu1 %vm1805_vm2, %v3454_v16  ;;  %3458 = vmatprep.subr.msk.mxu1 %vm985_vm0, %v4716_v59 }
 0x73c   : > { %3459 = vmatpush1.msk.msra.mxu1 %vm985_vm0, %v4714_v11  ;;  %3009 = vmatprep.mubr.f32.mxu1 %v4067_v34 }
 0x743   : > { %3460 = vmatmul.mubr.msk.f32.vlgmr.msra.gmra.mrb[64].mxu1 %vm1805_vm2, %v2853_v24 }
 0x816   : > { %v3011_v29 = vpop.f32.mrb[64].mxu1 }
 0x817   : > { %v3022_v30 = vadd.f32 %v3020_v21, %v3011_v29  ;;  %v3013_v32 = vpop.f32.mrb[65].mxu1 }
 0x818   : > { %v3023_v49 = vadd.f32 %v3020_v21, %v3013_v32 }
 0x819   : > { %v3026_v9 = vrot.slane %v3022_v30, 1 }
 0x81a   : > { %v3027_v51 = vrot.slane %v3023_v49, 1 }
 0x81b   : > { %v3030_v31 = vmax.f32 %v3022_v30, %v3026_v9 }
 0x81c   : > { %v3031_v59 = vmax.f32 %v3023_v49, %v3027_v51 }
 0x81d   : > { %v3032_v20 = vsub.f32 %v3022_v30, %v3030_v31  ;;  %v3040_v62 = vrot.slane %v3030_v31, 7 }
 0x81e   : > { %v3033_v11 = vsub.f32 %v3023_v49, %v3031_v59  ;;  %v3041_v44 = vrot.slane %v3031_v59, 7 }
 0x81f   : > { %v3044_v34 = vsub.f32 %v3022_v30, %v3040_v62  ;;  %v3034_v33 = vmul.f32 1.442695, %v3032_v20 }
 0x820   : > { %v3045_v4 = vsub.f32 %v3023_v49, %v3041_v44  ;;  %v3036_v53 = vmul.f32 1.442695, %v3033_v11 }
 0x821   : > { %v3046_v46 = vmul.f32 1.442695, %v3044_v34 }
 0x822   : > { %v3048_v39 = vmul.f32 1.442695, %v3045_v4 }
 0x823   : > { %4030 = vpow2.f32 %v3046_v46 }
 0x824   : > { %4032 = vpow2.f32 %v3048_v39 }
 0x825   : > { %4034 = vpow2.f32 %v3034_v33 }
 0x826   : > { %4036 = vpow2.f32 %v3036_v53 }
 0x82d   : > { %v4031_v17 = vpop.eup %4030 }
 0x82e   : > { %v4033_v15 = vpop.eup %4032  ;;  %v3052_v10 = vrot.slane %v4031_v17, 1 }
 0x82f   : > { %v4035_v0 = vpop.eup %4034  ;;  %v3053_v37 = vrot.slane %v4033_v15, 1 }
 0x830   : > { %v4037_v13 = vpop.eup %4036  ;;  %v3056_v58 = vadd.f32 %v4035_v0, %v3052_v10 }
 0x831   : > { %v3057_v12 = vadd.f32 %v4037_v13, %v3053_v37 }
 0x832   : > { %4038 = vrcp.f32 %v3056_v58 }
 0x833   : > { %4040 = vrcp.f32 %v3057_v12 }
 0x83c   : > { %v4039_v22 = vpop.eup %4038 }
 0x83d   : > { %v4041_v52 = vpop.eup %4040  ;;  %v3067_v57 = vmul.f32 %v4039_v22, %v4035_v0  ;;  %v3081_v47 = vrot.slane %v4039_v22, 7 }
 0x83e   : > { %v3068_v23 = vmul.f32 %v4041_v52, %v4037_v13  ;;  %v3082_v27 = vrot.slane %v4041_v52, 7 }
 0x83f   : > { %v3072_v2 = vrot.slane %v3067_v57, %v3071_v19  ;;  %v3085_v63 = vmul.f32 %v4031_v17, %v3081_v47 }
 0x840   : > { %v3076_v43 = vrot.slane %v3068_v23, %v3071_v19  ;;  %v3086_v7 = vmul.f32 %v4033_v15, %v3082_v27 }
 0x841   : > { %v3090_v8 = vrot.slane %v3085_v63, %v3089_v41  ;;  %v3077_v45 = vmul.f32 %v3072_v2, %v3062_v18 }
 0x842   : > { %v3094_v35 = vrot.slane %v3086_v7, %v3089_v41  ;;  %v3078_v1 = vmul.f32 %v3076_v43, %v3063_v40 }
 0x843   : > { %v3095_v55 = vmul.f32 %v3461_v50, %v3090_v8 }
 0x844   : > { %v3096_v36 = vmul.f32 %v3462_v28, %v3094_v35 }
 0x845   : > { %v3097_v42 = vadd.f32 %v3095_v55, %v3077_v45 }
 0x846   : > { %v3098_v14 = vadd.f32 %v3096_v36, %v3078_v1 }
 0x847   : > { %3099 = vst [vmem:[%s813_s14] sm:$0xff] %v3097_v42  ;;  %v3101_v60 = vadd.f32 %v3097_v42, %v3062_v18  ;;  %v3109_v3 = vadd.f32 %v3461_v50, %v3097_v42 }
 0x848   : > { %3100 = vst [vmem:[%s813_s14 + $0x8] sm:$0xff] %v3098_v14  ;;  %v3102_v5 = vadd.f32 %v3098_v14, %v3063_v40  ;;  %v3110_v16 = vadd.f32 %v3462_v28, %v3098_v14 }
 0x849   : > { %v3103_v48 = vmul.f32 0.5, %v3101_v60  ;;  %v3111_v6 = vmul.f32 0.5, %v3109_v3 }
 0x84a   : > { %v3104_v61 = vmul.f32 0.5, %v3102_v5  ;;  %v3112_v54 = vmul.f32 0.5, %v3110_v16 }
 0x84b   : > { %v3105_v25 = vmax.f32 %v3103_v48, 0.0  ;;  %v3113_v26 = vmax.f32 %v3111_v6, 0.0 }
 0x84c   : > { %v3106_v24 = vmax.f32 %v3104_v61, 0.0  ;;  %v3114_v21 = vmax.f32 %v3112_v54, 0.0 }
 0x84d   : > { %3107 = vst [vmem:[%s803_s25] sm:$0xff] %v3105_v25  ;;  %3115 = vst [vmem:[%s808_s26] sm:$0xff] %v3113_v26 }
 0x84e   : > { %3108 = vst [vmem:[%s803_s25 + $0x8] sm:$0xff] %v3106_v24  ;;  %3116 = vst [vmem:[%s808_s26 + $0x8] sm:$0xff] %v3114_v21 }
 0x84f PF: > { %p19_p9 = scmp.ge.s32.totalorder %s4146_s21, 4   ;;  %s4901_s17 = smov %s4060_s18 }
 0x850   : > { %s4902_s18 = smov %s4155_s24  ;;  %s4903_s19 = smov %s4146_s21 }
 0x851   :  { %21 = sbr.rel (!%p19_p9) target bundleno = 2 (0x2), region = 245 }

</bundles_post_ra>
